<compile_context>
chip_gen: v5e
topology: v5e:2x2
jax: 0.10.0
libtpu: 0.0.40
codegen_flags: <defaults>
</compile_context>

<pallas_src>
import jax
import jax.numpy as jnp
from jax import lax
from jax.experimental import pallas as pl
from jax.experimental.pallas import tpu as pltpu


def _round_up(n, m):
    return ((n + m - 1) // m) * m


def _sine_layer_kernel(x_ref, w_ref, b_ref, o_ref):
    # x_ref: (tm, in_f), w_ref: (in_f, out_fp), b_ref: (1, out_fp), o_ref: (tm, out_fp)
    # omega_0 is already folded into w_ref / b_ref by the wrapper.
    y = jnp.dot(x_ref[...], w_ref[...], preferred_element_type=jnp.float32)
    o_ref[...] = jnp.sin(y + b_ref[...]).astype(o_ref.dtype)


def sine_layer(x, weight, bias, *, omega_0=30.0, tm=2048, out_dtype=None):
    """SIREN SineLayer forward: sin(omega_0 * (x @ W^T + b)).

    x:      [B, in_f]      f32
    weight: [out_f, in_f]  f32 (nn.Linear convention; NOT pre-transposed)
    bias:   [out_f]        f32
    """
    B, in_f = x.shape
    out_f, in_f_w = weight.shape
    assert in_f == in_f_w
    assert bias.shape == (out_f,)
    out_dtype = jnp.dtype(x.dtype if out_dtype is None else out_dtype)

    # Fold omega_0 into the tiny, batch-reused parameters and pre-transpose W
    # once so the in-kernel contraction is a plain (tm,K)x(K,N) dot.
    w_t = (jnp.float32(omega_0) * weight.astype(jnp.float32)).T        # (in_f, out_f)
    b_s = (jnp.float32(omega_0) * bias.astype(jnp.float32)).reshape(1, out_f)

    # Lane-dense output: pad out_f to a multiple of 128 (zero columns -> sin(0)=0
    # in the padded region, sliced off below).
    out_fp = _round_up(out_f, 128)
    if out_fp != out_f:
        w_t = jnp.pad(w_t, ((0, 0), (0, out_fp - out_f)))
        b_s = jnp.pad(b_s, ((0, 0), (0, out_fp - out_f)))

    # Batch: pad only to a multiple of 8 (sublane); Pallas masks the tail tile.
    Bp = _round_up(B, 8)
    if Bp != B:
        x = jnp.pad(x.astype(jnp.float32), ((0, Bp - B), (0, 0)))
    else:
        x = x.astype(jnp.float32)

    # Batch tile: as large as possible, but
    #   * no bigger than the padded batch,
    #   * >= 2 grid steps along the parallel axis when possible (v7x has 2 TCs),
    #   * double-buffered working set <= ~40 MiB (fits v7x's 64 MiB VMEM).
    tm = max(8, _round_up(min(tm, Bp), 8))
    if Bp > 8 and pl.cdiv(Bp, tm) < 2:
        tm = max(8, _round_up(pl.cdiv(Bp, 2), 8))

    def _working_set_bytes(tm_):
        return 2 * (tm_ * in_f * 4                      # x tile (double-buffered)
                    + tm_ * out_fp * out_dtype.itemsize  # out tile
                    + in_f * out_fp * 4                  # resident W (conservative x2)
                    + 8 * out_fp * 4)                    # bias (padded rows)

    while _working_set_bytes(tm) > (40 << 20) and tm > 8:
        tm = max(8, _round_up(tm // 2, 8))

    grid = (pl.cdiv(Bp, tm),)

    # VMEM limit: never below the working set + headroom (fixes previous clamp bug).
    vmem_limit = max(32 << 20, _working_set_bytes(tm) + (8 << 20))

    cost = pl.CostEstimate(
        flops=2 * Bp * in_f * out_fp,
        transcendentals=Bp * out_fp,
        bytes_accessed=4 * (Bp * in_f + in_f * out_fp + out_fp)
        + Bp * out_fp * out_dtype.itemsize,
    )

    out = pl.pallas_call(
        _sine_layer_kernel,
        out_shape=jax.ShapeDtypeStruct((Bp, out_fp), out_dtype),
        grid_spec=pltpu.PrefetchScalarGridSpec(
            num_scalar_prefetch=0,
            grid=grid,
            in_specs=[
                pl.BlockSpec((tm, in_f), lambda i: (i, 0)),      # x row tile
                pl.BlockSpec((in_f, out_fp), lambda i: (0, 0)),  # W, VMEM-resident
                pl.BlockSpec((1, out_fp), lambda i: (0, 0)),     # bias, resident
            ],
            out_specs=pl.BlockSpec((tm, out_fp), lambda i: (i, 0)),
        ),
        compiler_params=pltpu.CompilerParams(
            dimension_semantics=("parallel",),
            vmem_limit_bytes=vmem_limit,
        ),
        cost_estimate=cost,
    )(x, w_t, b_s)

    return out[:B, :out_f]


if __name__ == "__main__":
    key = jax.random.PRNGKey(0)
    k1, k2, k3, k4, k5, k6, k7 = jax.random.split(key, 7)

    omega_0 = 30.0

    def ref(xx, W, b):
        return jnp.sin(
            omega_0 * (jnp.dot(xx, W.T, precision=lax.Precision.HIGHEST) + b)
        )

    # omega_0 amplifies MXU rounding into the sin argument -> modest tolerance.
    tol = dict(atol=1e-2, rtol=1e-2)

    # --- Config A: is_first=True SIREN layer, lane-dense out_features.
    in_f, out_f = 32, 128
    w_bound = 1.0 / in_f                    # SineLayer.init_weights (is_first=True)
    weight = jax.random.uniform(k1, (out_f, in_f), jnp.float32, -w_bound, w_bound)
    b_bound = 1.0 / (in_f ** 0.5)           # nn.Linear default bias init
    bias = jax.random.uniform(k2, (out_f,), jnp.float32, -b_bound, b_bound)

    # Case 1: batch multiple of 8; tile auto-split so the grid has >= 2 steps.
    x1 = jax.random.normal(k3, (256, in_f), jnp.float32)
    o1 = jax.block_until_ready(sine_layer(x1, weight, bias, omega_0=omega_0))
    assert o1.shape == (256, out_f)
    assert jnp.allclose(o1, ref(x1, weight, bias), **tol)

    # Case 2: ragged batch (exercises the masked tail-tile path).
    x2 = jax.random.normal(k4, (100, in_f), jnp.float32)
    o2 = jax.block_until_ready(sine_layer(x2, weight, bias, omega_0=omega_0))
    assert o2.shape == (100, out_f)
    assert jnp.allclose(o2, ref(x2, weight, bias), **tol)

    # --- Config B: hidden-layer init, out_features NOT a multiple of 128
    # (exercises the lane-dense out_f padding path).
    in_f2, out_f2 = 16, 72
    w_bound2 = (6.0 / in_f2) ** 0.5 / omega_0   # init_weights (is_first=False)
    weight2 = jax.random.uniform(k5, (out_f2, in_f2), jnp.float32, -w_bound2, w_bound2)
    b_bound2 = 1.0 / (in_f2 ** 0.5)
    bias2 = jax.random.uniform(k6, (out_f2,), jnp.float32, -b_bound2, b_bound2)
    x3 = jax.random.normal(k7, (40, in_f2), jnp.float32)
    o3 = jax.block_until_ready(sine_layer(x3, weight2, bias2, omega_0=omega_0))
    assert o3.shape == (40, out_f2)
    assert jnp.allclose(o3, ref(x3, weight2, bias2), **tol)

    print("KERNEL_OK")
</pallas_src>

<mosaic_0001>
module attributes {stable_mosaic.version = 11 : i64} {
  func.func @_sine_layer_kernel(%arg0: i32, %arg1: memref<128x32xf32, #tpu.memory_space<vmem>>, %arg2: memref<32x128xf32, #tpu.memory_space<vmem>>, %arg3: memref<1x128xf32, #tpu.memory_space<vmem>>, %arg4: memref<128x128xf32, #tpu.memory_space<vmem>>) attributes {dimension_semantics = [#tpu.dimension_semantics<parallel>], iteration_bounds = array<i64: 2>, scalar_prefetch = 0 : i64, scratch_operands = 0 : i64, tpu.core_type = #tpu.core_type<tc>, window_params = [{transform_indices = @transform_0, window_bounds = array<i64: 128, 32>}, {pipeline_mode = #tpu.pipeline_mode<synchronous>, transform_indices = @transform_1, window_bounds = array<i64: 32, 128>}, {pipeline_mode = #tpu.pipeline_mode<synchronous>, transform_indices = @transform_2, window_bounds = array<i64: 1, 128>}, {transform_indices = @transform_3, window_bounds = array<i64: 128, 128>}]} {
    %c0 = arith.constant 0 : index
    %c0_0 = arith.constant 0 : index
    %0 = vector.load %arg1[%c0, %c0_0] : memref<128x32xf32, #tpu.memory_space<vmem>>, vector<128x32xf32>
    %c0_1 = arith.constant 0 : index
    %c0_2 = arith.constant 0 : index
    %1 = vector.load %arg2[%c0_1, %c0_2] : memref<32x128xf32, #tpu.memory_space<vmem>>, vector<32x128xf32>
    %cst = arith.constant dense<0.000000e+00> : vector<128x128xf32>
    %2 = tpu.matmul %0, %1, %cst {dimension_numbers = #tpu.dot_dimension_numbers<[1], [0], [0], [1], [0, 0, 1, 1], [], []>} : vector<128x32xf32>, vector<32x128xf32>, vector<128x128xf32> -> vector<128x128xf32>
    %c0_3 = arith.constant 0 : index
    %c0_4 = arith.constant 0 : index
    %3 = vector.load %arg3[%c0_3, %c0_4] : memref<1x128xf32, #tpu.memory_space<vmem>>, vector<1x128xf32>
    %4 = vector.broadcast %3 : vector<1x128xf32> to vector<128x128xf32>
    %5 = arith.addf %2, %4 : vector<128x128xf32>
    %6 = math.sin %5 : vector<128x128xf32>
    %c0_5 = arith.constant 0 : index
    %c0_6 = arith.constant 0 : index
    %7 = vector.load %arg4[%c0_5, %c0_6] : memref<128x128xf32, #tpu.memory_space<vmem>>, vector<128x128xf32>
    tpu.vector_store %arg4[%c0_5, %c0_6], %6 {strides = array<i32>} : memref<128x128xf32, #tpu.memory_space<vmem>>, vector<128x128xf32>,
    return
  }
  func.func @transform_0(%arg0: i32) -> (i32, i32) {
    %c0_i32 = arith.constant 0 : i32
    %c0_i32_0 = arith.constant 0 : i32
    return %arg0, %c0_i32 : i32, i32
  }
  func.func @transform_1(%arg0: i32) -> (i32, i32) {
    %c0_i32 = arith.constant 0 : i32
    %c0_i32_0 = arith.constant 0 : i32
    %c0_i32_1 = arith.constant 0 : i32
    return %c0_i32, %c0_i32_0 : i32, i32
  }
  func.func @transform_2(%arg0: i32) -> (i32, i32) {
    %c0_i32 = arith.constant 0 : i32
    %c0_i32_0 = arith.constant 0 : i32
    %c0_i32_1 = arith.constant 0 : i32
    return %c0_i32, %c0_i32_0 : i32, i32
  }
  func.func @transform_3(%arg0: i32) -> (i32, i32) {
    %c0_i32 = arith.constant 0 : i32
    %c0_i32_0 = arith.constant 0 : i32
    return %arg0, %c0_i32 : i32, i32
  }
}

</mosaic_0001>

<bundles_post_ra>
// kernel: tpu_custom_call.1
= control target key start
LH: loop header
LB: loop body
LE: loop exit
PB: predicated region body
PF: predicated region fallthrough
CT: control target
= control target key end

     0   :  { %8 = vsyncpa [#allocation3], 0  ;;  %s5001_s0 = inlined_call_operand.vmem [shape: f32[256,32], index: 0, kind: input, shape index: {}]   ;;  %s5002_s1 = inlined_call_operand.vmem [shape: f32[32,128], index: 1, kind: input, shape index: {}]   ;;  %s5003_s2 = inlined_call_operand.vmem [shape: f32[1,128], index: 2, kind: input, shape index: {}]   ;;  %s5004_s3 = inlined_call_operand.hbm [shape: f32[256,128], index: 3, kind: output, shape index: {}]  }
   0x1   :  { %10 = vsyncpa [#allocation3 + $0x1], 0  ;;  %s3118_s12 = smov 0   ;;  %s3120_s13 = smov 0  }
   0x2   :  { %s3122_s14 = smov 0   ;;  %s3124_s15 = smov 0  }
   0x3 LB: > { %s3139_s16 = sadd.s32 4294967295, %s3087_s15   ;;  %s2884_s17 = sadd.s32 4294967294, %s3087_s15   ;;  %s3087_s15 = sphi %s3124_s15, %s5032_s15   ;;  %s3083_s14 = sphi %s3122_s14, %s5031_s14   ;;  %s3079_s13 = sphi %s3120_s13, %s5030_s13   ;;  %s3075_s12 = sphi %s3118_s12, %s5029_s12  }
   0x4   : > { %s3143_s18 = sadd.s32 1, %s3087_s15   ;;  %s91_s19 = sadd.s32 1, %s3083_s14 }
   0x5   : > { %s88_s20 = ssub.s32 %s3087_s15, %s3143_s18  ;;  %p101_p0 = scmp.ne.s32.totalorder %s3083_s14, %s3079_s13 }
   0x6   : > { %p89_p1 = scmp.eq.s32.totalorder %s88_s20, 0  ;;  %p102_p2 = scmp.eq.s32.totalorder %s3139_s16, 1 }
   0x7   : > { %p107_p3 = scmp.ne.s32.totalorder %s3079_s13, %s3075_s12  ;;  %p108_p4 = scmp.eq.s32.totalorder %s2884_s17, 1 }
   0x8   : > { %s3154_s21 = scalar_select %p89_p1, %s3083_s14, %s91_s19  }
   0x9   : > { %p3156_p5 = por %p102_p2, %p101_p0  ;;  %p3160_p6 = por %p108_p4, %p107_p3 }
   0xa   : > { %p2887_p7 = scmp.ge.s32.totalorder %s3087_s15, 1  ;;  %p141_p8 = scmp.lt.s32.totalorder %s3087_s15, 3 }
   0xc   : > { %p142_p9 = pnand %p2887_p7, %p141_p8 }
   0xd   : > { %s2889_s28 = sshll.u32 (!%p142_p9), %s3139_s16, 4  ;;  %s162_s17 = sand.u32 (!%p142_p9), 1, %s3079_s13  }
   0xe   : > { %145 = sbr.rel (%p142_p9) target bundleno = 799 (0x31f), region = 32  ;;  %p166_p10 = scmp.lt.s32.totalorder (!%p142_p9), %s2889_s28, 31 }
   0xf   : > { %s2888_s19 = sshll.u32 (!%p142_p9), %s162_s17, 7  ;;  %s2960_s30 = sshll.u32 (!%p142_p9), %s3139_s16, 7 }
  0x10   : > { %s3525_s20 = scalar_lea.vmem (!%p142_p9), [#allocation2], %s2888_s19  ;;  %s2807_s16 = scalar_lea.sflag (!%p142_p9), [#allocation3], %s162_s17 }
  0x11   : > { %s2819_s7 = sshll.u32 (!%p142_p9), %s3525_s20, 4  ;;  %s3045_s24 = scalar_lea.hbm (!%p142_p9), %s5004_s3, 256  ;;  %s2820_s7 = int_to_ptr.vmem [resolvable:$true] %s2819_s7 }
  0x13   : > { %v191_v0 = vld [vmem:[%s5002_s1 + $0x18] sm:$0xff]  ;;  %v190_v1 = vld [vmem:[%s5002_s1 + $0x10] sm:$0xff]  ;;  %v189_v2 = vld [vmem:[%s5002_s1 + $0x8] sm:$0xff]  ;;  %s5034_s28 = smov (!%p166_p10, %s2889_s28), 31  ;;  %vm196_vm0 = vcmask 261120  }
  0x14   : > { %257 = vmatpush.msra.mxu0 %v191_v0  ;;  %2961 = vmatpush.msra.mxu1 %v191_v0  ;;  %v188_v3 = vld [vmem:[%s5002_s1] sm:$0xff]  ;;  %s2890_s6 = sshll.u32 %s5034_s28, 3  ;;  %v3089_v48 = vmov 683565275   ;;  %v3090_v50 = vmov 2475754826  }
  0x15   : > { %2962 = vmatpush.msra.mxu2 %v191_v0  ;;  %2963 = vmatpush.msra.mxu3 %v191_v0  ;;  %s3182_s9 = scalar_lea.vmem %s5001_s0, %s2890_s6  ;;  %v3219_v20 = vld [vmem:[%s5003_s2] ss:$0 sm:$0xff]  ;;  %v3091_v52 = vmov 2131351028   ;;  %v3092_v54 = vmov 2102212464   ;;  %s2818_s6 = scalar_lea.hbm %s5004_s3, %s2960_s30 }
  0x16   : > { %258 = vmatpush.msra.mxu0 %v190_v1  ;;  %2964 = vmatpush.msra.mxu1 %v190_v1  ;;  %v172_v4 = vld [vmem:[%s3182_s9] sm:$0xff]  ;;  %v173_v8 = vld [vmem:[%s3182_s9 + $0x8] sm:$0xff]  ;;  %v174_v12 = vld [vmem:[%s3182_s9 + $0x10] sm:$0xff]  ;;  %v3093_v56 = vmov 920167782   ;;  %s2821_s8 = sshll.u32 %s2818_s6, 4  ;;  %s2822_s8 = int_to_ptr.hbm [resolvable:$true] %s2821_s8 }
  0x17   : > { %2965 = vmatpush.msra.mxu2 %v190_v1  ;;  %2966 = vmatpush.msra.mxu3 %v190_v1  ;;  %v176_v5 = vld [vmem:[%s3182_s9 + $0x20] sm:$0xff]  ;;  %v177_v9 = vld [vmem:[%s3182_s9 + $0x28] sm:$0xff]  ;;  %v178_v13 = vld [vmem:[%s3182_s9 + $0x30] sm:$0xff]  ;;  %v3094_v1 = vmov 1326507024  }
  0x18   : > { %259 = vmatpush.msra.mxu0 %v189_v2  ;;  %2967 = vmatpush.msra.mxu1 %v189_v2  ;;  %v180_v6 = vld [vmem:[%s3182_s9 + $0x40] sm:$0xff]  ;;  %v181_v10 = vld [vmem:[%s3182_s9 + $0x48] sm:$0xff]  ;;  %v182_v14 = vld [vmem:[%s3182_s9 + $0x50] sm:$0xff] }
  0x19   : > { %2968 = vmatpush.msra.mxu2 %v189_v2  ;;  %2969 = vmatpush.msra.mxu3 %v189_v2  ;;  %v184_v7 = vld [vmem:[%s3182_s9 + $0x60] sm:$0xff]  ;;  %v185_v11 = vld [vmem:[%s3182_s9 + $0x68] sm:$0xff]  ;;  %v186_v15 = vld [vmem:[%s3182_s9 + $0x70] sm:$0xff] }
  0x1a   : > { %260 = vmatpush.msra.mxu0 %v188_v3  ;;  %2970 = vmatpush.msra.mxu1 %v188_v3  ;;  %v175_v16 = vld [vmem:[%s3182_s9 + $0x18] sm:$0xff] }
  0x1b   : > { %2971 = vmatpush.msra.mxu2 %v188_v3  ;;  %2972 = vmatpush.msra.mxu3 %v188_v3  ;;  %v179_v17 = vld [vmem:[%s3182_s9 + $0x38] sm:$0xff] }
  0x1c   : > { %2891 = vmatmul.msk.f32.vlgmr.msra.gmra.mxu0 %vm196_vm0, %v172_v4  ;;  %2895 = vmatmul.msk.f32.vlgmr.msra.gmra.mxu1 %vm196_vm0, %v176_v5  ;;  %v183_v18 = vld [vmem:[%s3182_s9 + $0x58] sm:$0xff] }
  0x1d   : > { %2899 = vmatmul.msk.f32.vlgmr.msra.gmra.mxu2 %vm196_vm0, %v180_v6  ;;  %2903 = vmatmul.msk.f32.vlgmr.msra.gmra.mxu3 %vm196_vm0, %v184_v7  ;;  %v187_v19 = vld [vmem:[%s3182_s9 + $0x78] sm:$0xff]  ;;  %s3039_s9 = sshra.s32 %s2822_s8, 4  ;;  %s3040_s9 = int_to_ptr.hbm [resolvable:$true] %s3039_s9 }
  0x1e   : > { %s3041_s10 = scalar_lea.hbm %s3040_s9, 128  ;;  %p3046_p0 = scmp.lt.s32.totalorder %s3040_s9, %s5004_s3 }
  0x1f   : > { %p3042_p11 = scmp.ne.s32.totalorder %s3040_s9, %s3041_s10  ;;  %p3047_p1 = scmp.lt.s32.totalorder %s3045_s24, %s3041_s10 }
  0x21   : > { %p3043_p12 = pnand %p3042_p11, %p3156_p5  ;;  %p3048_p2 = por %p3047_p1, %p3046_p0 }
  0x23   : > { %p3044_p13 = pneg %p3043_p12 }
  0x24   : > { %2892 = vmatmul.msk.f32.gmra.mxu0 %vm196_vm0, %v173_v8  ;;  %2896 = vmatmul.msk.f32.gmra.mxu1 %vm196_vm0, %v177_v9 }
  0x25   : > { %2900 = vmatmul.msk.f32.gmra.mxu2 %vm196_vm0, %v181_v10  ;;  %2904 = vmatmul.msk.f32.gmra.mxu3 %vm196_vm0, %v185_v11  ;;  %p3049_p3 = pnand %p3048_p2, %p3044_p13 }
  0x2c   : > { %2893 = vmatmul.msk.f32.gmra.mxu0 %vm196_vm0, %v174_v12  ;;  %2897 = vmatmul.msk.f32.gmra.mxu1 %vm196_vm0, %v178_v13 }
  0x2d   : > { %2901 = vmatmul.msk.f32.gmra.mxu2 %vm196_vm0, %v182_v14  ;;  %2905 = vmatmul.msk.f32.gmra.mxu3 %vm196_vm0, %v186_v15 }
  0x34   : > { %2894 = vmatmul.msk.f32.gmra.mxu0 %vm196_vm0, %v175_v16  ;;  %2898 = vmatmul.msk.f32.gmra.mxu1 %vm196_vm0, %v179_v17 }
  0x35   : > { %2902 = vmatmul.msk.f32.gmra.mxu2 %vm196_vm0, %v183_v18  ;;  %2906 = vmatmul.msk.f32.gmra.mxu3 %vm196_vm0, %v187_v19 }
  0x99   : > { %v262_v21 = vpop.f32.mrf.mxu0  ;;  %v274_v22 = vpop.f32.mrf.mxu1 }
  0x9a   : > { %v3222_v23 = vadd.f32 %v3219_v20, %v262_v21  ;;  %v3225_v24 = vadd.f32 %v3219_v20, %v274_v22 }
  0x9c   : > { %v310_v25 = vand.u32 2147483647, %v3222_v23  ;;  %v313_v26 = vand.u32 2139095040, %v3222_v23  ;;  %v930_v27 = vand.u32 2147483647, %v3225_v24  ;;  %v933_v28 = vand.u32 2139095040, %v3225_v24 }
  0x9e   : > { %v314_v29 = vshrl.u32 %v313_v26, 23  ;;  %v317_v30 = vand.u32 8388607, %v310_v25  ;;  %v934_v31 = vshrl.u32 %v933_v28, 23  ;;  %v937_v35 = vand.u32 8388607, %v930_v27 }
  0xa0   : > { %v2907_v32 = vadd.s32 4294967169, %v314_v29  ;;  %v318_v33 = vor.u32 8388608, %v317_v30  ;;  %v2919_v34 = vadd.s32 4294967169, %v934_v31  ;;  %v286_v38 = vpop.f32.mrf.mxu2  ;;  %v938_v41 = vor.u32 8388608, %v937_v35 }
  0xa1   : > { %v3242_v46 = vadd.f32 %v3219_v20, %v286_v38 }
  0xa2   : > { %v320_v36 = vadd.s32 1, %v2907_v32  ;;  %v940_v37 = vadd.s32 1, %v2919_v34  ;;  %v3235_v40 = vshll.u32 %v318_v33, 8  ;;  %v3250_v59 = vshll.u32 %v938_v41, 8 }
  0xa3   : > { %v1553_v9 = vand.u32 2139095040, %v3242_v46 }
  0xa4   : > { %vm321_vm1 = vcmp.gt.s32.totalorder %v320_v36, 0  ;;  %vm941_vm2 = vcmp.gt.s32.totalorder %v940_v37, 0  ;;  %v359_v58 = vand.u32 65535, %v3235_v40  ;;  %v360_v63 = vshrl.u32 %v3235_v40, 16 }
  0xa5   : > { %v322_v39 = vsel %vm321_vm1, %v320_v36, 0  ;;  %v942_v43 = vsel %vm941_vm2, %v940_v37, 0  ;;  %v3294_v29 = vand.u32 65535, %v3250_v59 }
  0xa6   : > { %v324_v42 = vand.u32 31, %v322_v39  ;;  %v3237_v44 = vshrl.u32 %v322_v39, 5  ;;  %v3239_v45 = vand.u32 31, %v942_v43  ;;  %v3300_v36 = vshrl.u32 %v942_v43, 5 }
  0xa8   : > { %v325_v47 = vsub.s32 32, %v324_v42  ;;  %v327_v49 = vshll.u32 %v3089_v48, %v324_v42  ;;  %v330_v51 = vshll.u32 %v3090_v50, %v324_v42  ;;  %v333_v53 = vshll.u32 %v3091_v52, %v324_v42 }
  0xa9   : > { %v336_v55 = vshll.u32 %v3092_v54, %v324_v42  ;;  %v339_v57 = vshll.u32 %v3093_v56, %v324_v42  ;;  %vm342_vm3 = vcmp.lt.s32.totalorder %v3237_v44, 1  ;;  %vm345_vm4 = vcmp.lt.s32.totalorder %v3237_v44, 4 }
  0xaa   : > { %v328_v60 = vshrl.u32 %v3090_v50, %v325_v47  ;;  %v331_v61 = vshrl.u32 %v3091_v52, %v325_v47  ;;  %v334_v62 = vshrl.u32 %v3092_v54, %v325_v47  ;;  %v337_v0 = vshrl.u32 %v3093_v56, %v325_v47 }
  0xab   : > { %v340_v2 = vshrl.u32 %v3094_v1, %v325_v47  ;;  %v3261_v6 = vsub.s32 32, %v3239_v45  ;;  %vm344_vm5 = vcmp.lt.s32.totalorder %v3237_v44, 3  ;;  %v326_v10 = vshrl.u32 %v3089_v48, %v325_v47 }
  0xac   : > { %v329_v3 = vor.u32 %v328_v60, %v327_v49  ;;  %v332_v4 = vor.u32 %v331_v61, %v330_v51  ;;  %v335_v5 = vor.u32 %v334_v62, %v333_v53  ;;  %v338_v7 = vor.u32 %v337_v0, %v336_v55 }
  0xad   : > { %v341_v8 = vor.u32 %v340_v2, %v339_v57  ;;  %vm343_vm6 = vcmp.lt.s32.totalorder %v3237_v44, 2  ;;  %v947_v15 = vshll.u32 %v3089_v48, %v3239_v45  ;;  %v950_v16 = vshll.u32 %v3090_v50, %v3239_v45 }
  0xae   : > { %v350_v11 = vsel %vm342_vm3, %v329_v3, %v332_v4  ;;  %v354_v12 = vsel %vm342_vm3, %v332_v4, %v335_v5  ;;  %v351_v13 = vsel %vm345_vm4, %v338_v7, 920167782  ;;  %v347_v17 = vsel %vm345_vm4, %v335_v5, 2102212464 }
  0xaf   : > { %v355_v14 = vsel %vm345_vm4, %v341_v8, 1326507024  ;;  %v352_v18 = vsel %vm344_vm5, %v335_v5, %v351_v13  ;;  %v948_v21 = vshrl.u32 %v3090_v50, %v3261_v6  ;;  %v951_v28 = vshrl.u32 %v3091_v52, %v3261_v6 }
  0xb0   : > { %v356_v19 = vsel %vm344_vm5, %v338_v7, %v355_v14  ;;  %v353_v22 = vsel %vm343_vm6, %v350_v11, %v352_v18  ;;  %v346_v34 = vsel %vm342_vm3, %v326_v10, %v329_v3  ;;  %v348_v35 = vsel %vm344_vm5, %v332_v4, %v347_v17 }
  0xb1   : > { %v357_v26 = vsel %vm343_vm6, %v354_v12, %v356_v19  ;;  %v383_v32 = vand.u32 65535, %v353_v22  ;;  %v384_v33 = vshrl.u32 %v353_v22, 16  ;;  %v3302_v37 = vor.u32 %v948_v21, %v947_v15 }
  0xb2   : > { %v361_v30 = vand.u32 65535, %v357_v26  ;;  %v362_v31 = vshrl.u32 %v357_v26, 16  ;;  %v3304_v41 = vor.u32 %v951_v28, %v950_v16  ;;  %v953_v42 = vshll.u32 %v3091_v52, %v3239_v45 }
  0xb3   : > { %v386_v49 = vmul.u32 %v384_v33, %v359_v58  ;;  %v387_v51 = vmul.u32 %v383_v32, %v360_v63  ;;  %v954_v53 = vshrl.u32 %v3092_v54, %v3261_v6  ;;  %v385_v60 = vmul.u32 %v383_v32, %v359_v58 }
  0xb4   : > { %v364_v38 = vmul.u32 %v362_v31, %v359_v58  ;;  %v365_v39 = vmul.u32 %v361_v30, %v360_v63  ;;  %v363_v47 = vmul.u32 %v361_v30, %v359_v58  ;;  %v366_v55 = vmul.u32 %v362_v31, %v360_v63 }
  0xb5   : > { %v388_v43 = vmul.u32 %v384_v33, %v360_v63  ;;  %v389_v2 = vshll.u32 %v386_v49, 16  ;;  %v391_v4 = vshll.u32 %v387_v51, 16  ;;  %v956_v5 = vshll.u32 %v3092_v54, %v3239_v45 }
  0xb6   : > { %v367_v57 = vshll.u32 %v364_v38, 16  ;;  %v368_v61 = vshrl.u32 %v364_v38, 16  ;;  %v369_v62 = vshll.u32 %v365_v39, 16  ;;  %v370_v0 = vshrl.u32 %v365_v39, 16 }
  0xb7   : > { %v3095_v7 = vmov 0   ;;  %vm393_vm8 = vc.u32 %v385_v60, %v389_v2  ;;  %v395_v10 = vadd.s32 %v389_v2, %v385_v60  ;;  %v957_v11 = vshrl.u32 %v3093_v56, %v3261_v6 }
  0xb8   : > { %vm371_vm7 = vc.u32 %v363_v47, %v367_v57  ;;  %v373_v3 = vadd.s32 %v367_v57, %v363_v47  ;;  %v394_v63 = vsel %vm393_vm8, 1, %v3095_v7  ;;  %v959_v12 = vshll.u32 %v3093_v56, %v3239_v45 }
  0xb9   : > { %v372_v8 = vsel %vm371_vm7, 1, %v3095_v7  ;;  %v396_v14 = vadd.s32 %v394_v63, %v388_v43  ;;  %vm397_vm10 = vc.u32 %v395_v10, %v391_v4  ;;  %v955_v15 = vor.u32 %v954_v53, %v953_v42 }
  0xba   : > { %v374_v58 = vadd.s32 %v372_v8, %v366_v55  ;;  %vm375_vm9 = vc.u32 %v373_v3, %v369_v62  ;;  %v398_v17 = vsel %vm397_vm10, 1, %v3095_v7  ;;  %v958_v18 = vor.u32 %v957_v11, %v956_v5 }
  0xbb   : > { %v376_v13 = vsel %vm375_vm9, 1, %v3095_v7  ;;  %v960_v19 = vshrl.u32 %v3094_v1, %v3261_v6  ;;  %v390_v21 = vshrl.u32 %v386_v49, 16  ;;  %v400_v22 = vadd.s32 %v398_v17, %v396_v14 }
  0xbc   : > { %v378_v16 = vadd.s32 %v376_v13, %v374_v58  ;;  %vm962_vm11 = vcmp.lt.s32.totalorder %v3300_v36, 1  ;;  %vm964_vm12 = vcmp.lt.s32.totalorder %v3300_v36, 3  ;;  %v392_v45 = vshrl.u32 %v387_v51, 16 }
  0xbd   : > { %v961_v28 = vor.u32 %v960_v19, %v959_v12  ;;  %vm965_vm13 = vcmp.lt.s32.totalorder %v3300_v36, 4  ;;  %v3325_v30 = vadd.s32 %v395_v10, %v391_v4  ;;  %v401_v31 = vadd.s32 %v400_v22, %v390_v21 }
  0xbe   : > { %v379_v26 = vadd.s32 %v378_v16, %v368_v61  ;;  %v970_v32 = vsel %vm962_vm11, %v3302_v37, %v3304_v41  ;;  %v971_v33 = vsel %vm965_vm13, %v958_v18, 920167782  ;;  %vm963_vm14 = vcmp.lt.s32.totalorder %v3300_v36, 2 }
  0xbf   : > { %v972_v39 = vsel %vm964_vm12, %v955_v15, %v971_v33  ;;  %v974_v42 = vsel %vm962_vm11, %v3304_v41, %v955_v15  ;;  %v349_v47 = vsel %vm343_vm6, %v346_v34, %v348_v35  ;;  %v402_v49 = vadd.s32 %v401_v31, %v392_v45 }
  0xc0   : > { %v3333_v38 = vadd.s32 %v379_v26, %v370_v0  ;;  %v973_v51 = vsel %vm963_vm14, %v970_v32, %v972_v39  ;;  %v975_v53 = vsel %vm965_vm13, %v961_v28, 1326507024  ;;  %v980_v57 = vshrl.u32 %v3250_v59, 16 }
  0xc1   : > { %v976_v55 = vsel %vm964_vm12, %v958_v18, %v975_v53  ;;  %v1003_v60 = vand.u32 65535, %v973_v51  ;;  %v406_v43 = vadd.s32 1, %v402_v49  ;;  %v1004_v34 = vshrl.u32 %v973_v51, 16 }
  0xc2   : > { %vm405_vm15 = vc.u32 %v3333_v38, %v3325_v30  ;;  %v977_v44 = vsel %vm963_vm14, %v974_v42, %v976_v55  ;;  %v1554_v35 = vshrl.u32 %v1553_v9, 23  ;;  %v403_v61 = vmul.u32 %v3235_v40, %v349_v47 }
  0xc3   : > { %v981_v62 = vand.u32 65535, %v977_v44  ;;  %v982_v0 = vshrl.u32 %v977_v44, 16  ;;  %v1550_v2 = vand.u32 2147483647, %v3242_v46  ;;  %v407_v3 = vsel %vm405_vm15, %v406_v43, %v402_v49 }
  0xc4   : > { %v946_v4 = vshrl.u32 %v3089_v48, %v3261_v6  ;;  %v1006_v5 = vmul.u32 %v1004_v34, %v3294_v29  ;;  %v1007_v8 = vmul.u32 %v1003_v60, %v980_v57  ;;  %v408_v10 = vadd.s32 %v407_v3, %v403_v61 }
  0xc5   : > { %v967_v11 = vsel %vm965_vm13, %v955_v15, 2102212464  ;;  %v984_v58 = vmul.u32 %v982_v0, %v3294_v29  ;;  %v985_v9 = vmul.u32 %v981_v62, %v980_v57  ;;  %v1005_v40 = vmul.u32 %v1003_v60, %v3294_v29 }
  0xc6   : > { %v1008_v63 = vmul.u32 %v1004_v34, %v980_v57  ;;  %v1009_v12 = vshll.u32 %v1006_v5, 16  ;;  %v2931_v13 = vadd.s32 4294967169, %v1554_v35  ;;  %v409_v14 = vadd.s32 536870912, %v408_v10 }
  0xc7   : > { %v983_v16 = vmul.u32 %v981_v62, %v3294_v29  ;;  %v986_v17 = vmul.u32 %v982_v0, %v980_v57  ;;  %v987_v6 = vshll.u32 %v984_v58, 16  ;;  %v989_v18 = vshll.u32 %v985_v9, 16 }
  0xc8   : > { %v1011_v19 = vshll.u32 %v1007_v8, 16  ;;  %vm1013_vm0 = vc.u32 %v1005_v40, %v1009_v12  ;;  %v1015_v21 = vadd.s32 %v1009_v12, %v1005_v40  ;;  %v410_v22 = vshrl.u32 %v409_v14, 30 }
  0xc9   : > { %vm991_vm1 = vc.u32 %v983_v16, %v987_v6  ;;  %v993_v15 = vadd.s32 %v987_v6, %v983_v16  ;;  %v1014_v26 = vsel %vm1013_vm0, 1, %v3095_v7  ;;  %v1557_v31 = vand.u32 8388607, %v1550_v2 }
  0xca   : > { %v992_v45 = vsel %vm991_vm1, 1, %v3095_v7  ;;  %v1016_v28 = vadd.s32 %v1014_v26, %v1008_v63  ;;  %vm1017_vm2 = vc.u32 %v1015_v21, %v1011_v19  ;;  %v411_v32 = vshll.u32 %v410_v22, 30 }
  0xcb   : > { %v966_v29 = vsel %vm962_vm11, %v946_v4, %v3302_v37  ;;  %v994_v33 = vadd.s32 %v992_v45, %v986_v17  ;;  %vm995_vm3 = vc.u32 %v993_v15, %v989_v18  ;;  %v968_v39 = vsel %vm964_vm12, %v3304_v41, %v967_v11 }
  0xcc   : > { %v996_v42 = vsel %vm995_vm3, 1, %v3095_v7  ;;  %v1018_v47 = vsel %vm1017_vm2, 1, %v3095_v7  ;;  %v1560_v49 = vadd.s32 1, %v2931_v13  ;;  %v412_v51 = vsub.s32 %v408_v10, %v411_v32 }
  0xcd   : > { %v988_v53 = vshrl.u32 %v984_v58, 16  ;;  %v998_v55 = vadd.s32 %v996_v42, %v994_v33  ;;  %v1020_v57 = vadd.s32 %v1018_v47, %v1016_v28  ;;  %vm312_vm4 = vcmp.lt.s32.totalorder %v3222_v23, 0 }
  0xce   : > { %v434_v60 = vsub.s32 4, %v410_v22  ;;  %v1010_v43 = vshrl.u32 %v1006_v5, 16  ;;  %vm1561_vm5 = vcmp.gt.s32.totalorder %v1560_v49, 0  ;;  %vm413_vm6 = vcmp.lt.s32.totalorder %v412_v51, 0 }
  0xcf   : > { %v414_v37 = vsub.s32 0, %v412_v51  ;;  %v990_v44 = vshrl.u32 %v985_v9, 16  ;;  %v999_v34 = vadd.s32 %v998_v55, %v988_v53  ;;  %v969_v41 = vsel %vm963_vm14, %v966_v29, %v968_v39 }
  0xd0   : > { %v1012_v35 = vshrl.u32 %v1007_v8, 16  ;;  %v1021_v61 = vadd.s32 %v1020_v57, %v1010_v43  ;;  %v1562_v62 = vsel %vm1561_vm5, %v1560_v49, 0  ;;  %v3383_v4 = vadd.s32 %v1015_v21, %v1011_v19 }
  0xd1   : > { %v415_v0 = vsel %vm413_vm6, %v414_v37, %v412_v51  ;;  %v3381_v3 = vadd.s32 %v999_v34, %v990_v44  ;;  %v1558_v10 = vor.u32 8388608, %v1557_v31  ;;  %v435_v5 = vsel %vm312_vm4, %v434_v60, %v410_v22 }
  0xd2   : > { %v416_v11 = vclz %v415_v0  ;;  %v1022_v58 = vadd.s32 %v1021_v61, %v1012_v35  ;;  %v1564_v40 = vand.u32 31, %v1562_v62  ;;  %vm3389_vm7 = vcmp.le.f32.partialorder %v310_v25, 0.7853982 }
  0xd3   : > { %v404_v8 = vadd.s32 %v3325_v30, %v3333_v38  ;;  %v1023_v9 = vmul.u32 %v3250_v59, %v969_v41  ;;  %vm1025_vm8 = vc.u32 %v3381_v3, %v3383_v4  ;;  %v437_v14 = vsel %vm3389_vm7, 0, %v435_v5 }
  0xd4   : > { %v2908_v63 = vadd.s32 4294967294, %v416_v11  ;;  %v1026_v12 = vadd.s32 1, %v1022_v58  ;;  %v1565_v13 = vsub.s32 32, %v1564_v40  ;;  %v3400_v16 = vshrl.u32 %v1562_v62, 5 }
  0xd5   : > { %v1567_v25 = vshll.u32 %v3089_v48, %v1564_v40  ;;  %v3403_v17 = vshll.u32 %v1558_v10, 8  ;;  %v1570_v59 = vshll.u32 %v3090_v50, %v1564_v40  ;;  %v1573_v21 = vshll.u32 %v3091_v52, %v1564_v40 }
  0xd6   : > { %vm2909_vm9 = vcmp.lt.s32.totalorder %v2908_v63, 0  ;;  %v1027_v6 = vsel %vm1025_vm8, %v1026_v12, %v1022_v58  ;;  %v1568_v30 = vshrl.u32 %v3090_v50, %v1565_v13  ;;  %v1571_v19 = vshrl.u32 %v3091_v52, %v1565_v13 }
  0xd7   : > { %v419_v38 = vsel %vm2909_vm9, 0, %v2908_v63  ;;  %v1028_v18 = vadd.s32 %v1027_v6, %v1023_v9  ;;  %v1574_v26 = vshrl.u32 %v3092_v54, %v1565_v13  ;;  %v1576_v45 = vshll.u32 %v3092_v54, %v1564_v40  ;;  %v298_v6 = vpop.f32.mrf.mxu3 }
  0xd8   : > { %v420_v22 = vsub.s32 32, %v419_v38  ;;  %v424_v15 = vsub.s32 4294967266, %v419_v38  ;;  %v421_v28 = vshll.u32 %v412_v51, %v419_v38  ;;  %v1569_v32 = vor.u32 %v1568_v30, %v1567_v25 }
  0xd9   : > { %v1029_v31 = vadd.s32 536870912, %v1028_v18  ;;  %v1577_v29 = vshrl.u32 %v3093_v56, %v1565_v13  ;;  %v1572_v42 = vor.u32 %v1571_v19, %v1570_v59  ;;  %v1580_v47 = vshrl.u32 %v3094_v1, %v1565_v13 }
  0xda   : > { %v422_v33 = vshrl.u32 %v404_v8, %v420_v22  ;;  %v425_v39 = vadd.s32 127, %v424_v15  ;;  %v454_v49 = vadd.s32 3, %v437_v14  ;;  %v1575_v43 = vor.u32 %v1574_v26, %v1573_v21 }
  0xdb   : > { %v1030_v53 = vshrl.u32 %v1029_v31, 30  ;;  %v1578_v55 = vor.u32 %v1577_v29, %v1576_v45  ;;  %v1579_v37 = vshll.u32 %v3093_v56, %v1564_v40  ;;  %vm932_vm10 = vcmp.lt.s32.totalorder %v3225_v24, 0 }
  0xdc   : > { %v423_v57 = vor.u32 %v422_v33, %v421_v28  ;;  %v426_v60 = vshll.u32 %v425_v39, 23  ;;  %vm1582_vm11 = vcmp.lt.s32.totalorder %v3400_v16, 1  ;;  %v1599_v44 = vand.u32 65535, %v3403_v17 }
  0xdd   : > { %v1031_v51 = vshll.u32 %v1030_v53, 30  ;;  %v1600_v34 = vshrl.u32 %v3403_v17, 16  ;;  %v1581_v35 = vor.u32 %v1580_v47, %v1579_v37  ;;  %vm1585_vm12 = vcmp.lt.s32.totalorder %v3400_v16, 4 }
  0xde   : > { %v427_v41 = vor.u32 4788187, %v426_v60  ;;  %v1590_v61 = vsel %vm1582_vm11, %v1569_v32, %v1572_v42  ;;  %v3421_v62 = vand.u32 3, %v454_v49  ;;  %vm1584_vm13 = vcmp.lt.s32.totalorder %v3400_v16, 3 }
  0xdf   : > { %v3423_v0 = vsub.s32 %v1028_v18, %v1031_v51  ;;  %v1591_v10 = vsel %vm1585_vm12, %v1578_v55, 920167782  ;;  %v430_v5 = vcvt.s32.f32 %v423_v57  ;;  %vm1583_vm14 = vcmp.lt.s32.totalorder %v3400_v16, 2 }
  0xe0   : > { %v428_v11 = vand.u32 2147483647, %v427_v41  ;;  %v1592_v58 = vsel %vm1584_vm13, %v1575_v43, %v1591_v10  ;;  %v1566_v8 = vshrl.u32 %v3089_v48, %v1565_v13  ;;  %v1054_v12 = vsub.s32 4, %v1030_v53 }
  0xe1   : > { %vm1033_vm15 = vcmp.lt.s32.totalorder %v3423_v0, 0  ;;  %v1034_v40 = vsub.s32 0, %v3423_v0  ;;  %v1593_v9 = vsel %vm1583_vm14, %v1590_v61, %v1592_v58  ;;  %v1594_v14 = vsel %vm1582_vm11, %v1572_v42, %v1575_v43 }
  0xe2   : > { %v431_v63 = vmul.f32 %v430_v5, %v428_v11  ;;  %v1595_v25 = vsel %vm1585_vm12, %v1581_v35, 1326507024  ;;  %v1587_v59 = vsel %vm1585_vm12, %v1575_v43, 2102212464  ;;  %v1623_v38 = vand.u32 65535, %v1593_v9 }
  0xe3   : > { %v1035_v30 = vsel %vm1033_vm15, %v1034_v40, %v3423_v0  ;;  %v1596_v13 = vsel %vm1584_vm13, %v1578_v55, %v1595_v25  ;;  %v1624_v22 = vshrl.u32 %v1593_v9, 16  ;;  %v1024_v15 = vadd.s32 %v3383_v4, %v3381_v3 }
  0xe4   : > { %v432_v18 = vxor.u32 2147483648, %v431_v63  ;;  %v1036_v19 = vclz %v1035_v30  ;;  %v1597_v21 = vsel %vm1583_vm14, %v1594_v14, %v1596_v13  ;;  %v3451_v26 = vsel %vm1582_vm11, %v1566_v8, %v1569_v32 }
  0xe5   : > { %v1601_v45 = vand.u32 65535, %v1597_v21  ;;  %v3454_v28 = vadd.f32 %v3219_v20, %v298_v6  ;;  %v3460_v33 = vsel %vm932_vm10, %v1054_v12, %v1030_v53  ;;  %v1602_v39 = vshrl.u32 %v1597_v21, 16 }
  0xe6   : > { %v433_v31 = vsel %vm312_vm4, %v432_v18, %v431_v63  ;;  %v2920_v29 = vadd.s32 4294967294, %v1036_v19  ;;  %v3469_v4 = vsel %vm1584_vm13, %v1572_v42, %v1587_v59  ;;  %v1625_v47 = vmul.u32 %v1623_v38, %v1599_v44 }
  0xe7   : > { %v3465_v3 = vsel %vm3389_vm7, %v3222_v23, %v433_v31  ;;  %v1605_v32 = vmul.u32 %v1601_v45, %v1600_v34  ;;  %v1604_v55 = vmul.u32 %v1602_v39, %v1599_v44  ;;  %v3473_v57 = vmul.u32 %v1624_v22, %v1599_v44 }
  0xe8   : > { %v438_v49 = vmul.f32 %v3465_v3, %v3465_v3  ;;  %vm2921_vm0 = vcmp.lt.s32.totalorder %v2920_v29, 0  ;;  %v1603_v60 = vmul.u32 %v1601_v45, %v1599_v44  ;;  %v1606_v43 = vmul.u32 %v1602_v39, %v1600_v34 }
  0xe9   : > { %v1039_v53 = vsel %vm2921_vm0, 0, %v2920_v29  ;;  %v3475_v37 = vmul.u32 %v1623_v38, %v1600_v34  ;;  %v1609_v35 = vshll.u32 %v1605_v32, 16  ;;  %v1607_v61 = vshll.u32 %v1604_v55, 16 }
  0xea   : > { %v439_v36 = vmul.f32 -0.001358992, %v438_v49  ;;  %v446_v51 = vmul.f32 -0.00019511016, %v438_v49  ;;  %v1040_v41 = vsub.s32 32, %v1039_v53  ;;  %v1044_v42 = vsub.s32 4294967266, %v1039_v53 }
  0xeb   : > { %v1610_v10 = vshrl.u32 %v1605_v32, 16  ;;  %v1628_v11 = vmul.u32 %v1624_v22, %v1600_v34  ;;  %v1041_v40 = vshll.u32 %v3423_v0, %v1039_v53  ;;  %vm1611_vm1 = vc.u32 %v1603_v60, %v1607_v61 }
  0xec   : > { %v440_v5 = vadd.f32 0.041655596, %v439_v36  ;;  %v447_v58 = vadd.f32 0.008332121, %v446_v51  ;;  %v1042_v8 = vshrl.u32 %v1024_v15, %v1040_v41  ;;  %v1045_v9 = vadd.s32 127, %v1044_v42 }
  0xed   : > { %v1613_v63 = vadd.s32 %v1607_v61, %v1603_v60  ;;  %v1629_v44 = vshll.u32 %v3473_v57, 16  ;;  %v1612_v6 = vsel %vm1611_vm1, 1, %v3095_v7  ;;  %vm3482_vm2 = vcmp.le.f32.partialorder %v930_v27, 0.7853982 }
  0xee   : > { %v441_v12 = vmul.f32 %v440_v5, %v438_v49  ;;  %v448_v14 = vmul.f32 %v447_v58, %v438_v49  ;;  %v1043_v25 = vor.u32 %v1042_v8, %v1041_v40  ;;  %v1046_v34 = vshll.u32 %v1045_v9, 23 }
  0xef   : > { %v1608_v59 = vshrl.u32 %v1604_v55, 16  ;;  %v1614_v0 = vadd.s32 %v1612_v6, %v1606_v43  ;;  %vm1615_vm3 = vc.u32 %v1613_v63, %v1609_v35  ;;  %v1631_v19 = vshll.u32 %v3475_v37, 16 }
  0xf0   : > { %v442_v13 = vadd.f32 -0.4999988, %v441_v12  ;;  %v449_v38 = vadd.f32 -0.16666654, %v448_v14  ;;  %v1616_v18 = vsel %vm1615_vm3, 1, %v3095_v7  ;;  %vm457_vm4 = vcmp.eq.s32.totalorder %v3421_v62, 0 }
  0xf1   : > { %v1047_v21 = vor.u32 4788187, %v1046_v34  ;;  %v1618_v22 = vadd.s32 %v1616_v18, %v1614_v0  ;;  %vm1633_vm5 = vc.u32 %v1625_v47, %v1629_v44  ;;  %v1635_v27 = vadd.s32 %v1629_v44, %v1625_v47 }
  0xf2   : > { %v443_v15 = vmul.f32 %v442_v13, %v438_v49  ;;  %v450_v45 = vmul.f32 %v449_v38, %v438_v49  ;;  %vm456_vm6 = vcmp.lt.s32.totalorder %v3421_v62, 2  ;;  %v1050_v31 = vcvt.s32.f32 %v1043_v25 }
  0xf3   : > { %v1634_v29 = vsel %vm1633_vm5, 1, %v3095_v7  ;;  %vm453_vm7 = vweird.f32 %v3222_v23  ;;  %v1048_v39 = vand.u32 2147483647, %v1047_v21  ;;  %v1619_v32 = vadd.s32 %v1618_v22, %v1608_v59 }
  0xf4   : > { %v1636_v55 = vadd.s32 %v1634_v29, %v1628_v11  ;;  %vm1637_vm8 = vc.u32 %v1635_v27, %v1631_v19  ;;  %v444_v53 = vadd.f32 1.0, %v443_v15  ;;  %v451_v60 = vadd.f32 1.0, %v450_v45 }
  0xf5   : > { %v1630_v43 = vshrl.u32 %v3473_v57, 16  ;;  %v1638_v47 = vsel %vm1637_vm8, 1, %v3095_v7  ;;  %v1051_v49 = vmul.f32 %v1050_v31, %v1048_v39  ;;  %v1620_v36 = vadd.s32 %v1619_v32, %v1610_v10 }
  0xf6   : > { %v1640_v51 = vadd.s32 %v1638_v47, %v1636_v55  ;;  %v2170_v41 = vand.u32 2147483647, %v3454_v28  ;;  %v452_v35 = vmul.f32 %v451_v60, %v3465_v3  ;;  %vm460_vm9 = vcmp.eq.s32.totalorder %v3421_v62, 2  ;;  %v265_v62 = vpop.f32.mrf.mxu0 }
  0xf7   : > { %v461_v42 = vxor.u32 2147483648, %v444_v53  ;;  %v2173_v61 = vand.u32 2139095040, %v3454_v28  ;;  %v1052_v11 = vxor.u32 2147483648, %v1051_v49  ;;  %v1632_v5 = vshrl.u32 %v3475_v37, 16 }
  0xf8   : > { %v1639_v57 = vadd.s32 %v1635_v27, %v1631_v19  ;;  %v1641_v58 = vadd.s32 %v1640_v51, %v1630_v43  ;;  %v458_v40 = vxor.u32 2147483648, %v452_v35  ;;  %v1057_v10 = vsel %vm3482_vm2, 0, %v3460_v33 }
  0xf9   : > { %v1589_v3 = vsel %vm1583_vm14, %v3451_v26, %v3469_v4  ;;  %v2174_v8 = vshrl.u32 %v2173_v61, 23  ;;  %v1053_v9 = vsel %vm932_vm10, %v1052_v11, %v1051_v49  ;;  %v2177_v37 = vand.u32 8388607, %v2170_v41 }
  0xfa   : > { %v1642_v63 = vadd.s32 %v1641_v58, %v1632_v5  ;;  %vm1645_vm11 = vc.u32 %v1620_v36, %v1639_v57  ;;  %v459_v44 = vsel %vm457_vm4, %v444_v53, %v458_v40  ;;  %v462_v33 = vsel %vm460_vm9, %v461_v42, %v452_v35 }
  0xfb   : > { %v1056_v16 = vsel %vm3482_vm2, %v3225_v24, %v1053_v9  ;;  %v2943_v26 = vadd.s32 4294967169, %v2174_v8  ;;  %v463_v4 = vsel %vm456_vm6, %v459_v44, %v462_v33  ;;  %v1074_v14 = vadd.s32 3, %v1057_v10 }
  0xfc   : > { %v1058_v12 = vmul.f32 %v1056_v16, %v1056_v16  ;;  %v1646_v25 = vadd.s32 1, %v1642_v63  ;;  %v464_v6 = vsel %vm453_vm7, nan, %v463_v4  ;;  %v1643_v34 = vmul.u32 %v3403_v17, %v1589_v3 }
  0xfd   : > { %v2178_v59 = vor.u32 8388608, %v2177_v37  ;;  %v2180_v0 = vadd.s32 1, %v2943_v26  ;;  %2790 = vst [vmem:[%s3525_s20] sm:$0xff] %v464_v6  ;;  %v1075_v22 = vand.u32 3, %v1074_v14  ;;  %v3532_v45 = vadd.f32 %v3219_v20, %v265_v62 }
  0xfe   : > { %v1059_v30 = vmul.f32 -0.001358992, %v1058_v12  ;;  %v1066_v13 = vmul.f32 -0.00019511016, %v1058_v12  ;;  %v1647_v38 = vsel %vm1645_vm11, %v1646_v25, %v1642_v63  ;;  %vm1552_vm12 = vcmp.lt.s32.totalorder %v3242_v46, 0 }
  0xff   : > { %v1648_v18 = vadd.s32 %v1647_v38, %v1643_v34  ;;  %vm2181_vm10 = vcmp.gt.s32.totalorder %v2180_v0, 0  ;;  %v3529_v17 = vshll.u32 %v2178_v59, 8  ;;  %vm3539_vm13 = vcmp.le.f32.partialorder %v1550_v2, 0.7853982 }
 0x100   : > { %v1060_v19 = vadd.f32 0.041655596, %v1059_v30  ;;  %v1067_v21 = vadd.f32 0.008332121, %v1066_v13  ;;  %v2182_v23 = vsel %vm2181_vm10, %v2180_v0, 0  ;;  %v3543_v43 = vadd.s32 %v1639_v57, %v1620_v36 }
 0x101   : > { %v1649_v27 = vadd.s32 536870912, %v1648_v18  ;;  %v2184_v15 = vand.u32 31, %v2182_v23  ;;  %v465_v20 = vand.u32 2147483647, %v3532_v45  ;;  %vm1077_vm14 = vcmp.eq.s32.totalorder %v1075_v22, 0 }
 0x102   : > { %v1061_v31 = vmul.f32 %v1060_v19, %v1058_v12  ;;  %v1068_v29 = vmul.f32 %v1067_v21, %v1058_v12  ;;  %vm1080_vm15 = vcmp.eq.s32.totalorder %v1075_v22, 2  ;;  %v3546_v49 = vshrl.u32 %v2182_v23, 5 }
 0x103   : > { %v1650_v39 = vshrl.u32 %v1649_v27, 30  ;;  %v3535_v32 = vsub.s32 32, %v2184_v15  ;;  %v3549_v51 = vand.u32 65535, %v3529_v17  ;;  %v468_v35 = vand.u32 2139095040, %v3532_v45 }
 0x104   : > { %v1062_v55 = vadd.f32 -0.4999988, %v1061_v31  ;;  %v1069_v53 = vadd.f32 -0.16666654, %v1068_v29  ;;  %vm1076_vm0 = vcmp.lt.s32.totalorder %v1075_v22, 2  ;;  %v3553_v11 = vshrl.u32 %v3529_v17, 16 }
 0x105   : > { %v1651_v47 = vshll.u32 %v1650_v39, 30  ;;  %v1674_v2 = vsub.s32 4, %v1650_v39  ;;  %vm1073_vm1 = vweird.f32 %v3225_v24  ;;  %v2187_v5 = vshll.u32 %v3089_v48, %v2184_v15 }
 0x106   : > { %v1063_v42 = vmul.f32 %v1062_v55, %v1058_v12  ;;  %v1070_v61 = vmul.f32 %v1069_v53, %v1058_v12  ;;  %v2188_v57 = vshrl.u32 %v3090_v50, %v3535_v32  ;;  %v2191_v58 = vshrl.u32 %v3091_v52, %v3535_v32 }
 0x107   : > { %v1652_v36 = vsub.s32 %v1648_v18, %v1651_v47  ;;  %v2190_v3 = vshll.u32 %v3090_v50, %v2184_v15  ;;  %v2197_v8 = vshrl.u32 %v3093_v56, %v3535_v32  ;;  %v2193_v63 = vshll.u32 %v3091_v52, %v2184_v15 }
 0x108   : > { %v1064_v40 = vadd.f32 1.0, %v1063_v42  ;;  %v1071_v10 = vadd.f32 1.0, %v1070_v61  ;;  %v2194_v37 = vshrl.u32 %v3092_v54, %v3535_v32  ;;  %v1675_v26 = vsel %vm1552_vm12, %v1674_v2, %v1650_v39 }
 0x109   : > { %vm1653_vm2 = vcmp.lt.s32.totalorder %v1652_v36, 0  ;;  %v1654_v9 = vsub.s32 0, %v1652_v36  ;;  %v2196_v4 = vshll.u32 %v3092_v54, %v2184_v15  ;;  %v2189_v14 = vor.u32 %v2188_v57, %v2187_v5 }
 0x10a   : > { %v1072_v44 = vmul.f32 %v1071_v10, %v1056_v16  ;;  %v1081_v33 = vxor.u32 2147483648, %v1064_v40  ;;  %v2192_v25 = vor.u32 %v2191_v58, %v2190_v3  ;;  %v2200_v6 = vshrl.u32 %v3094_v1, %v3535_v32 }
 0x10b   : > { %v1655_v12 = vsel %vm1653_vm2, %v1654_v9, %v1652_v36  ;;  %v2198_v0 = vor.u32 %v2197_v8, %v2196_v4  ;;  %v469_v30 = vshrl.u32 %v468_v35, 23  ;;  %v1677_v13 = vsel %vm3539_vm13, 0, %v1675_v26 }
 0x10c   : > { %v1078_v34 = vxor.u32 2147483648, %v1072_v44  ;;  %v1656_v59 = vclz %v1655_v12  ;;  %v2195_v16 = vor.u32 %v2194_v37, %v2193_v63  ;;  %v2199_v38 = vshll.u32 %v3093_v56, %v2184_v15 }
 0x10d   : > { %v3577_v62 = vand.u32 8388607, %v465_v20  ;;  %v1082_v19 = vsel %vm1080_vm15, %v1081_v33, %v1072_v44  ;;  %vm2202_vm3 = vcmp.lt.s32.totalorder %v3546_v49, 1  ;;  %vm2205_vm4 = vcmp.lt.s32.totalorder %v3546_v49, 4 }
 0x10e   : > { %v1079_v18 = vsel %vm1077_vm14, %v1064_v40, %v1078_v34  ;;  %v2932_v21 = vadd.s32 4294967294, %v1656_v59  ;;  %v2201_v27 = vor.u32 %v2200_v6, %v2199_v38  ;;  %v2210_v31 = vsel %vm2202_vm3, %v2189_v14, %v2192_v25 }
 0x10f   : > { %v1083_v23 = vsel %vm1076_vm0, %v1079_v18, %v1082_v19  ;;  %vm2204_vm6 = vcmp.lt.s32.totalorder %v3546_v49, 3  ;;  %v2211_v29 = vsel %vm2205_vm4, %v2198_v0, 920167782  ;;  %v1694_v55 = vadd.s32 3, %v1677_v13 }
 0x110   : > { %v1084_v15 = vsel %vm1073_vm1, nan, %v1083_v23  ;;  %vm2933_vm5 = vcmp.lt.s32.totalorder %v2932_v21, 0  ;;  %vm2203_vm7 = vcmp.lt.s32.totalorder %v3546_v49, 2  ;;  %v2212_v22 = vsel %vm2204_vm6, %v2195_v16, %v2211_v29 }
 0x111   : > { %2794 = vst [vmem:[%s3525_s20 + $0x20] sm:$0xff] %v1084_v15  ;;  %v1659_v39 = vsel %vm2933_vm5, 0, %v2932_v21  ;;  %v2213_v24 = vsel %vm2203_vm7, %v2210_v31, %v2212_v22  ;;  %v2214_v35 = vsel %vm2202_vm3, %v2192_v25, %v2195_v16  ;;  %v2186_v42 = vshrl.u32 %v3089_v48, %v3535_v32 }
 0x112   : > { %v1660_v53 = vsub.s32 32, %v1659_v39  ;;  %v1664_v47 = vsub.s32 4294967266, %v1659_v39  ;;  %v2215_v61 = vsel %vm2205_vm4, %v2201_v27, 1326507024  ;;  %v2243_v2 = vand.u32 65535, %v2213_v24 }
 0x113   : > { %v2244_v5 = vshrl.u32 %v2213_v24, 16  ;;  %v1661_v57 = vshll.u32 %v1652_v36, %v1659_v39  ;;  %v2216_v10 = vsel %vm2204_vm6, %v2198_v0, %v2215_v61  ;;  %v3606_v3 = vand.u32 3, %v1694_v55 }
 0x114   : > { %v1662_v58 = vshrl.u32 %v3543_v43, %v1660_v53  ;;  %v1665_v40 = vadd.s32 127, %v1664_v47  ;;  %v2207_v8 = vsel %vm2205_vm4, %v2195_v16, 2102212464  ;;  %v2217_v32 = vsel %vm2203_vm7, %v2214_v35, %v2216_v10 }
 0x115   : > { %v2246_v9 = vmul.u32 %v2244_v5, %v3549_v51  ;;  %v2221_v44 = vand.u32 65535, %v2217_v32  ;;  %v2222_v36 = vshrl.u32 %v2217_v32, 16  ;;  %v2206_v43 = vsel %vm2202_vm3, %v2186_v42, %v2189_v14 }
 0x116   : > { %v1663_v63 = vor.u32 %v1662_v58, %v1661_v57  ;;  %v1666_v37 = vshll.u32 %v1665_v40, 23  ;;  %v2245_v33 = vmul.u32 %v2243_v2, %v3549_v51  ;;  %v2247_v26 = vmul.u32 %v2243_v2, %v3553_v11 }
 0x117   : > { %v2249_v4 = vshll.u32 %v2246_v9, 16  ;;  %v2208_v6 = vsel %vm2204_vm6, %v2192_v25, %v2207_v8  ;;  %v2224_v34 = vmul.u32 %v2222_v36, %v3549_v51  ;;  %v2910_v59 = vadd.s32 4294967169, %v469_v30 }
 0x118   : > { %v1667_v12 = vor.u32 4788187, %v1666_v37  ;;  %v1670_v0 = vcvt.s32.f32 %v1663_v63  ;;  %v2225_v13 = vmul.u32 %v2221_v44, %v3553_v11  ;;  %v2248_v16 = vmul.u32 %v2244_v5, %v3553_v11 }
 0x119   : > { %vm2253_vm8 = vc.u32 %v2245_v33, %v2249_v4  ;;  %v2223_v14 = vmul.u32 %v2221_v44, %v3549_v51  ;;  %v2227_v18 = vshll.u32 %v2224_v34, 16  ;;  %v2226_v21 = vmul.u32 %v2222_v36, %v3553_v11 }
 0x11a   : > { %v1668_v38 = vand.u32 2147483647, %v1667_v12  ;;  %v2254_v19 = vsel %vm2253_vm8, 1, %v3095_v7  ;;  %v2251_v23 = vshll.u32 %v2247_v26, 16  ;;  %v2255_v27 = vadd.s32 %v2249_v4, %v2245_v33 }
 0x11b   : > { %v2256_v25 = vadd.s32 %v2254_v19, %v2248_v16  ;;  %v2229_v15 = vshll.u32 %v2225_v13, 16  ;;  %vm2231_vm9 = vc.u32 %v2223_v14, %v2227_v18  ;;  %v2233_v30 = vadd.s32 %v2227_v18, %v2223_v14 }
 0x11c   : > { %v1671_v31 = vmul.f32 %v1670_v0, %v1668_v38  ;;  %v2209_v29 = vsel %vm2203_vm7, %v2206_v43, %v2208_v6  ;;  %v2232_v39 = vsel %vm2231_vm9, 1, %v3095_v7  ;;  %vm2257_vm11 = vc.u32 %v2255_v27, %v2251_v23 }
 0x11d   : > { %v475_v55 = vadd.s32 1, %v2910_v59  ;;  %v2234_v22 = vadd.s32 %v2232_v39, %v2226_v21  ;;  %vm2235_vm10 = vc.u32 %v2233_v30, %v2229_v15  ;;  %v2258_v53 = vsel %vm2257_vm11, 1, %v3095_v7 }
 0x11e   : > { %v1672_v51 = vxor.u32 2147483648, %v1671_v31  ;;  %v2236_v11 = vsel %vm2235_vm10, 1, %v3095_v7  ;;  %v2250_v47 = vshrl.u32 %v2246_v9, 16  ;;  %v2260_v24 = vadd.s32 %v2258_v53, %v2256_v25 }
 0x11f   : > { %vm476_vm14 = vcmp.gt.s32.totalorder %v475_v55, 0  ;;  %v2228_v42 = vshrl.u32 %v2224_v34, 16  ;;  %v2238_v49 = vadd.s32 %v2236_v11, %v2234_v22  ;;  %v2252_v5 = vshrl.u32 %v2247_v26, 16 }
 0x120   : > { %v1673_v35 = vsel %vm1552_vm12, %v1672_v51, %v1671_v31  ;;  %v477_v61 = vsel %vm476_vm14, %v475_v55, 0  ;;  %v2261_v57 = vadd.s32 %v2260_v24, %v2250_v47  ;;  %v2230_v10 = vshrl.u32 %v2225_v13, 16 }
 0x121   : > { %v1676_v2 = vsel %vm3539_vm13, %v3242_v46, %v1673_v35  ;;  %v479_v58 = vand.u32 31, %v477_v61  ;;  %v2239_v8 = vadd.s32 %v2238_v49, %v2228_v42  ;;  %v2263_v32 = vmul.u32 %v3529_v17, %v2209_v29 }
 0x122   : > { %v1678_v40 = vmul.f32 %v1676_v2, %v1676_v2  ;;  %v2262_v9 = vadd.s32 %v2261_v57, %v2252_v5  ;;  %v473_v63 = vor.u32 8388608, %v3577_v62  ;;  %v3642_v60 = vadd.s32 %v2255_v27, %v2251_v23 }
 0x123   : > { %v3637_v37 = vsub.s32 32, %v479_v58  ;;  %v482_v44 = vshll.u32 %v3089_v48, %v479_v58  ;;  %v3640_v33 = vadd.s32 %v2239_v8, %v2230_v10  ;;  %v485_v12 = vshll.u32 %v3090_v50, %v479_v58 }
 0x124   : > { %v1679_v36 = vmul.f32 -0.001358992, %v1678_v40  ;;  %v1686_v43 = vmul.f32 -0.00019511016, %v1678_v40  ;;  %v2266_v26 = vadd.s32 1, %v2262_v9  ;;  %v488_v34 = vshll.u32 %v3091_v52, %v479_v58 }
 0x125   : > { %v483_v4 = vshrl.u32 %v3090_v50, %v3637_v37  ;;  %v486_v17 = vshrl.u32 %v3091_v52, %v3637_v37  ;;  %vm2265_vm12 = vc.u32 %v3640_v33, %v3642_v60  ;;  %v3652_v0 = vshrl.u32 %v477_v61, 5 }
 0x126   : > { %v1680_v62 = vadd.f32 0.041655596, %v1679_v36  ;;  %v1687_v6 = vadd.f32 0.008332121, %v1686_v43  ;;  %v2267_v59 = vsel %vm2265_vm12, %v2266_v26, %v2262_v9  ;;  %v489_v16 = vshrl.u32 %v3092_v54, %v3637_v37 }
 0x127   : > { %v3654_v13 = vor.u32 %v483_v4, %v482_v44  ;;  %v2268_v18 = vadd.s32 %v2267_v59, %v2263_v32  ;;  %v491_v19 = vshll.u32 %v3092_v54, %v479_v58  ;;  %v3659_v21 = vor.u32 %v486_v17, %v485_v12 }
 0x128   : > { %v1681_v38 = vmul.f32 %v1680_v62, %v1678_v40  ;;  %v1688_v14 = vmul.f32 %v1687_v6, %v1678_v40  ;;  %v492_v23 = vshrl.u32 %v3093_v56, %v3637_v37  ;;  %v494_v27 = vshll.u32 %v3093_v56, %v479_v58 }
 0x129   : > { %v495_v25 = vshrl.u32 %v3094_v1, %v3637_v37  ;;  %v2269_v30 = vadd.s32 536870912, %v2268_v18  ;;  %v490_v29 = vor.u32 %v489_v16, %v488_v34  ;;  %vm497_vm13 = vcmp.lt.s32.totalorder %v3652_v0, 1 }
 0x12a   : > { %v1682_v31 = vadd.f32 -0.4999988, %v1681_v38  ;;  %v1689_v15 = vadd.f32 -0.16666654, %v1688_v14  ;;  %v493_v39 = vor.u32 %v492_v23, %v491_v19  ;;  %vm499_vm15 = vcmp.lt.s32.totalorder %v3652_v0, 3 }
 0x12b   : > { %v496_v55 = vor.u32 %v495_v25, %v494_v27  ;;  %v3668_v53 = vshrl.u32 %v2269_v30, 30  ;;  %vm500_vm0 = vcmp.lt.s32.totalorder %v3652_v0, 4  ;;  %vm1696_vm1 = vcmp.lt.s32.totalorder %v3606_v3, 2 }
 0x12c   : > { %v1683_v51 = vmul.f32 %v1682_v31, %v1678_v40  ;;  %v1690_v22 = vmul.f32 %v1689_v15, %v1678_v40  ;;  %v506_v11 = vsel %vm500_vm0, %v493_v39, 920167782  ;;  %v3674_v47 = vshll.u32 %v473_v63, 8 }
 0x12d   : > { %v2271_v42 = vshll.u32 %v3668_v53, 30  ;;  %v505_v49 = vsel %vm497_vm13, %v3654_v13, %v3659_v21  ;;  %vm1697_vm2 = vcmp.eq.s32.totalorder %v3606_v3, 0  ;;  %vm498_vm3 = vcmp.lt.s32.totalorder %v3652_v0, 2 }
 0x12e   : > { %v1684_v24 = vadd.f32 1.0, %v1683_v51  ;;  %v1691_v35 = vadd.f32 1.0, %v1690_v22  ;;  %v507_v61 = vsel %vm499_vm15, %v490_v29, %v506_v11  ;;  %v510_v5 = vsel %vm500_vm0, %v496_v55, 1326507024 }
 0x12f   : > { %v2272_v40 = vsub.s32 %v2268_v18, %v2271_v42  ;;  %v509_v10 = vsel %vm497_vm13, %v3659_v21, %v490_v29  ;;  %vm1700_vm4 = vcmp.eq.s32.totalorder %v3606_v3, 2  ;;  %v508_v8 = vsel %vm498_vm3, %v505_v49, %v507_v61 }
 0x130   : > { %v1692_v57 = vmul.f32 %v1691_v35, %v1676_v2  ;;  %v1701_v58 = vxor.u32 2147483648, %v1684_v24  ;;  %v511_v32 = vsel %vm499_vm15, %v493_v39, %v510_v5  ;;  %v514_v9 = vand.u32 65535, %v3674_v47 }
 0x131   : > { %vm2273_vm5 = vcmp.lt.s32.totalorder %v2272_v40, 0  ;;  %v2274_v44 = vsub.s32 0, %v2272_v40  ;;  %v515_v2 = vshrl.u32 %v3674_v47, 16  ;;  %v481_v43 = vshrl.u32 %v3089_v48, %v3637_v37 }
 0x132   : > { %v1698_v63 = vxor.u32 2147483648, %v1692_v57  ;;  %v1702_v36 = vsel %vm1700_vm4, %v1701_v58, %v1692_v57  ;;  %v512_v26 = vsel %vm498_vm3, %v509_v10, %v511_v32  ;;  %v538_v4 = vand.u32 65535, %v508_v8  ;;  %v277_v10 = vpop.f32.mrf.mxu1 }
 0x133   : > { %v2275_v17 = vsel %vm2273_vm5, %v2274_v44, %v2272_v40  ;;  %v516_v62 = vand.u32 65535, %v512_v26  ;;  %v517_v6 = vshrl.u32 %v512_v26, 16  ;;  %vm1693_vm6 = vweird.f32 %v3242_v46  ;;  %v289_v44 = vpop.f32.mrf.mxu2 }
 0x134   : > { %v1699_v12 = vsel %vm1697_vm2, %v1684_v24, %v1698_v63  ;;  %v2276_v59 = vclz %v2275_v17  ;;  %v539_v16 = vshrl.u32 %v508_v8, 16  ;;  %v2264_v18 = vadd.s32 %v3642_v60, %v3640_v33 }
 0x135   : > { %v1703_v34 = vsel %vm1696_vm1, %v1699_v12, %v1702_v36  ;;  %v519_v14 = vmul.u32 %v517_v6, %v514_v9  ;;  %v520_v37 = vmul.u32 %v516_v62, %v515_v2  ;;  %v501_v23 = vsel %vm497_vm13, %v481_v43, %v3654_v13  ;;  %v3726_v12 = vld [vmem:[%s5003_s2] ss:$0 sm:$0xff] }
 0x136   : > { %v1704_v38 = vsel %vm1693_vm6, nan, %v1703_v34  ;;  %v2944_v19 = vadd.s32 4294967294, %v2276_v59  ;;  %v502_v46 = vsel %vm500_vm0, %v490_v29, 2102212464  ;;  %v518_v27 = vmul.u32 %v516_v62, %v514_v9 }
 0x137   : > { %2798 = vst [vmem:[%s3525_s20 + $0x40] sm:$0xff] %v1704_v38  ;;  %v522_v3 = vshll.u32 %v519_v14, 16  ;;  %v540_v25 = vmul.u32 %v538_v4, %v514_v9  ;;  %v521_v31 = vmul.u32 %v517_v6, %v515_v2  ;;  %v524_v15 = vshll.u32 %v520_v37, 16 }
 0x138   : > { %vm2945_vm7 = vcmp.lt.s32.totalorder %v2944_v19, 0  ;;  %v541_v30 = vmul.u32 %v539_v16, %v514_v9  ;;  %v542_v51 = vmul.u32 %v538_v4, %v515_v2  ;;  %vm2172_vm9 = vcmp.lt.s32.totalorder %v3454_v28, 0 }
 0x139   : > { %v2279_v39 = vsel %vm2945_vm7, 0, %v2944_v19  ;;  %vm526_vm8 = vc.u32 %v518_v27, %v522_v3  ;;  %v528_v55 = vadd.s32 %v522_v3, %v518_v27  ;;  %v523_v22 = vshrl.u32 %v519_v14, 16 }
 0x13a   : > { %v2280_v33 = vsub.s32 32, %v2279_v39  ;;  %v2284_v60 = vsub.s32 4294967266, %v2279_v39  ;;  %v527_v13 = vsel %vm526_vm8, 1, %v3095_v7  ;;  %v543_v29 = vmul.u32 %v539_v16, %v515_v2 }
 0x13b   : > { %v529_v11 = vadd.s32 %v527_v13, %v521_v31  ;;  %vm530_vm11 = vc.u32 %v528_v55, %v524_v15  ;;  %v544_v24 = vshll.u32 %v541_v30, 16  ;;  %v2281_v35 = vshll.u32 %v2272_v40, %v2279_v39 }
 0x13c   : > { %v2282_v42 = vshrl.u32 %v2264_v18, %v2280_v33  ;;  %v2285_v49 = vadd.s32 127, %v2284_v60  ;;  %v531_v61 = vsel %vm530_vm11, 1, %v3095_v7  ;;  %v546_v57 = vshll.u32 %v542_v51, 16 }
 0x13d   : > { %v533_v5 = vadd.s32 %v531_v61, %v529_v11  ;;  %vm548_vm10 = vc.u32 %v540_v25, %v544_v24  ;;  %v550_v58 = vadd.s32 %v544_v24, %v540_v25  ;;  %v2294_v9 = vsub.s32 4, %v3668_v53 }
 0x13e   : > { %v2283_v8 = vor.u32 %v2282_v42, %v2281_v35  ;;  %v2286_v32 = vshll.u32 %v2285_v49, 23  ;;  %v549_v63 = vsel %vm548_vm10, 1, %v3095_v7  ;;  %v503_v40 = vsel %vm499_vm15, %v3659_v21, %v502_v46 }
 0x13f   : > { %v534_v2 = vadd.s32 %v533_v5, %v523_v22  ;;  %v551_v36 = vadd.s32 %v549_v63, %v543_v29  ;;  %vm552_vm14 = vc.u32 %v550_v58, %v546_v57  ;;  %v525_v26 = vshrl.u32 %v520_v37, 16 }
 0x140   : > { %v2287_v43 = vor.u32 4788187, %v2286_v32  ;;  %v553_v4 = vsel %vm552_vm14, 1, %v3095_v7  ;;  %v3729_v17 = vadd.f32 %v3726_v12, %v277_v10  ;;  %v2290_v62 = vcvt.s32.f32 %v2283_v8 }
 0x141   : > { %v545_v6 = vshrl.u32 %v541_v30, 16  ;;  %v555_v34 = vadd.s32 %v553_v4, %v551_v36  ;;  %v3732_v21 = vadd.f32 %v3726_v12, %v289_v44  ;;  %v535_v16 = vadd.s32 %v534_v2, %v525_v26 }
 0x142   : > { %v2288_v59 = vand.u32 2147483647, %v2287_v43  ;;  %v1085_v38 = vand.u32 2147483647, %v3729_v17  ;;  %v1088_v14 = vand.u32 2139095040, %v3729_v17  ;;  %v2295_v37 = vsel %vm2172_vm9, %v2294_v9, %v3668_v53 }
 0x143   : > { %v547_v18 = vshrl.u32 %v542_v51, 16  ;;  %v556_v19 = vadd.s32 %v555_v34, %v545_v6  ;;  %v554_v27 = vadd.s32 %v550_v58, %v546_v57  ;;  %vm2171_vm12 = vcmp.le.f32.partialorder %v2170_v41, 0.7853982 }
 0x144   : > { %v2291_v46 = vmul.f32 %v2290_v62, %v2288_v59  ;;  %v1089_v3 = vshrl.u32 %v1088_v14, 23  ;;  %v1092_v25 = vand.u32 8388607, %v1085_v38  ;;  %v504_v31 = vsel %vm498_vm3, %v501_v23, %v503_v40 }
 0x145   : > { %v557_v15 = vadd.s32 %v556_v19, %v547_v18  ;;  %v1708_v30 = vand.u32 2139095040, %v3732_v21  ;;  %v2297_v55 = vsel %vm2171_vm12, 0, %v2295_v37  ;;  %vm560_vm13 = vc.u32 %v535_v16, %v554_v27 }
 0x146   : > { %v2292_v39 = vxor.u32 2147483648, %v2291_v46  ;;  %v2922_v53 = vadd.s32 4294967169, %v1089_v3  ;;  %v1093_v33 = vor.u32 8388608, %v1092_v25  ;;  %v558_v22 = vmul.u32 %v3674_v47, %v504_v31 }
 0x147   : > { %v561_v51 = vadd.s32 1, %v557_v15  ;;  %v2314_v11 = vadd.s32 3, %v2297_v55  ;;  %v1709_v23 = vshrl.u32 %v1708_v30, 23  ;;  %v3754_v9 = vadd.s32 %v554_v27, %v535_v16 }
 0x148   : > { %v2293_v60 = vsel %vm2172_vm9, %v2292_v39, %v2291_v46  ;;  %v1095_v13 = vadd.s32 1, %v2922_v53  ;;  %v3750_v42 = vshll.u32 %v1093_v33, 8  ;;  %v1705_v40 = vand.u32 2147483647, %v3732_v21 }
 0x149   : > { %v2296_v41 = vsel %vm2171_vm12, %v3454_v28, %v2293_v60  ;;  %v562_v0 = vsel %vm560_vm13, %v561_v51, %v557_v15  ;;  %v3752_v57 = vand.u32 3, %v2314_v11  ;;  %v2934_v10 = vadd.s32 4294967169, %v1709_v23 }
 0x14a   : > { %v2298_v29 = vmul.f32 %v2296_v41, %v2296_v41  ;;  %v563_v24 = vadd.s32 %v562_v0, %v558_v22  ;;  %vm1096_vm15 = vcmp.gt.s32.totalorder %v1095_v13, 0  ;;  %v3757_v44 = vand.u32 65535, %v3750_v42 }
 0x14b   : > { %v1097_v35 = vsel %vm1096_vm15, %v1095_v13, 0  ;;  %vm467_vm0 = vcmp.lt.s32.totalorder %v3532_v45, 0  ;;  %v3762_v26 = vshrl.u32 %v3750_v42, 16  ;;  %vm2320_vm1 = vcmp.eq.s32.totalorder %v3752_v57, 2 }
 0x14c   : > { %v2299_v49 = vmul.f32 -0.001358992, %v2298_v29  ;;  %v2306_v61 = vmul.f32 -0.00019511016, %v2298_v29  ;;  %v564_v5 = vadd.s32 536870912, %v563_v24  ;;  %v1099_v58 = vand.u32 31, %v1097_v35 }
 0x14d   : > { %v3765_v4 = vshrl.u32 %v1097_v35, 5  ;;  %v3769_v34 = vadd.s32 1, %v2934_v10  ;;  %vm2317_vm2 = vcmp.eq.s32.totalorder %v3752_v57, 0  ;;  %vm2316_vm3 = vcmp.lt.s32.totalorder %v3752_v57, 2 }
 0x14e   : > { %v2300_v47 = vadd.f32 0.041655596, %v2299_v49  ;;  %v2307_v8 = vadd.f32 0.008332121, %v2306_v61  ;;  %v565_v32 = vshrl.u32 %v564_v5, 30  ;;  %v1100_v63 = vsub.s32 32, %v1099_v58 }
 0x14f   : > { %v1102_v62 = vshll.u32 %v3089_v48, %v1099_v58  ;;  %v1105_v37 = vshll.u32 %v3090_v50, %v1099_v58  ;;  %v1108_v46 = vshll.u32 %v3091_v52, %v1099_v58  ;;  %vm2313_vm5 = vweird.f32 %v3454_v28 }
 0x150   : > { %v2301_v2 = vmul.f32 %v2300_v47, %v2298_v29  ;;  %v2308_v36 = vmul.f32 %v2307_v8, %v2298_v29  ;;  %v566_v43 = vshll.u32 %v565_v32, 30  ;;  %v1103_v6 = vshrl.u32 %v3090_v50, %v1100_v63 }
 0x151   : > { %v589_v18 = vsub.s32 4, %v565_v32  ;;  %v1106_v19 = vshrl.u32 %v3091_v52, %v1100_v63  ;;  %v1109_v27 = vshrl.u32 %v3092_v54, %v1100_v63  ;;  %v1111_v30 = vshll.u32 %v3092_v54, %v1099_v58 }
 0x152   : > { %v2302_v59 = vadd.f32 -0.4999988, %v2301_v2  ;;  %v2309_v16 = vadd.f32 -0.16666654, %v2308_v36  ;;  %v3771_v14 = vsub.s32 %v563_v24, %v566_v43  ;;  %v1104_v15 = vor.u32 %v1103_v6, %v1102_v62 }
 0x153   : > { %v1112_v39 = vshrl.u32 %v3093_v56, %v1100_v63  ;;  %v1114_v55 = vshll.u32 %v3093_v56, %v1099_v58  ;;  %v1115_v60 = vshrl.u32 %v3094_v1, %v1100_v63  ;;  %vm3789_vm6 = vcmp.le.f32.partialorder %v465_v20, 0.7853982 }
 0x154   : > { %v2303_v3 = vmul.f32 %v2302_v59, %v2298_v29  ;;  %v2310_v25 = vmul.f32 %v2309_v16, %v2298_v29  ;;  %vm568_vm4 = vcmp.lt.s32.totalorder %v3771_v14, 0  ;;  %v569_v31 = vsub.s32 0, %v3771_v14 }
 0x155   : > { %v1107_v11 = vor.u32 %v1106_v19, %v1105_v37  ;;  %v1110_v0 = vor.u32 %v1109_v27, %v1108_v46  ;;  %v1113_v23 = vor.u32 %v1112_v39, %v1111_v30  ;;  %v1101_v35 = vshrl.u32 %v3089_v48, %v1100_v63 }
 0x156   : > { %v2304_v53 = vadd.f32 1.0, %v2303_v3  ;;  %v2311_v51 = vadd.f32 1.0, %v2310_v25  ;;  %v570_v33 = vsel %vm568_vm4, %v569_v31, %v3771_v14  ;;  %vm1117_vm7 = vcmp.lt.s32.totalorder %v3765_v4, 1 }
 0x157   : > { %v571_v13 = vclz %v570_v33  ;;  %v590_v61 = vsel %vm467_vm0, %v589_v18, %v565_v32  ;;  %vm1118_vm8 = vcmp.lt.s32.totalorder %v3765_v4, 2  ;;  %vm1119_vm9 = vcmp.lt.s32.totalorder %v3765_v4, 3 }
 0x158   : > { %v2312_v29 = vmul.f32 %v2311_v51, %v2296_v41  ;;  %v2321_v24 = vxor.u32 2147483648, %v2304_v53  ;;  %v1116_v58 = vor.u32 %v1115_v60, %v1114_v55  ;;  %vm1120_vm11 = vcmp.lt.s32.totalorder %v3765_v4, 4 }
 0x159   : > { %v2911_v49 = vadd.s32 4294967294, %v571_v13  ;;  %v1122_v41 = vsel %vm1120_vm11, %v1110_v0, 2102212464  ;;  %v1125_v10 = vsel %vm1117_vm7, %v1104_v15, %v1107_v11  ;;  %v1126_v47 = vsel %vm1120_vm11, %v1113_v23, 920167782 }
 0x15a   : > { %v2318_v20 = vxor.u32 2147483648, %v2312_v29  ;;  %v2322_v5 = vsel %vm2320_vm1, %v2321_v24, %v2312_v29  ;;  %v1121_v63 = vsel %vm1117_vm7, %v1101_v35, %v1104_v15  ;;  %v1127_v2 = vsel %vm1119_vm9, %v1110_v0, %v1126_v47 }
 0x15b   : > { %vm2912_vm10 = vcmp.lt.s32.totalorder %v2911_v49, 0  ;;  %v1123_v6 = vsel %vm1119_vm9, %v1107_v11, %v1122_v41  ;;  %v1128_v37 = vsel %vm1118_vm8, %v1125_v10, %v1127_v2  ;;  %v1129_v18 = vsel %vm1117_vm7, %v1107_v11, %v1110_v0 }
 0x15c   : > { %v2319_v8 = vsel %vm2317_vm2, %v2304_v53, %v2318_v20  ;;  %v574_v32 = vsel %vm2912_vm10, 0, %v2911_v49  ;;  %v1130_v46 = vsel %vm1120_vm11, %v1116_v58, 1326507024  ;;  %v1158_v27 = vand.u32 65535, %v1128_v37 }
 0x15d   : > { %v2323_v36 = vsel %vm2316_vm3, %v2319_v8, %v2322_v5  ;;  %v575_v43 = vsub.s32 32, %v574_v32  ;;  %v579_v62 = vsub.s32 4294967266, %v574_v32  ;;  %v576_v16 = vshll.u32 %v3771_v14, %v574_v32 }
 0x15e   : > { %v2324_v59 = vsel %vm2313_vm5, nan, %v2323_v36  ;;  %v592_v28 = vsel %vm3789_vm6, 0, %v590_v61  ;;  %v3833_v14 = vsel %vm1118_vm8, %v1121_v63, %v1123_v6  ;;  %v1131_v3 = vsel %vm1119_vm9, %v1113_v23, %v1130_v46 }
 0x15f   : > { %2802 = vst [vmem:[%s3525_s20 + $0x60] sm:$0xff] %v2324_v59  ;;  %v577_v57 = vshrl.u32 %v3754_v9, %v575_v43  ;;  %v580_v19 = vadd.s32 127, %v579_v62  ;;  %v1159_v25 = vshrl.u32 %v1128_v37, 16  ;;  %v1132_v9 = vsel %vm1118_vm8, %v1129_v18, %v1131_v3 }
 0x160   : > { %vm1716_vm14 = vcmp.gt.s32.totalorder %v3769_v34, 0  ;;  %v1136_v30 = vand.u32 65535, %v1132_v9  ;;  %v1137_v39 = vshrl.u32 %v1132_v9, 16  ;;  %v1162_v53 = vmul.u32 %v1158_v27, %v3762_v26 }
 0x161   : > { %v578_v31 = vor.u32 %v577_v57, %v576_v16  ;;  %v581_v15 = vshll.u32 %v580_v19, 23  ;;  %v1161_v55 = vmul.u32 %v1159_v25, %v3757_v44  ;;  %v3842_v33 = vadd.s32 3, %v592_v28 }
 0x162   : > { %v1178_v60 = vmul.u32 %v3750_v42, %v3833_v14  ;;  %v3848_v13 = vand.u32 8388607, %v1705_v40  ;;  %v1139_v4 = vmul.u32 %v1137_v39, %v3757_v44  ;;  %v1140_v11 = vmul.u32 %v1136_v30, %v3762_v26 }
 0x163   : > { %v582_v51 = vor.u32 4788187, %v581_v15  ;;  %v1160_v0 = vmul.u32 %v1158_v27, %v3757_v44  ;;  %v1717_v23 = vsel %vm1716_vm14, %v3769_v34, 0  ;;  %v585_v24 = vcvt.s32.f32 %v578_v31 }
 0x164   : > { %v1163_v35 = vmul.u32 %v1159_v25, %v3762_v26  ;;  %v1164_v49 = vshll.u32 %v1161_v55, 16  ;;  %v1138_v61 = vmul.u32 %v1136_v30, %v3757_v44  ;;  %v1141_v20 = vmul.u32 %v1137_v39, %v3762_v26 }
 0x165   : > { %v583_v29 = vand.u32 2147483647, %v582_v51  ;;  %v1142_v5 = vshll.u32 %v1139_v4, 16  ;;  %v1166_v58 = vshll.u32 %v1162_v53, 16  ;;  %v1144_v10 = vshll.u32 %v1140_v11, 16 }
 0x166   : > { %vm1168_vm12 = vc.u32 %v1160_v0, %v1164_v49  ;;  %v1170_v47 = vadd.s32 %v1164_v49, %v1160_v0  ;;  %v1719_v34 = vand.u32 31, %v1717_v23  ;;  %v1165_v44 = vshrl.u32 %v1161_v55, 16 }
 0x167   : > { %v586_v41 = vmul.f32 %v585_v24, %v583_v29  ;;  %vm1146_vm13 = vc.u32 %v1138_v61, %v1142_v5  ;;  %v1148_v8 = vadd.s32 %v1142_v5, %v1138_v61  ;;  %v1169_v32 = vsel %vm1168_vm12, 1, %v3095_v7 }
 0x168   : > { %v1147_v2 = vsel %vm1146_vm13, 1, %v3095_v7  ;;  %v1171_v36 = vadd.s32 %v1169_v32, %v1163_v35  ;;  %vm1172_vm15 = vc.u32 %v1170_v47, %v1166_v58  ;;  %v3863_v16 = vsub.s32 32, %v1719_v34 }
 0x169   : > { %v587_v63 = vxor.u32 2147483648, %v586_v41  ;;  %v1149_v43 = vadd.s32 %v1147_v2, %v1141_v20  ;;  %vm1150_vm1 = vc.u32 %v1148_v8, %v1144_v10  ;;  %v1173_v26 = vsel %vm1172_vm15, 1, %v3095_v7 }
 0x16a   : > { %v1151_v6 = vsel %vm1150_vm1, 1, %v3095_v7  ;;  %v1175_v59 = vadd.s32 %v1173_v26, %v1171_v36  ;;  %v1143_v18 = vshrl.u32 %v1139_v4, 16  ;;  %v3868_v19 = vshrl.u32 %v1717_v23, 5 }
 0x16b   : > { %v588_v62 = vsel %vm467_vm0, %v587_v63, %v586_v41  ;;  %v1153_v57 = vadd.s32 %v1151_v6, %v1149_v43  ;;  %v1145_v27 = vshrl.u32 %v1140_v11, 16  ;;  %v1167_v28 = vshrl.u32 %v1162_v53, 16 }
 0x16c   : > { %v591_v37 = vsel %vm3789_vm6, %v3532_v45, %v588_v62  ;;  %v1176_v3 = vadd.s32 %v1175_v59, %v1165_v44  ;;  %v3870_v31 = vadd.s32 %v1170_v47, %v1166_v58  ;;  %v1722_v15 = vshll.u32 %v3089_v48, %v1719_v34 }
 0x16d   : > { %v593_v46 = vmul.f32 %v591_v37, %v591_v37  ;;  %v1154_v25 = vadd.s32 %v1153_v57, %v1143_v18  ;;  %v1725_v9 = vshll.u32 %v3090_v50, %v1719_v34  ;;  %v1723_v22 = vshrl.u32 %v3090_v50, %v3863_v16 }
 0x16e   : > { %v1177_v55 = vadd.s32 %v1176_v3, %v1167_v28  ;;  %v1726_v4 = vshrl.u32 %v3091_v52, %v3863_v16  ;;  %v1729_v53 = vshrl.u32 %v3092_v54, %v3863_v16  ;;  %v1731_v11 = vshll.u32 %v3092_v54, %v1719_v34 }
 0x16f   : > { %v594_v30 = vmul.f32 -0.001358992, %v593_v46  ;;  %v601_v39 = vmul.f32 -0.00019511016, %v593_v46  ;;  %v3876_v51 = vadd.s32 %v1154_v25, %v1145_v27  ;;  %v1732_v24 = vshrl.u32 %v3093_v56, %v3863_v16 }
 0x170   : > { %v1181_v29 = vadd.s32 1, %v1177_v55  ;;  %v1728_v35 = vshll.u32 %v3091_v52, %v1719_v34  ;;  %v1734_v49 = vshll.u32 %v3093_v56, %v1719_v34  ;;  %v1735_v61 = vshrl.u32 %v3094_v1, %v3863_v16 }
 0x171   : > { %v595_v0 = vadd.f32 0.041655596, %v594_v30  ;;  %v602_v23 = vadd.f32 0.008332121, %v601_v39  ;;  %vm1180_vm0 = vc.u32 %v3876_v51, %v3870_v31  ;;  %v1733_v41 = vor.u32 %v1732_v24, %v1731_v11 }
 0x172   : > { %v1182_v58 = vsel %vm1180_vm0, %v1181_v29, %v1177_v55  ;;  %v3894_v47 = vor.u32 %v1723_v22, %v1722_v15  ;;  %v3896_v8 = vor.u32 %v1726_v4, %v1725_v9  ;;  %v3898_v32 = vor.u32 %v1729_v53, %v1728_v35 }
 0x173   : > { %v596_v20 = vmul.f32 %v595_v0, %v593_v46  ;;  %v603_v5 = vmul.f32 %v602_v23, %v593_v46  ;;  %v1183_v10 = vadd.s32 %v1182_v58, %v1178_v60  ;;  %v1736_v34 = vor.u32 %v1735_v61, %v1734_v49 }
 0x174   : > { %v610_v36 = vand.u32 3, %v3842_v33  ;;  %v1713_v44 = vor.u32 8388608, %v3848_v13  ;;  %vm1740_vm2 = vcmp.lt.s32.totalorder %v3868_v19, 4  ;;  %vm1737_vm3 = vcmp.lt.s32.totalorder %v3868_v19, 1 }
 0x175   : > { %v597_v63 = vadd.f32 -0.4999988, %v596_v20  ;;  %v604_v2 = vadd.f32 -0.16666654, %v603_v5  ;;  %v1184_v43 = vadd.s32 536870912, %v1183_v10  ;;  %vm1739_vm4 = vcmp.lt.s32.totalorder %v3868_v19, 3 }
 0x176   : > { %v1746_v42 = vsel %vm1740_vm2, %v1733_v41, 920167782  ;;  %v1745_v33 = vsel %vm1737_vm3, %v3894_v47, %v3896_v8  ;;  %v1749_v60 = vsel %vm1737_vm3, %v3896_v8, %v3898_v32  ;;  %v1750_v18 = vsel %vm1740_vm2, %v1736_v34, 1326507024 }
 0x177   : > { %v598_v26 = vmul.f32 %v597_v63, %v593_v46  ;;  %v605_v62 = vmul.f32 %v604_v2, %v593_v46  ;;  %v3906_v14 = vshrl.u32 %v1184_v43, 30  ;;  %v1747_v59 = vsel %vm1739_vm4, %v3898_v32, %v1746_v42 }
 0x178   : > { %vm1738_vm5 = vcmp.lt.s32.totalorder %v3868_v19, 2  ;;  %v1751_v46 = vsel %vm1739_vm4, %v1733_v41, %v1750_v18  ;;  %v3926_v27 = vshll.u32 %v1713_v44, 8  ;;  %vm608_vm6 = vweird.f32 %v3532_v45 }
 0x179   : > { %v599_v13 = vadd.f32 1.0, %v598_v26  ;;  %v606_v6 = vadd.f32 1.0, %v605_v62  ;;  %v1186_v57 = vshll.u32 %v3906_v14, 30  ;;  %v1752_v25 = vsel %vm1738_vm5, %v1749_v60, %v1751_v46 }
 0x17a   : > { %vm611_vm7 = vcmp.lt.s32.totalorder %v610_v36, 2  ;;  %vm612_vm8 = vcmp.eq.s32.totalorder %v610_v36, 0  ;;  %v1748_v9 = vsel %vm1738_vm5, %v1745_v33, %v1747_v59  ;;  %vm615_vm9 = vcmp.eq.s32.totalorder %v610_v36, 2 }
 0x17b   : > { %v607_v28 = vmul.f32 %v606_v6, %v591_v37  ;;  %v616_v3 = vxor.u32 2147483648, %v599_v13  ;;  %v1187_v15 = vsub.s32 %v1183_v10, %v1186_v57  ;;  %v1755_v39 = vshrl.u32 %v3926_v27, 16  ;;  %v301_v6 = vpop.f32.mrf.mxu3 }
 0x17c   : > { %v1756_v55 = vand.u32 65535, %v1752_v25  ;;  %v1754_v22 = vand.u32 65535, %v3926_v27  ;;  %v1757_v4 = vshrl.u32 %v1752_v25, 16  ;;  %v1778_v23 = vand.u32 65535, %v1748_v9 }
 0x17d   : > { %v613_v30 = vxor.u32 2147483648, %v607_v28  ;;  %vm1188_vm11 = vcmp.lt.s32.totalorder %v1187_v15, 0  ;;  %v1189_v37 = vsub.s32 0, %v1187_v15  ;;  %v617_v11 = vsel %vm615_vm9, %v616_v3, %v607_v28 }
 0x17e   : > { %v1760_v0 = vmul.u32 %v1756_v55, %v1755_v39  ;;  %v1759_v35 = vmul.u32 %v1757_v4, %v1754_v22  ;;  %v1779_v49 = vshrl.u32 %v1748_v9, 16  ;;  %v1721_v5 = vshrl.u32 %v3089_v48, %v3863_v16 }
 0x17f   : > { %v614_v53 = vsel %vm612_vm8, %v599_v13, %v613_v30  ;;  %v1190_v24 = vsel %vm1188_vm11, %v1189_v37, %v1187_v15  ;;  %v1758_v58 = vmul.u32 %v1756_v55, %v1754_v22  ;;  %v1179_v10 = vadd.s32 %v3870_v31, %v3876_v51 }
 0x180   : > { %v618_v29 = vsel %vm611_vm7, %v614_v53, %v617_v11  ;;  %v1191_v20 = vclz %v1190_v24  ;;  %v1762_v41 = vshll.u32 %v1759_v35, 16  ;;  %v1761_v2 = vmul.u32 %v1757_v4, %v1755_v39 }
 0x181   : > { %v619_v61 = vsel %vm608_vm6, nan, %v618_v29  ;;  %v1764_v34 = vshll.u32 %v1760_v0, 16  ;;  %v1781_v43 = vmul.u32 %v1779_v49, %v1754_v22  ;;  %v1782_v44 = vmul.u32 %v1778_v23, %v1755_v39 }
 0x182   : > { %2791 = vst [vmem:[%s3525_s20 + $0x8] sm:$0xff] %v619_v61  ;;  %v2923_v63 = vadd.s32 4294967294, %v1191_v20  ;;  %vm1766_vm10 = vc.u32 %v1758_v58, %v1762_v41  ;;  %v1768_v36 = vadd.s32 %v1762_v41, %v1758_v58  ;;  %v1742_v45 = vsel %vm1740_vm2, %v3898_v32, 2102212464 }
 0x183   : > { %v1763_v26 = vshrl.u32 %v1759_v35, 16  ;;  %v1767_v16 = vsel %vm1766_vm10, 1, %v3095_v7  ;;  %v1784_v33 = vshll.u32 %v1781_v43, 16  ;;  %v1780_v13 = vmul.u32 %v1778_v23, %v1754_v22  ;;  %v268_v35 = vpop.f32.mrf.mxu0 }
 0x184   : > { %vm2924_vm14 = vcmp.lt.s32.totalorder %v2923_v63, 0  ;;  %v1769_v42 = vadd.s32 %v1767_v16, %v1761_v2  ;;  %vm1770_vm12 = vc.u32 %v1768_v36, %v1764_v34  ;;  %v1783_v57 = vmul.u32 %v1779_v49, %v1755_v39 }
 0x185   : > { %v1194_v62 = vsel %vm2924_vm14, 0, %v2923_v63  ;;  %v1771_v60 = vsel %vm1770_vm12, 1, %v3095_v7  ;;  %v1786_v46 = vshll.u32 %v1782_v44, 16  ;;  %vm1788_vm13 = vc.u32 %v1780_v13, %v1784_v33 }
 0x186   : > { %v1195_v31 = vsub.s32 32, %v1194_v62  ;;  %v1199_v51 = vsub.s32 4294967266, %v1194_v62  ;;  %v1196_v59 = vshll.u32 %v1187_v15, %v1194_v62  ;;  %v1773_v18 = vadd.s32 %v1771_v60, %v1769_v42 }
 0x187   : > { %v1790_v32 = vadd.s32 %v1784_v33, %v1780_v13  ;;  %v1209_v25 = vsub.s32 4, %v3906_v14  ;;  %v1789_v30 = vsel %vm1788_vm13, 1, %v3095_v7  ;;  %v3951_v55 = vadd.f32 %v3726_v12, %v301_v6 }
 0x188   : > { %v1197_v28 = vshrl.u32 %v1179_v10, %v1195_v31  ;;  %v1200_v3 = vadd.s32 127, %v1199_v51  ;;  %v1774_v9 = vadd.s32 %v1773_v18, %v1763_v26  ;;  %v1791_v22 = vadd.s32 %v1789_v30, %v1783_v57 }
 0x189   : > { %vm1792_vm15 = vc.u32 %v1790_v32, %v1786_v46  ;;  %vm1087_vm1 = vcmp.lt.s32.totalorder %v3729_v17, 0  ;;  %v1765_v15 = vshrl.u32 %v1760_v0, 16  ;;  %v2325_v53 = vand.u32 2147483647, %v3951_v55 }
 0x18a   : > { %v1198_v37 = vor.u32 %v1197_v28, %v1196_v59  ;;  %v1201_v4 = vshll.u32 %v1200_v3, 23  ;;  %v1793_v39 = vsel %vm1792_vm15, 1, %v3095_v7  ;;  %v1741_v23 = vsel %vm1737_vm3, %v1721_v5, %v3894_v47 }
 0x18b   : > { %v1785_v29 = vshrl.u32 %v1781_v43, 16  ;;  %v1795_v24 = vadd.s32 %v1793_v39, %v1791_v22  ;;  %v1210_v49 = vsel %vm1087_vm1, %v1209_v25, %v3906_v14  ;;  %v1743_v0 = vsel %vm1739_vm4, %v3896_v8, %v1742_v45 }
 0x18c   : > { %v1202_v11 = vor.u32 4788187, %v1201_v4  ;;  %v1775_v61 = vadd.s32 %v1774_v9, %v1765_v15  ;;  %v2328_v20 = vand.u32 2139095040, %v3951_v55  ;;  %v1205_v41 = vcvt.s32.f32 %v1198_v37 }
 0x18d   : > { %v1787_v10 = vshrl.u32 %v1782_v44, 16  ;;  %v1796_v63 = vadd.s32 %v1795_v24, %v1785_v29  ;;  %v1794_v2 = vadd.s32 %v1790_v32, %v1786_v46  ;;  %v2332_v5 = vand.u32 8388607, %v2325_v53 }
 0x18e   : > { %v1203_v58 = vand.u32 2147483647, %v1202_v11  ;;  %v2329_v47 = vshrl.u32 %v2328_v20, 23  ;;  %v3969_v34 = vadd.f32 %v3726_v12, %v268_v35  ;;  %v1744_v36 = vsel %vm1738_vm5, %v1741_v23, %v1743_v0 }
 0x18f   : > { %v1797_v8 = vadd.s32 %v1796_v63, %v1787_v10  ;;  %vm1086_vm0 = vcmp.le.f32.partialorder %v1085_v38, 0.7853982  ;;  %vm1800_vm2 = vc.u32 %v1775_v61, %v1794_v2  ;;  %v1798_v16 = vmul.u32 %v3926_v27, %v1744_v36 }
 0x190   : > { %v1206_v14 = vmul.f32 %v1205_v41, %v1203_v58  ;;  %v2946_v43 = vadd.s32 4294967169, %v2329_v47  ;;  %v1212_v45 = vsel %vm1086_vm0, 0, %v1210_v49  ;;  %v2333_v62 = vor.u32 8388608, %v2332_v5 }
 0x191   : > { %v1801_v26 = vadd.s32 1, %v1797_v8  ;;  %v623_v12 = vand.u32 2139095040, %v3969_v34  ;;  %v1229_v51 = vadd.s32 3, %v1212_v45  ;;  %vm1707_vm4 = vcmp.lt.s32.totalorder %v3732_v21, 0 }
 0x192   : > { %v1207_v44 = vxor.u32 2147483648, %v1206_v14  ;;  %v2335_v42 = vadd.s32 1, %v2946_v43  ;;  %v3980_v18 = vshll.u32 %v2333_v62, 8  ;;  %v3985_v30 = vadd.s32 %v1794_v2, %v1775_v61 }
 0x193   : > { %v1802_v19 = vsel %vm1800_vm2, %v1801_v26, %v1797_v8  ;;  %v624_v27 = vshrl.u32 %v623_v12, 23  ;;  %v3982_v28 = vand.u32 3, %v1229_v51  ;;  %v620_v37 = vand.u32 2147483647, %v3969_v34 }
 0x194   : > { %v1208_v33 = vsel %vm1087_vm1, %v1207_v44, %v1206_v14  ;;  %v1803_v60 = vadd.s32 %v1802_v19, %v1798_v16  ;;  %vm2336_vm3 = vcmp.gt.s32.totalorder %v2335_v42, 0  ;;  %v3989_v22 = vand.u32 65535, %v3980_v18 }
 0x195   : > { %v1211_v31 = vsel %vm1086_vm0, %v3729_v17, %v1208_v33  ;;  %v2337_v13 = vsel %vm2336_vm3, %v2335_v42, 0  ;;  %v3992_v15 = vshrl.u32 %v3980_v18, 16  ;;  %v3994_v39 = vadd.s32 4294967169, %v624_v27 }
 0x196   : > { %v1213_v38 = vmul.f32 %v1211_v31, %v1211_v31  ;;  %v1804_v6 = vadd.s32 536870912, %v1803_v60  ;;  %v2339_v59 = vand.u32 31, %v2337_v13  ;;  %v3996_v29 = vshrl.u32 %v2337_v13, 5 }
 0x197   : > { %vm1235_vm5 = vcmp.eq.s32.totalorder %v3982_v28, 2  ;;  %vm1232_vm6 = vcmp.eq.s32.totalorder %v3982_v28, 0  ;;  %vm1231_vm8 = vcmp.lt.s32.totalorder %v3982_v28, 2  ;;  %vm1228_vm9 = vweird.f32 %v3729_v17 }
 0x198   : > { %v1214_v57 = vmul.f32 -0.001358992, %v1213_v38  ;;  %v1221_v46 = vmul.f32 -0.00019511016, %v1213_v38  ;;  %v1805_v3 = vshrl.u32 %v1804_v6, 30  ;;  %v2340_v32 = vsub.s32 32, %v2339_v59 }
 0x199   : > { %v2342_v49 = vshll.u32 %v3089_v48, %v2339_v59  ;;  %v2345_v0 = vshll.u32 %v3090_v50, %v2339_v59  ;;  %v2348_v41 = vshll.u32 %v3091_v52, %v2339_v59  ;;  %v2351_v8 = vshll.u32 %v3092_v54, %v2339_v59 }
 0x19a   : > { %v1215_v25 = vadd.f32 0.041655596, %v1214_v57  ;;  %v1222_v9 = vadd.f32 0.008332121, %v1221_v46  ;;  %v1806_v4 = vshll.u32 %v1805_v3, 30  ;;  %v2343_v24 = vshrl.u32 %v3090_v50, %v2340_v32 }
 0x19b   : > { %v2346_v61 = vshrl.u32 %v3091_v52, %v2340_v32  ;;  %v2349_v10 = vshrl.u32 %v3092_v54, %v2340_v32  ;;  %v1829_v2 = vsub.s32 4, %v1805_v3  ;;  %v2352_v47 = vshrl.u32 %v3093_v56, %v2340_v32 }
 0x19c   : > { %v1216_v11 = vmul.f32 %v1215_v25, %v1213_v38  ;;  %v1223_v23 = vmul.f32 %v1222_v9, %v1213_v38  ;;  %v3999_v35 = vsub.s32 %v1803_v60, %v1806_v4  ;;  %v2344_v36 = vor.u32 %v2343_v24, %v2342_v49 }
 0x19d   : > { %v2347_v44 = vor.u32 %v2346_v61, %v2345_v0  ;;  %v2354_v45 = vshll.u32 %v3093_v56, %v2339_v59  ;;  %v2355_v26 = vshrl.u32 %v3094_v1, %v2340_v32  ;;  %v2350_v12 = vor.u32 %v2349_v10, %v2348_v41 }
 0x19e   : > { %v1217_v20 = vadd.f32 -0.4999988, %v1216_v11  ;;  %v1224_v58 = vadd.f32 -0.16666654, %v1223_v23  ;;  %vm1808_vm7 = vcmp.lt.s32.totalorder %v3999_v35, 0  ;;  %v1809_v63 = vsub.s32 0, %v3999_v35 }
 0x19f   : > { %v4019_v33 = vsel %vm1707_vm4, %v1829_v2, %v1805_v3  ;;  %v2341_v19 = vshrl.u32 %v3089_v48, %v2340_v32  ;;  %v2353_v51 = vor.u32 %v2352_v47, %v2351_v8  ;;  %v2356_v60 = vor.u32 %v2355_v26, %v2354_v45 }
 0x1a0   : > { %v1218_v5 = vmul.f32 %v1217_v20, %v1213_v38  ;;  %v1225_v14 = vmul.f32 %v1224_v58, %v1213_v38  ;;  %v1810_v43 = vsel %vm1808_vm7, %v1809_v63, %v3999_v35  ;;  %vm2357_vm11 = vcmp.lt.s32.totalorder %v3996_v29, 1 }
 0x1a1   : > { %v1811_v42 = vclz %v1810_v43  ;;  %vm4025_vm10 = vcmp.le.f32.partialorder %v1705_v40, 0.7853982  ;;  %vm2358_vm14 = vcmp.lt.s32.totalorder %v3996_v29, 2  ;;  %vm2359_vm12 = vcmp.lt.s32.totalorder %v3996_v29, 3 }
 0x1a2   : > { %v1219_v16 = vadd.f32 1.0, %v1218_v5  ;;  %v1226_v62 = vadd.f32 1.0, %v1225_v14  ;;  %vm2360_vm13 = vcmp.lt.s32.totalorder %v3996_v29, 4  ;;  %v2361_v27 = vsel %vm2357_vm11, %v2341_v19, %v2344_v36 }
 0x1a3   : > { %v2935_v6 = vadd.s32 4294967294, %v1811_v42  ;;  %v2369_v46 = vsel %vm2357_vm11, %v2347_v44, %v2350_v12  ;;  %v2366_v40 = vsel %vm2360_vm13, %v2353_v51, 920167782  ;;  %v2370_v25 = vsel %vm2360_vm13, %v2356_v60, 1326507024 }
 0x1a4   : > { %v1227_v38 = vmul.f32 %v1226_v62, %v1211_v31  ;;  %v1236_v13 = vxor.u32 2147483648, %v1219_v16  ;;  %v2365_v31 = vsel %vm2357_vm11, %v2344_v36, %v2347_v44  ;;  %v2362_v23 = vsel %vm2360_vm13, %v2350_v12, 2102212464 }
 0x1a5   : > { %vm2936_vm15 = vcmp.lt.s32.totalorder %v2935_v6, 0  ;;  %v2367_v0 = vsel %vm2359_vm12, %v2350_v12, %v2366_v40  ;;  %v2371_v61 = vsel %vm2359_vm12, %v2353_v51, %v2370_v25  ;;  %v2363_v28 = vsel %vm2359_vm12, %v2347_v44, %v2362_v23 }
 0x1a6   : > { %v1233_v57 = vxor.u32 2147483648, %v1227_v38  ;;  %v1237_v3 = vsel %vm1235_vm5, %v1236_v13, %v1227_v38  ;;  %v1814_v32 = vsel %vm2936_vm15, 0, %v2935_v6  ;;  %v2368_v10 = vsel %vm2358_vm14, %v2365_v31, %v2367_v0 }
 0x1a7   : > { %v1815_v4 = vsub.s32 32, %v1814_v32  ;;  %v1819_v11 = vsub.s32 4294967266, %v1814_v32  ;;  %v1816_v49 = vshll.u32 %v3999_v35, %v1814_v32  ;;  %v2372_v35 = vsel %vm2358_vm14, %v2369_v46, %v2371_v61 }
 0x1a8   : > { %v1234_v9 = vsel %vm1232_vm6, %v1219_v16, %v1233_v57  ;;  %v2398_v63 = vand.u32 65535, %v2368_v10  ;;  %v2399_v2 = vshrl.u32 %v2368_v10, 16  ;;  %v2376_v14 = vand.u32 65535, %v2372_v35 }
 0x1a9   : > { %v1238_v24 = vsel %vm1231_vm8, %v1234_v9, %v1237_v3  ;;  %v1817_v58 = vshrl.u32 %v3985_v30, %v1815_v4  ;;  %v1820_v41 = vadd.s32 127, %v1819_v11  ;;  %v2377_v17 = vshrl.u32 %v2372_v35, 16 }
 0x1aa   : > { %v1239_v20 = vsel %vm1228_vm9, nan, %v1238_v24  ;;  %v2401_v36 = vmul.u32 %v2399_v2, %v3989_v22  ;;  %v2402_v30 = vmul.u32 %v2398_v63, %v3992_v15  ;;  %v4057_v8 = vand.u32 8388607, %v620_v37 }
 0x1ab   : > { %2795 = vst [vmem:[%s3525_s20 + $0x28] sm:$0xff] %v1239_v20  ;;  %v1818_v47 = vor.u32 %v1817_v58, %v1816_v49  ;;  %v1821_v5 = vshll.u32 %v1820_v41, 23  ;;  %v630_v43 = vadd.s32 1, %v3994_v39  ;;  %v1832_v45 = vsel %vm4025_vm10, 0, %v4019_v33 }
 0x1ac   : > { %v4065_v26 = vsel %vm2358_vm14, %v2361_v27, %v2363_v28  ;;  %v2379_v16 = vmul.u32 %v2377_v17, %v3989_v22  ;;  %v2380_v62 = vmul.u32 %v2376_v14, %v3992_v15  ;;  %v2400_v42 = vmul.u32 %v2398_v63, %v3989_v22 }
 0x1ad   : > { %v1822_v44 = vor.u32 4788187, %v1821_v5  ;;  %v2403_v12 = vmul.u32 %v2399_v2, %v3992_v15  ;;  %v2404_v19 = vshll.u32 %v2401_v36, 16  ;;  %v1825_v39 = vcvt.s32.f32 %v1818_v47 }
 0x1ae   : > { %v2378_v60 = vmul.u32 %v2376_v14, %v3989_v22  ;;  %v2382_v38 = vshll.u32 %v2379_v16, 16  ;;  %v2381_v33 = vmul.u32 %v2377_v17, %v3992_v15  ;;  %v2384_v13 = vshll.u32 %v2380_v62, 16 }
 0x1af   : > { %v1823_v51 = vand.u32 2147483647, %v1822_v44  ;;  %v2406_v29 = vshll.u32 %v2402_v30, 16  ;;  %vm2408_vm1 = vc.u32 %v2400_v42, %v2404_v19  ;;  %v2410_v46 = vadd.s32 %v2404_v19, %v2400_v42 }
 0x1b0   : > { %vm2386_vm0 = vc.u32 %v2378_v60, %v2382_v38  ;;  %v2388_v27 = vadd.s32 %v2382_v38, %v2378_v60  ;;  %v2409_v57 = vsel %vm2408_vm1, 1, %v3095_v7  ;;  %vm631_vm2 = vcmp.gt.s32.totalorder %v630_v43, 0 }
 0x1b1   : > { %v1826_v6 = vmul.f32 %v1825_v39, %v1823_v51  ;;  %v2387_v31 = vsel %vm2386_vm0, 1, %v3095_v7  ;;  %v2411_v3 = vadd.s32 %v2409_v57, %v2403_v12  ;;  %v632_v22 = vsel %vm631_vm2, %v630_v43, 0 }
 0x1b2   : > { %v2389_v40 = vadd.s32 %v2387_v31, %v2381_v33  ;;  %vm2390_vm3 = vc.u32 %v2388_v27, %v2384_v13  ;;  %v1849_v25 = vadd.s32 3, %v1832_v45  ;;  %v2383_v9 = vshrl.u32 %v2379_v16, 16 }
 0x1b3   : > { %v1827_v32 = vxor.u32 2147483648, %v1826_v6  ;;  %v2391_v15 = vsel %vm2390_vm3, 1, %v3095_v7  ;;  %vm2412_vm5 = vc.u32 %v2410_v46, %v2406_v29  ;;  %v634_v24 = vand.u32 31, %v632_v22 }
 0x1b4   : > { %v2393_v11 = vadd.s32 %v2391_v15, %v2389_v40  ;;  %v2413_v23 = vsel %vm2412_vm5, 1, %v3095_v7  ;;  %v2405_v0 = vshrl.u32 %v2401_v36, 16  ;;  %v2418_v20 = vmul.u32 %v3980_v18, %v4065_v26 }
 0x1b5   : > { %v1828_v4 = vsel %vm1707_vm4, %v1827_v32, %v1826_v6  ;;  %v2415_v61 = vadd.s32 %v2413_v23, %v2411_v3  ;;  %v2385_v41 = vshrl.u32 %v2380_v62, 16  ;;  %v635_v28 = vsub.s32 32, %v634_v24 }
 0x1b6   : > { %v1831_v49 = vsel %vm4025_vm10, %v3732_v21, %v1828_v4  ;;  %v2394_v10 = vadd.s32 %v2393_v11, %v2383_v9  ;;  %v2407_v35 = vshrl.u32 %v2402_v30, 16  ;;  %v4084_v63 = vadd.s32 %v2410_v46, %v2406_v29 }
 0x1b7   : > { %v1833_v58 = vmul.f32 %v1831_v49, %v1831_v49  ;;  %v2416_v2 = vadd.s32 %v2415_v61, %v2405_v0  ;;  %v640_v47 = vshll.u32 %v3090_v50, %v634_v24  ;;  %v4089_v59 = vshrl.u32 %v632_v22, 5 }
 0x1b8   : > { %v4087_v17 = vadd.s32 %v2394_v10, %v2385_v41  ;;  %v641_v43 = vshrl.u32 %v3091_v52, %v635_v28  ;;  %v643_v18 = vshll.u32 %v3091_v52, %v634_v24  ;;  %v644_v44 = vshrl.u32 %v3092_v54, %v635_v28 }
 0x1b9   : > { %v1834_v5 = vmul.f32 -0.001358992, %v1833_v58  ;;  %v1841_v14 = vmul.f32 -0.00019511016, %v1833_v58  ;;  %v2417_v36 = vadd.s32 %v2416_v2, %v2407_v35  ;;  %v646_v26 = vshll.u32 %v3092_v54, %v634_v24 }
 0x1ba   : > { %vm2420_vm4 = vc.u32 %v4087_v17, %v4084_v63  ;;  %v637_v62 = vshll.u32 %v3089_v48, %v634_v24  ;;  %v638_v42 = vshrl.u32 %v3090_v50, %v635_v28  ;;  %v4099_v12 = vor.u32 %v641_v43, %v640_v47 }
 0x1bb   : > { %v1835_v45 = vadd.f32 0.041655596, %v1834_v5  ;;  %v1842_v30 = vadd.f32 0.008332121, %v1841_v14  ;;  %v2421_v16 = vadd.s32 1, %v2417_v36  ;;  %v647_v39 = vshrl.u32 %v3093_v56, %v635_v28 }
 0x1bc   : > { %v649_v60 = vshll.u32 %v3093_v56, %v634_v24  ;;  %v4103_v33 = vor.u32 %v644_v44, %v643_v18  ;;  %v650_v13 = vshrl.u32 %v3094_v1, %v635_v28  ;;  %vm655_vm6 = vcmp.lt.s32.totalorder %v4089_v59, 4 }
 0x1bd   : > { %v1836_v19 = vmul.f32 %v1835_v45, %v1833_v58  ;;  %v1843_v51 = vmul.f32 %v1842_v30, %v1833_v58  ;;  %v2422_v38 = vsel %vm2420_vm4, %v2421_v16, %v2417_v36  ;;  %v648_v57 = vor.u32 %v647_v39, %v646_v26 }
 0x1be   : > { %v2423_v27 = vadd.s32 %v2422_v38, %v2418_v20  ;;  %v628_v31 = vor.u32 8388608, %v4057_v8  ;;  %v639_v46 = vor.u32 %v638_v42, %v637_v62  ;;  %v651_v3 = vor.u32 %v650_v13, %v649_v60 }
 0x1bf   : > { %v1837_v29 = vadd.f32 -0.4999988, %v1836_v19  ;;  %v1844_v6 = vadd.f32 -0.16666654, %v1843_v51  ;;  %vm652_vm7 = vcmp.lt.s32.totalorder %v4089_v59, 1  ;;  %vm654_vm8 = vcmp.lt.s32.totalorder %v4089_v59, 3 }
 0x1c0   : > { %v2424_v22 = vadd.s32 536870912, %v2423_v27  ;;  %v1850_v9 = vand.u32 3, %v1849_v25  ;;  %v661_v15 = vsel %vm655_vm6, %v648_v57, 920167782  ;;  %v665_v4 = vsel %vm655_vm6, %v651_v3, 1326507024 }
 0x1c1   : > { %v1838_v32 = vmul.f32 %v1837_v29, %v1833_v58  ;;  %v1845_v40 = vmul.f32 %v1844_v6, %v1833_v58  ;;  %v664_v8 = vsel %vm652_vm7, %v4099_v12, %v4103_v33  ;;  %v660_v0 = vsel %vm652_vm7, %v639_v46, %v4099_v12 }
 0x1c2   : > { %v4114_v24 = vshrl.u32 %v2424_v22, 30  ;;  %v662_v25 = vsel %vm654_vm8, %v4103_v33, %v661_v15  ;;  %v666_v61 = vsel %vm654_vm8, %v648_v57, %v665_v4  ;;  %v4128_v20 = vshll.u32 %v628_v31, 8 }
 0x1c3   : > { %v1839_v11 = vadd.f32 1.0, %v1838_v32  ;;  %v1846_v23 = vadd.f32 1.0, %v1845_v40  ;;  %vm653_vm9 = vcmp.lt.s32.totalorder %v4089_v59, 2  ;;  %vm1851_vm11 = vcmp.lt.s32.totalorder %v1850_v9, 2 }
 0x1c4   : > { %v2426_v10 = vshll.u32 %v4114_v24, 30  ;;  %vm1852_vm10 = vcmp.eq.s32.totalorder %v1850_v9, 0  ;;  %vm1855_vm14 = vcmp.eq.s32.totalorder %v1850_v9, 2  ;;  %v667_v35 = vsel %vm653_vm9, %v664_v8, %v666_v61 }
 0x1c5   : > { %v1847_v58 = vmul.f32 %v1846_v23, %v1831_v49  ;;  %v1856_v41 = vxor.u32 2147483648, %v1839_v11  ;;  %v636_v5 = vshrl.u32 %v3089_v48, %v635_v28  ;;  %v663_v14 = vsel %vm653_vm9, %v660_v0, %v662_v25  ;;  %v280_v0 = vpop.f32.mrf.mxu1 }
 0x1c6   : > { %v2427_v47 = vsub.s32 %v2423_v27, %v2426_v10  ;;  %v669_v49 = vand.u32 65535, %v4128_v20  ;;  %v670_v36 = vshrl.u32 %v4128_v20, 16  ;;  %v671_v43 = vand.u32 65535, %v667_v35 }
 0x1c7   : > { %v1853_v2 = vxor.u32 2147483648, %v1847_v58  ;;  %v672_v18 = vshrl.u32 %v667_v35, 16  ;;  %v1857_v45 = vsel %vm1855_vm14, %v1856_v41, %v1847_v58  ;;  %vm1848_vm13 = vweird.f32 %v3732_v21 }
 0x1c8   : > { %vm2428_vm12 = vcmp.lt.s32.totalorder %v2427_v47, 0  ;;  %v2429_v30 = vsub.s32 0, %v2427_v47  ;;  %v675_v28 = vmul.u32 %v671_v43, %v670_v36  ;;  %v693_v19 = vand.u32 65535, %v663_v14 }
 0x1c9   : > { %v1854_v44 = vsel %vm1852_vm10, %v1839_v11, %v1853_v2  ;;  %v674_v16 = vmul.u32 %v672_v18, %v669_v49  ;;  %v694_v51 = vshrl.u32 %v663_v14, 16  ;;  %v673_v60 = vmul.u32 %v671_v43, %v669_v49 }
 0x1ca   : > { %v1858_v26 = vsel %vm1851_vm11, %v1854_v44, %v1857_v45  ;;  %v2430_v42 = vsel %vm2428_vm12, %v2429_v30, %v2427_v47  ;;  %v2419_v13 = vadd.s32 %v4084_v63, %v4087_v17  ;;  %v656_v29 = vsel %vm652_vm7, %v636_v5, %v639_v46 }
 0x1cb   : > { %v1859_v62 = vsel %vm1848_vm13, nan, %v1858_v26  ;;  %v2431_v39 = vclz %v2430_v42  ;;  %v677_v38 = vshll.u32 %v674_v16, 16  ;;  %v676_v6 = vmul.u32 %v672_v18, %v670_v36 }
 0x1cc   : > { %2799 = vst [vmem:[%s3525_s20 + $0x48] sm:$0xff] %v1859_v62  ;;  %v679_v27 = vshll.u32 %v675_v28, 16  ;;  %vm2327_vm1 = vcmp.lt.s32.totalorder %v3951_v55, 0  ;;  %v2449_v31 = vsub.s32 4, %v4114_v24  ;;  %v696_v32 = vmul.u32 %v694_v51, %v669_v49 }
 0x1cd   : > { %v2947_v21 = vadd.s32 4294967294, %v2431_v39  ;;  %vm681_vm15 = vc.u32 %v673_v60, %v677_v38  ;;  %v683_v57 = vadd.s32 %v677_v38, %v673_v60  ;;  %v697_v40 = vmul.u32 %v693_v19, %v670_v36  ;;  %v292_v38 = vpop.f32.mrf.mxu2 }
 0x1ce   : > { %v682_v3 = vsel %vm681_vm15, 1, %v3095_v7  ;;  %v678_v22 = vshrl.u32 %v674_v16, 16  ;;  %v695_v46 = vmul.u32 %v693_v19, %v669_v49  ;;  %v699_v15 = vshll.u32 %v696_v32, 16  ;;  %v4157_v49 = vld [vmem:[%s5003_s2] ss:$0 sm:$0xff] }
 0x1cf   : > { %vm2948_vm0 = vcmp.lt.s32.totalorder %v2947_v21, 0  ;;  %v684_v9 = vadd.s32 %v682_v3, %v676_v6  ;;  %vm685_vm2 = vc.u32 %v683_v57, %v679_v27  ;;  %v698_v8 = vmul.u32 %v694_v51, %v670_v36 }
 0x1d0   : > { %v2434_v63 = vsel %vm2948_vm0, 0, %v2947_v21  ;;  %v686_v17 = vsel %vm685_vm2, 1, %v3095_v7  ;;  %v701_v61 = vshll.u32 %v697_v40, 16  ;;  %vm703_vm3 = vc.u32 %v695_v46, %v699_v15 }
 0x1d1   : > { %v2435_v4 = vsub.s32 32, %v2434_v63  ;;  %v2439_v11 = vsub.s32 4294967266, %v2434_v63  ;;  %v688_v23 = vadd.s32 %v686_v17, %v684_v9  ;;  %v2436_v25 = vshll.u32 %v2427_v47, %v2434_v63 }
 0x1d2   : > { %v705_v58 = vadd.s32 %v699_v15, %v695_v46  ;;  %v704_v2 = vsel %vm703_vm3, 1, %v3095_v7  ;;  %v657_v5 = vsel %vm655_vm6, %v4103_v33, 2102212464  ;;  %v4160_v47 = vadd.f32 %v4157_v49, %v280_v0 }
 0x1d3   : > { %v2437_v41 = vshrl.u32 %v2419_v13, %v2435_v4  ;;  %v2440_v10 = vadd.s32 127, %v2439_v11  ;;  %v689_v35 = vadd.s32 %v688_v23, %v678_v22  ;;  %v706_v14 = vadd.s32 %v704_v2, %v698_v8 }
 0x1d4   : > { %vm707_vm5 = vc.u32 %v705_v58, %v701_v61  ;;  %v680_v18 = vshrl.u32 %v675_v28, 16  ;;  %v700_v45 = vshrl.u32 %v696_v32, 16  ;;  %v1240_v26 = vand.u32 2147483647, %v4160_v47 }
 0x1d5   : > { %v2438_v36 = vor.u32 %v2437_v41, %v2436_v25  ;;  %v2441_v43 = vshll.u32 %v2440_v10, 23  ;;  %v708_v44 = vsel %vm707_vm5, 1, %v3095_v7  ;;  %v1243_v33 = vand.u32 2139095040, %v4160_v47 }
 0x1d6   : > { %v710_v30 = vadd.s32 %v708_v44, %v706_v14  ;;  %v2450_v62 = vsel %vm2327_vm1, %v2449_v31, %v4114_v24  ;;  %v658_v42 = vsel %vm654_vm8, %v4099_v12, %v657_v5  ;;  %v690_v19 = vadd.s32 %v689_v35, %v680_v18 }
 0x1d7   : > { %v2442_v16 = vor.u32 4788187, %v2441_v43  ;;  %v702_v51 = vshrl.u32 %v697_v40, 16  ;;  %v1244_v39 = vshrl.u32 %v1243_v33, 23  ;;  %v1247_v60 = vand.u32 8388607, %v1240_v26 }
 0x1d8   : > { %v711_v28 = vadd.s32 %v710_v30, %v700_v45  ;;  %v2445_v6 = vcvt.s32.f32 %v2438_v36  ;;  %v709_v21 = vadd.s32 %v705_v58, %v701_v61  ;;  %vm4175_vm4 = vcmp.le.f32.partialorder %v2325_v53, 0.7853982 }
 0x1d9   : > { %v2443_v13 = vand.u32 2147483647, %v2442_v16  ;;  %v659_v12 = vsel %vm653_vm9, %v656_v29, %v658_v42  ;;  %v2925_v57 = vadd.s32 4294967169, %v1244_v39  ;;  %v2452_v3 = vsel %vm4175_vm4, 0, %v2450_v62 }
 0x1da   : > { %v712_v24 = vadd.s32 %v711_v28, %v702_v51  ;;  %vm715_vm6 = vc.u32 %v690_v19, %v709_v21  ;;  %v4184_v32 = vadd.f32 %v4157_v49, %v292_v38  ;;  %v1248_v22 = vor.u32 8388608, %v1247_v60 }
 0x1db   : > { %v2446_v31 = vmul.f32 %v2445_v6, %v2443_v13  ;;  %v1250_v9 = vadd.s32 1, %v2925_v57  ;;  %v713_v63 = vmul.u32 %v4128_v20, %v659_v12  ;;  %v2469_v17 = vadd.s32 3, %v2452_v3 }
 0x1dc   : > { %v716_v40 = vadd.s32 1, %v712_v24  ;;  %v1863_v4 = vand.u32 2139095040, %v4184_v32  ;;  %v4195_v8 = vshll.u32 %v1248_v22, 8  ;;  %v1860_v20 = vand.u32 2147483647, %v4184_v32 }
 0x1dd   : > { %v2447_v53 = vxor.u32 2147483648, %v2446_v31  ;;  %vm1251_vm7 = vcmp.gt.s32.totalorder %v1250_v9, 0  ;;  %v4200_v61 = vand.u32 3, %v2469_v17  ;;  %v4202_v58 = vadd.s32 %v709_v21, %v690_v19 }
 0x1de   : > { %v717_v46 = vsel %vm715_vm6, %v716_v40, %v712_v24  ;;  %v1252_v15 = vsel %vm1251_vm7, %v1250_v9, 0  ;;  %v1864_v5 = vshrl.u32 %v1863_v4, 23  ;;  %v4207_v43 = vand.u32 65535, %v4195_v8 }
 0x1df   : > { %v2448_v59 = vsel %vm2327_vm1, %v2447_v53, %v2446_v31  ;;  %v718_v29 = vadd.s32 %v717_v46, %v713_v63  ;;  %v1254_v23 = vand.u32 31, %v1252_v15  ;;  %v4211_v18 = vand.u32 8388607, %v1860_v20 }
 0x1e0   : > { %v4193_v11 = vsel %vm4175_vm4, %v3951_v55, %v2448_v59  ;;  %v4214_v33 = vshrl.u32 %v4195_v8, 16  ;;  %vm622_vm8 = vcmp.lt.s32.totalorder %v3969_v34, 0  ;;  %v4223_v60 = vshrl.u32 %v1252_v15, 5 }
 0x1e1   : > { %v2453_v0 = vmul.f32 %v4193_v11, %v4193_v11  ;;  %v719_v25 = vadd.s32 536870912, %v718_v29  ;;  %v1255_v41 = vsub.s32 32, %v1254_v23  ;;  %v1257_v14 = vshll.u32 %v3089_v48, %v1254_v23 }
 0x1e2   : > { %v1260_v16 = vshll.u32 %v3090_v50, %v1254_v23  ;;  %v1266_v42 = vshll.u32 %v3092_v54, %v1254_v23  ;;  %vm2475_vm9 = vcmp.eq.s32.totalorder %v4200_v61, 2  ;;  %v1263_v6 = vshll.u32 %v3091_v52, %v1254_v23 }
 0x1e3   : > { %v2454_v10 = vmul.f32 -0.001358992, %v2453_v0  ;;  %v2461_v35 = vmul.f32 -0.00019511016, %v2453_v0  ;;  %v720_v2 = vshrl.u32 %v719_v25, 30  ;;  %v1258_v36 = vshrl.u32 %v3090_v50, %v1255_v41 }
 0x1e4   : > { %v1261_v62 = vshrl.u32 %v3091_v52, %v1255_v41  ;;  %v1267_v19 = vshrl.u32 %v3093_v56, %v1255_v41  ;;  %v1264_v21 = vshrl.u32 %v3092_v54, %v1255_v41  ;;  %vm2472_vm10 = vcmp.eq.s32.totalorder %v4200_v61, 0 }
 0x1e5   : > { %v2455_v44 = vadd.f32 0.041655596, %v2454_v10  ;;  %v2462_v45 = vadd.f32 0.008332121, %v2461_v35  ;;  %v721_v30 = vshll.u32 %v720_v2, 30  ;;  %v744_v38 = vsub.s32 4, %v720_v2 }
 0x1e6   : > { %v4226_v13 = vor.u32 %v1258_v36, %v1257_v14  ;;  %v4233_v57 = vor.u32 %v1261_v62, %v1260_v16  ;;  %v1268_v31 = vor.u32 %v1267_v19, %v1266_v42  ;;  %v1269_v3 = vshll.u32 %v3093_v56, %v1254_v23 }
 0x1e7   : > { %v2456_v51 = vmul.f32 %v2455_v44, %v2453_v0  ;;  %v2463_v28 = vmul.f32 %v2462_v45, %v2453_v0  ;;  %v4221_v39 = vsub.s32 %v718_v29, %v721_v30  ;;  %v1270_v40 = vshrl.u32 %v3094_v1, %v1255_v41 }
 0x1e8   : > { %vm2471_vm14 = vcmp.lt.s32.totalorder %v4200_v61, 2  ;;  %vm1272_vm12 = vcmp.lt.s32.totalorder %v4223_v60, 1  ;;  %vm2468_vm13 = vweird.f32 %v3951_v55  ;;  %v1265_v17 = vor.u32 %v1264_v21, %v1263_v6 }
 0x1e9   : > { %v2457_v27 = vadd.f32 -0.4999988, %v2456_v51  ;;  %v2464_v12 = vadd.f32 -0.16666654, %v2463_v28  ;;  %vm723_vm11 = vcmp.lt.s32.totalorder %v4221_v39, 0  ;;  %v724_v24 = vsub.s32 0, %v4221_v39 }
 0x1ea   : > { %vm1275_vm15 = vcmp.lt.s32.totalorder %v4223_v60, 4  ;;  %v2937_v46 = vadd.s32 4294967169, %v1864_v5  ;;  %vm1274_vm1 = vcmp.lt.s32.totalorder %v4223_v60, 3  ;;  %v1868_v15 = vor.u32 8388608, %v4211_v18 }
 0x1eb   : > { %v2458_v22 = vmul.f32 %v2457_v27, %v2453_v0  ;;  %v2465_v9 = vmul.f32 %v2464_v12, %v2453_v0  ;;  %v725_v53 = vsel %vm723_vm11, %v724_v24, %v4221_v39  ;;  %vm4246_vm0 = vcmp.le.f32.partialorder %v620_v37, 0.7853982 }
 0x1ec   : > { %v726_v63 = vclz %v725_v53  ;;  %v1256_v0 = vshrl.u32 %v3089_v48, %v1255_v41  ;;  %v1271_v25 = vor.u32 %v1270_v40, %v1269_v3  ;;  %v1280_v10 = vsel %vm1272_vm12, %v4226_v13, %v4233_v57 }
 0x1ed   : > { %v2459_v59 = vadd.f32 1.0, %v2458_v22  ;;  %v2466_v29 = vadd.f32 1.0, %v2465_v9  ;;  %v4258_v14 = vsel %vm622_vm8, %v744_v38, %v720_v2  ;;  %v1281_v37 = vsel %vm1275_vm15, %v1268_v31, 920167782 }
 0x1ee   : > { %v2914_v23 = vadd.s32 4294967294, %v726_v63  ;;  %vm1273_vm3 = vcmp.lt.s32.totalorder %v4223_v60, 2  ;;  %v1282_v41 = vsel %vm1274_vm1, %v1265_v17, %v1281_v37  ;;  %v1284_v36 = vsel %vm1272_vm12, %v4233_v57, %v1265_v17 }
 0x1ef   : > { %v2467_v35 = vmul.f32 %v2466_v29, %v4193_v11  ;;  %v2476_v5 = vxor.u32 2147483648, %v2459_v59  ;;  %v1283_v2 = vsel %vm1273_vm3, %v1280_v10, %v1282_v41  ;;  %v1285_v42 = vsel %vm1275_vm15, %v1271_v25, 1326507024 }
 0x1f0   : > { %vm2915_vm2 = vcmp.lt.s32.totalorder %v2914_v23, 0  ;;  %v1286_v51 = vsel %vm1274_vm1, %v1268_v31, %v1285_v42  ;;  %v1313_v28 = vand.u32 65535, %v1283_v2  ;;  %v1314_v38 = vshrl.u32 %v1283_v2, 16 }
 0x1f1   : > { %v2473_v44 = vxor.u32 2147483648, %v2467_v35  ;;  %v2477_v11 = vsel %vm2475_vm9, %v2476_v5, %v2467_v35  ;;  %v729_v45 = vsel %vm2915_vm2, 0, %v2914_v23  ;;  %v1870_v40 = vadd.s32 1, %v2937_v46 }
 0x1f2   : > { %v730_v30 = vsub.s32 32, %v729_v45  ;;  %v731_v16 = vshll.u32 %v4221_v39, %v729_v45  ;;  %v734_v62 = vsub.s32 4294967266, %v729_v45  ;;  %v1287_v39 = vsel %vm1273_vm3, %v1284_v36, %v1286_v51 }
 0x1f3   : > { %v2474_v19 = vsel %vm2472_vm10, %v2459_v59, %v2473_v44  ;;  %v1291_v24 = vand.u32 65535, %v1287_v39  ;;  %v1292_v3 = vshrl.u32 %v1287_v39, 16  ;;  %v1316_v9 = vmul.u32 %v1314_v38, %v4207_v43 }
 0x1f4   : > { %v2478_v6 = vsel %vm2471_vm14, %v2474_v19, %v2477_v11  ;;  %v732_v21 = vshrl.u32 %v4202_v58, %v730_v30  ;;  %v735_v27 = vadd.s32 127, %v734_v62  ;;  %v1317_v61 = vmul.u32 %v1313_v28, %v4214_v33 }
 0x1f5   : > { %v2479_v12 = vsel %vm2468_vm13, nan, %v2478_v6  ;;  %v747_v58 = vsel %vm4246_vm0, 0, %v4258_v14  ;;  %v1276_v53 = vsel %vm1272_vm12, %v1256_v0, %v4226_v13  ;;  %v1294_v55 = vmul.u32 %v1292_v3, %v4207_v43 }
 0x1f6   : > { %2803 = vst [vmem:[%s3525_s20 + $0x68] sm:$0xff] %v2479_v12  ;;  %v733_v22 = vor.u32 %v732_v21, %v731_v16  ;;  %v736_v31 = vshll.u32 %v735_v27, 23  ;;  %v1295_v63 = vmul.u32 %v1291_v24, %v4214_v33  ;;  %v1277_v59 = vsel %vm1275_vm15, %v1265_v17, 2102212464 }
 0x1f7   : > { %v1315_v29 = vmul.u32 %v1313_v28, %v4207_v43  ;;  %v1319_v23 = vshll.u32 %v1316_v9, 16  ;;  %v1293_v10 = vmul.u32 %v1291_v24, %v4207_v43  ;;  %v1296_v35 = vmul.u32 %v1292_v3, %v4214_v33 }
 0x1f8   : > { %v737_v46 = vor.u32 4788187, %v736_v31  ;;  %v740_v25 = vcvt.s32.f32 %v733_v22  ;;  %v1297_v5 = vshll.u32 %v1294_v55, 16  ;;  %v1299_v37 = vshll.u32 %v1295_v63, 16 }
 0x1f9   : > { %v1318_v13 = vmul.u32 %v1314_v38, %v4214_v33  ;;  %v1321_v0 = vshll.u32 %v1317_v61, 16  ;;  %vm1323_vm4 = vc.u32 %v1315_v29, %v1319_v23  ;;  %v1325_v36 = vadd.s32 %v1319_v23, %v1315_v29 }
 0x1fa   : > { %v738_v14 = vand.u32 2147483647, %v737_v46  ;;  %vm1301_vm5 = vc.u32 %v1293_v10, %v1297_v5  ;;  %v1303_v41 = vadd.s32 %v1297_v5, %v1293_v10  ;;  %v1278_v17 = vsel %vm1274_vm1, %v4233_v57, %v1277_v59 }
 0x1fb   : > { %v1302_v11 = vsel %vm1301_vm5, 1, %v3095_v7  ;;  %v1324_v43 = vsel %vm1323_vm4, 1, %v3095_v7  ;;  %vm1327_vm7 = vc.u32 %v1325_v36, %v1321_v0  ;;  %v1298_v33 = vshrl.u32 %v1294_v55, 16 }
 0x1fc   : > { %v741_v44 = vmul.f32 %v740_v25, %v738_v14  ;;  %v1304_v45 = vadd.s32 %v1302_v11, %v1296_v35  ;;  %vm1305_vm6 = vc.u32 %v1303_v41, %v1299_v37  ;;  %v1326_v2 = vadd.s32 %v1324_v43, %v1318_v13 }
 0x1fd   : > { %v1306_v16 = vsel %vm1305_vm6, 1, %v3095_v7  ;;  %v1328_v62 = vsel %vm1327_vm7, 1, %v3095_v7  ;;  %v1320_v19 = vshrl.u32 %v1316_v9, 16  ;;  %vm1871_vm9 = vcmp.gt.s32.totalorder %v1870_v40, 0 }
 0x1fe   : > { %v742_v30 = vxor.u32 2147483648, %v741_v44  ;;  %v1308_v42 = vadd.s32 %v1306_v16, %v1304_v45  ;;  %v1330_v51 = vadd.s32 %v1328_v62, %v1326_v2  ;;  %v764_v28 = vadd.s32 3, %v747_v58 }
 0x1ff   : > { %v1300_v38 = vshrl.u32 %v1295_v63, 16  ;;  %v1872_v6 = vsel %vm1871_vm9, %v1870_v40, 0  ;;  %v1322_v39 = vshrl.u32 %v1317_v61, 16  ;;  %v1279_v3 = vsel %vm1273_vm3, %v1276_v53, %v1278_v17 }
 0x200   : > { %v743_v57 = vsel %vm622_vm8, %v742_v30, %v741_v44  ;;  %v1309_v27 = vadd.s32 %v1308_v42, %v1298_v33  ;;  %v1331_v12 = vadd.s32 %v1330_v51, %v1320_v19  ;;  %v1874_v22 = vand.u32 31, %v1872_v6 }
 0x201   : > { %v746_v21 = vsel %vm4246_vm0, %v3969_v34, %v743_v57  ;;  %v4319_v9 = vadd.s32 %v1325_v36, %v1321_v0  ;;  %v4321_v40 = vand.u32 3, %v764_v28  ;;  %v1333_v4 = vmul.u32 %v4195_v8, %v1279_v3 }
 0x202   : > { %v748_v24 = vmul.f32 %v746_v21, %v746_v21  ;;  %v4317_v31 = vadd.s32 %v1309_v27, %v1300_v38  ;;  %v1332_v55 = vadd.s32 %v1331_v12, %v1322_v39  ;;  %v4323_v46 = vsub.s32 32, %v1874_v22 }
 0x203   : > { %v4330_v60 = vshll.u32 %v1868_v15, 8  ;;  %v4332_v29 = vshrl.u32 %v1872_v6, 5  ;;  %v1877_v10 = vshll.u32 %v3089_v48, %v1874_v22  ;;  %v1880_v14 = vshll.u32 %v3090_v50, %v1874_v22 }
 0x204   : > { %v749_v58 = vmul.f32 -0.001358992, %v748_v24  ;;  %v756_v63 = vmul.f32 -0.00019511016, %v748_v24  ;;  %vm1335_vm8 = vc.u32 %v4317_v31, %v4319_v9  ;;  %v1336_v61 = vadd.s32 1, %v1332_v55 }
 0x205   : > { %v1878_v23 = vshrl.u32 %v3090_v50, %v4323_v46  ;;  %v1881_v8 = vshrl.u32 %v3091_v52, %v4323_v46  ;;  %v1884_v35 = vshrl.u32 %v3092_v54, %v4323_v46  ;;  %v1883_v13 = vshll.u32 %v3091_v52, %v1874_v22 }
 0x206   : > { %v750_v53 = vadd.f32 0.041655596, %v749_v58  ;;  %v757_v59 = vadd.f32 0.008332121, %v756_v63  ;;  %v1337_v25 = vsel %vm1335_vm8, %v1336_v61, %v1332_v55  ;;  %v1886_v0 = vshll.u32 %v3092_v54, %v1874_v22 }
 0x207   : > { %v1338_v15 = vadd.s32 %v1337_v25, %v1333_v4  ;;  %v4342_v37 = vor.u32 %v1878_v23, %v1877_v10  ;;  %v1887_v41 = vshrl.u32 %v3093_v56, %v4323_v46  ;;  %v4348_v11 = vor.u32 %v1881_v8, %v1880_v14 }
 0x208   : > { %v751_v5 = vmul.f32 %v750_v53, %v748_v24  ;;  %v758_v18 = vmul.f32 %v757_v59, %v748_v24  ;;  %v1885_v43 = vor.u32 %v1884_v35, %v1883_v13  ;;  %v1889_v2 = vshll.u32 %v3093_v56, %v1874_v22  ;;  %v304_v35 = vpop.f32.mrf.mxu3 }
 0x209   : > { %v1339_v17 = vadd.s32 536870912, %v1338_v15  ;;  %v1888_v45 = vor.u32 %v1887_v41, %v1886_v0  ;;  %v1890_v30 = vshrl.u32 %v3094_v1, %v4323_v46  ;;  %vm1895_vm11 = vcmp.lt.s32.totalorder %v4332_v29, 4 }
 0x20a   : > { %v752_v36 = vadd.f32 -0.4999988, %v751_v5  ;;  %v759_v44 = vadd.f32 -0.16666654, %v758_v18  ;;  %vm1892_vm10 = vcmp.lt.s32.totalorder %v4332_v29, 1  ;;  %vm1894_vm14 = vcmp.lt.s32.totalorder %v4332_v29, 3 }
 0x20b   : > { %v4353_v62 = vshrl.u32 %v1339_v17, 30  ;;  %v1891_v42 = vor.u32 %v1890_v30, %v1889_v2  ;;  %v1901_v19 = vsel %vm1895_vm11, %v1888_v45, 920167782  ;;  %v1900_v38 = vsel %vm1892_vm10, %v4342_v37, %v4348_v11 }
 0x20c   : > { %v753_v33 = vmul.f32 %v752_v36, %v748_v24  ;;  %v760_v16 = vmul.f32 %v759_v44, %v748_v24  ;;  %vm766_vm12 = vcmp.lt.s32.totalorder %v4321_v40, 2  ;;  %vm1893_vm13 = vcmp.lt.s32.totalorder %v4332_v29, 2 }
 0x20d   : > { %v1341_v28 = vshll.u32 %v4353_v62, 30  ;;  %v1902_v6 = vsel %vm1894_vm14, %v1885_v43, %v1901_v19  ;;  %v1905_v27 = vsel %vm1895_vm11, %v1891_v42, 1326507024  ;;  %v1904_v3 = vsel %vm1892_vm10, %v4348_v11, %v1885_v43 }
 0x20e   : > { %v754_v51 = vadd.f32 1.0, %v753_v33  ;;  %v761_v57 = vadd.f32 1.0, %v760_v16  ;;  %vm767_vm15 = vcmp.eq.s32.totalorder %v4321_v40, 0  ;;  %vm770_vm1 = vcmp.eq.s32.totalorder %v4321_v40, 2 }
 0x20f   : > { %v1342_v24 = vsub.s32 %v1338_v15, %v1341_v28  ;;  %v1903_v22 = vsel %vm1893_vm13, %v1900_v38, %v1902_v6  ;;  %v1906_v55 = vsel %vm1894_vm14, %v1888_v45, %v1905_v27  ;;  %v1910_v53 = vshrl.u32 %v4330_v60, 16 }
 0x210   : > { %v762_v39 = vmul.f32 %v761_v57, %v746_v21  ;;  %v771_v12 = vxor.u32 2147483648, %v754_v51  ;;  %v1909_v21 = vand.u32 65535, %v4330_v60  ;;  %v1907_v61 = vsel %vm1893_vm13, %v1904_v3, %v1906_v55 }
 0x211   : > { %vm1343_vm0 = vcmp.lt.s32.totalorder %v1342_v24, 0  ;;  %v1344_v63 = vsub.s32 0, %v1342_v24  ;;  %v1933_v59 = vand.u32 65535, %v1903_v22  ;;  %v1911_v10 = vand.u32 65535, %v1907_v61 }
 0x212   : > { %v768_v58 = vxor.u32 2147483648, %v762_v39  ;;  %v772_v4 = vsel %vm770_vm1, %v771_v12, %v762_v39  ;;  %v1912_v8 = vshrl.u32 %v1907_v61, 16  ;;  %vm763_vm2 = vweird.f32 %v3969_v34 }
 0x213   : > { %v1345_v25 = vsel %vm1343_vm0, %v1344_v63, %v1342_v24  ;;  %v1934_v15 = vshrl.u32 %v1903_v22, 16  ;;  %v1915_v0 = vmul.u32 %v1911_v10, %v1910_v53  ;;  %v1334_v41 = vadd.s32 %v4319_v9, %v4317_v31 }
 0x214   : > { %v769_v23 = vsel %vm767_vm15, %v754_v51, %v768_v58  ;;  %v1346_v18 = vclz %v1345_v25  ;;  %v1914_v13 = vmul.u32 %v1912_v8, %v1909_v21  ;;  %v1876_v44 = vshrl.u32 %v3089_v48, %v4323_v46 }
 0x215   : > { %v773_v5 = vsel %vm766_vm12, %v769_v23, %v772_v4  ;;  %v4393_v17 = vadd.f32 %v4157_v49, %v304_v35  ;;  %v1897_v34 = vsel %vm1895_vm11, %v1885_v43, 2102212464  ;;  %v1913_v40 = vmul.u32 %v1911_v10, %v1909_v21 }
 0x216   : > { %v774_v14 = vsel %vm763_vm2, nan, %v773_v5  ;;  %v2926_v36 = vadd.s32 4294967294, %v1346_v18  ;;  %v1917_v45 = vshll.u32 %v1914_v13, 16  ;;  %v1935_v2 = vmul.u32 %v1933_v59, %v1909_v21 }
 0x217   : > { %2792 = vst [vmem:[%s3525_s20 + $0x10] sm:$0xff] %v774_v14  ;;  %v1916_v30 = vmul.u32 %v1912_v8, %v1910_v53  ;;  %v1919_v33 = vshll.u32 %v1915_v0, 16  ;;  %v1936_v16 = vmul.u32 %v1934_v15, %v1909_v21  ;;  %vm1242_vm5 = vcmp.lt.s32.totalorder %v4160_v47, 0 }
 0x218   : > { %vm2927_vm3 = vcmp.lt.s32.totalorder %v2926_v36, 0  ;;  %vm1921_vm4 = vc.u32 %v1913_v40, %v1917_v45  ;;  %v1923_v9 = vadd.s32 %v1917_v45, %v1913_v40  ;;  %v1937_v42 = vmul.u32 %v1933_v59, %v1910_v53 }
 0x219   : > { %v1349_v31 = vsel %vm2927_vm3, 0, %v2926_v36  ;;  %v1918_v51 = vshrl.u32 %v1914_v13, 16  ;;  %v1922_v57 = vsel %vm1921_vm4, 1, %v3095_v7  ;;  %v1938_v43 = vmul.u32 %v1934_v15, %v1910_v53 }
 0x21a   : > { %v1350_v46 = vsub.s32 32, %v1349_v31  ;;  %v1354_v19 = vsub.s32 4294967266, %v1349_v31  ;;  %v1924_v28 = vadd.s32 %v1922_v57, %v1916_v30  ;;  %vm1925_vm6 = vc.u32 %v1923_v9, %v1919_v33 }
 0x21b   : > { %v1939_v38 = vshll.u32 %v1936_v16, 16  ;;  %v1351_v6 = vshll.u32 %v1342_v24, %v1349_v31  ;;  %v1926_v12 = vsel %vm1925_vm6, 1, %v3095_v7  ;;  %v1941_v22 = vshll.u32 %v1937_v42, 16 }
 0x21c   : > { %v1352_v27 = vshrl.u32 %v1334_v41, %v1350_v46  ;;  %v1355_v39 = vadd.s32 127, %v1354_v19  ;;  %v1928_v3 = vadd.s32 %v1926_v12, %v1924_v28  ;;  %v1364_v21 = vsub.s32 4, %v4353_v62 }
 0x21d   : > { %vm1943_vm7 = vc.u32 %v1935_v2, %v1939_v38  ;;  %v1945_v55 = vadd.s32 %v1939_v38, %v1935_v2  ;;  %v1896_v61 = vsel %vm1892_vm10, %v1876_v44, %v4342_v37  ;;  %v1920_v23 = vshrl.u32 %v1915_v0, 16 }
 0x21e   : > { %v1353_v58 = vor.u32 %v1352_v27, %v1351_v6  ;;  %v1356_v63 = vshll.u32 %v1355_v39, 23  ;;  %v1944_v4 = vsel %vm1943_vm7, 1, %v3095_v7  ;;  %v1929_v53 = vadd.s32 %v1928_v3, %v1918_v51 }
 0x21f   : > { %v1946_v24 = vadd.s32 %v1944_v4, %v1938_v43  ;;  %vm1947_vm9 = vc.u32 %v1945_v55, %v1941_v22  ;;  %v2480_v10 = vand.u32 2147483647, %v4393_v17  ;;  %v1898_v8 = vsel %vm1894_vm14, %v4348_v11, %v1897_v34  ;;  %v271_v11 = vpop.f32.mrf.mxu0 }
 0x220   : > { %v1357_v59 = vor.u32 4788187, %v1356_v63  ;;  %v1948_v25 = vsel %vm1947_vm9, 1, %v3095_v7  ;;  %v1940_v35 = vshrl.u32 %v1936_v16, 16  ;;  %v2483_v18 = vand.u32 2139095040, %v4393_v17 }
 0x221   : > { %v1950_v5 = vadd.s32 %v1948_v25, %v1946_v24  ;;  %v1360_v14 = vcvt.s32.f32 %v1353_v58  ;;  %v1365_v37 = vsel %vm1242_vm5, %v1364_v21, %v4353_v62  ;;  %v1930_v13 = vadd.s32 %v1929_v53, %v1920_v23 }
 0x222   : > { %v1358_v15 = vand.u32 2147483647, %v1357_v59  ;;  %v1942_v0 = vshrl.u32 %v1937_v42, 16  ;;  %v2484_v36 = vshrl.u32 %v2483_v18, 23  ;;  %v2487_v44 = vand.u32 8388607, %v2480_v10 }
 0x223   : > { %v1951_v41 = vadd.s32 %v1950_v5, %v1940_v35  ;;  %v1949_v45 = vadd.s32 %v1945_v55, %v1941_v22  ;;  %vm4418_vm8 = vcmp.le.f32.partialorder %v1240_v26, 0.7853982  ;;  %v1899_v2 = vsel %vm1893_vm13, %v1896_v61, %v1898_v8 }
 0x224   : > { %v1361_v40 = vmul.f32 %v1360_v14, %v1358_v15  ;;  %v2949_v30 = vadd.s32 4294967169, %v2484_v36  ;;  %v1367_v16 = vsel %vm4418_vm8, 0, %v1365_v37  ;;  %v2488_v9 = vor.u32 8388608, %v2487_v44 }
 0x225   : > { %v1952_v62 = vadd.s32 %v1951_v41, %v1942_v0  ;;  %vm1955_vm11 = vc.u32 %v1930_v13, %v1949_v45  ;;  %v4427_v46 = vadd.f32 %v4157_v49, %v271_v11  ;;  %v1953_v19 = vmul.u32 %v4330_v60, %v1899_v2 }
 0x226   : > { %v1362_v33 = vxor.u32 2147483648, %v1361_v40  ;;  %v2490_v42 = vadd.s32 1, %v2949_v30  ;;  %v1384_v28 = vadd.s32 3, %v1367_v16  ;;  %v4435_v27 = vshll.u32 %v2488_v9, 8 }
 0x227   : > { %v1956_v31 = vadd.s32 1, %v1952_v62  ;;  %v778_v49 = vand.u32 2139095040, %v4427_v46  ;;  %v4442_v21 = vadd.s32 %v1949_v45, %v1930_v13  ;;  %vm1383_vm1 = vweird.f32 %v4160_v47 }
 0x228   : > { %v1363_v26 = vsel %vm1242_vm5, %v1362_v33, %v1361_v40  ;;  %vm2491_vm10 = vcmp.gt.s32.totalorder %v2490_v42, 0  ;;  %v4438_v58 = vand.u32 3, %v1384_v28  ;;  %v4445_v4 = vand.u32 65535, %v4435_v27 }
 0x229   : > { %v1366_v29 = vsel %vm4418_vm8, %v4160_v47, %v1363_v26  ;;  %v1957_v51 = vsel %vm1955_vm11, %v1956_v31, %v1952_v62  ;;  %v2492_v38 = vsel %vm2491_vm10, %v2490_v42, 0  ;;  %v4448_v61 = vshrl.u32 %v4435_v27, 16 }
 0x22a   : > { %v1368_v57 = vmul.f32 %v1366_v29, %v1366_v29  ;;  %v1958_v43 = vadd.s32 %v1957_v51, %v1953_v19  ;;  %v2494_v6 = vand.u32 31, %v2492_v38  ;;  %v4450_v53 = vshrl.u32 %v778_v49, 23 }
 0x22b   : > { %v4453_v25 = vshrl.u32 %v2492_v38, 5  ;;  %vm1390_vm14 = vcmp.eq.s32.totalorder %v4438_v58, 2  ;;  %vm1387_vm12 = vcmp.eq.s32.totalorder %v4438_v58, 0  ;;  %vm1386_vm13 = vcmp.lt.s32.totalorder %v4438_v58, 2 }
 0x22c   : > { %v1369_v39 = vmul.f32 -0.001358992, %v1368_v57  ;;  %v1376_v12 = vmul.f32 -0.00019511016, %v1368_v57  ;;  %v1959_v3 = vadd.s32 536870912, %v1958_v43  ;;  %v2495_v22 = vsub.s32 32, %v2494_v6 }
 0x22d   : > { %v2497_v8 = vshll.u32 %v3089_v48, %v2494_v6  ;;  %v2500_v0 = vshll.u32 %v3090_v50, %v2494_v6  ;;  %v2503_v41 = vshll.u32 %v3091_v52, %v2494_v6  ;;  %v2506_v36 = vshll.u32 %v3092_v54, %v2494_v6 }
 0x22e   : > { %v1370_v60 = vadd.f32 0.041655596, %v1369_v39  ;;  %v1377_v55 = vadd.f32 0.008332121, %v1376_v12  ;;  %v4440_v63 = vshrl.u32 %v1959_v3, 30  ;;  %v2498_v35 = vshrl.u32 %v3090_v50, %v2495_v22 }
 0x22f   : > { %v2501_v5 = vshrl.u32 %v3091_v52, %v2495_v22  ;;  %v2504_v18 = vshrl.u32 %v3092_v54, %v2495_v22  ;;  %v2507_v13 = vshrl.u32 %v3093_v56, %v2495_v22  ;;  %v2510_v44 = vshrl.u32 %v3094_v1, %v2495_v22 }
 0x230   : > { %v1371_v24 = vmul.f32 %v1370_v60, %v1368_v57  ;;  %v1378_v59 = vmul.f32 %v1377_v55, %v1368_v57  ;;  %v1961_v23 = vshll.u32 %v4440_v63, 30  ;;  %v2499_v34 = vor.u32 %v2498_v35, %v2497_v8 }
 0x231   : > { %v2502_v2 = vor.u32 %v2501_v5, %v2500_v0  ;;  %v2505_v62 = vor.u32 %v2504_v18, %v2503_v41  ;;  %v2509_v30 = vshll.u32 %v3093_v56, %v2494_v6  ;;  %v2508_v9 = vor.u32 %v2507_v13, %v2506_v36 }
 0x232   : > { %v1372_v15 = vadd.f32 -0.4999988, %v1371_v24  ;;  %v1379_v14 = vadd.f32 -0.16666654, %v1378_v59  ;;  %v4460_v37 = vsub.s32 %v1958_v43, %v1961_v23  ;;  %v1984_v26 = vsub.s32 4, %v4440_v63 }
 0x233   : > { %v2496_v19 = vshrl.u32 %v3089_v48, %v2495_v22  ;;  %v2511_v51 = vor.u32 %v2510_v44, %v2509_v30  ;;  %vm2512_vm0 = vcmp.lt.s32.totalorder %v4453_v25, 1  ;;  %vm2513_vm2 = vcmp.lt.s32.totalorder %v4453_v25, 2 }
 0x234   : > { %v1373_v40 = vmul.f32 %v1372_v15, %v1368_v57  ;;  %v1380_v45 = vmul.f32 %v1379_v14, %v1368_v57  ;;  %vm1963_vm15 = vcmp.lt.s32.totalorder %v4460_v37, 0  ;;  %v1964_v11 = vsub.s32 0, %v4460_v37 }
 0x235   : > { %vm1862_vm3 = vcmp.lt.s32.totalorder %v4184_v32, 0  ;;  %vm2514_vm5 = vcmp.lt.s32.totalorder %v4453_v25, 3  ;;  %vm2515_vm4 = vcmp.lt.s32.totalorder %v4453_v25, 4  ;;  %v2520_v38 = vsel %vm2512_vm0, %v2499_v34, %v2502_v2 }
 0x236   : > { %v1374_v33 = vadd.f32 1.0, %v1373_v40  ;;  %v1381_v16 = vadd.f32 1.0, %v1380_v45  ;;  %v1965_v31 = vsel %vm1963_vm15, %v1964_v11, %v4460_v37  ;;  %v2516_v49 = vsel %vm2512_vm0, %v2496_v19, %v2499_v34 }
 0x237   : > { %v1966_v42 = vclz %v1965_v31  ;;  %v2517_v39 = vsel %vm2515_vm4, %v2505_v62, 2102212464  ;;  %v2521_v12 = vsel %vm2515_vm4, %v2508_v9, 920167782  ;;  %v2524_v22 = vsel %vm2512_vm0, %v2502_v2, %v2505_v62 }
 0x238   : > { %v1382_v57 = vmul.f32 %v1381_v16, %v1366_v29  ;;  %v1391_v28 = vxor.u32 2147483648, %v1374_v33  ;;  %v2522_v3 = vsel %vm2514_vm5, %v2505_v62, %v2521_v12  ;;  %v2525_v59 = vsel %vm2515_vm4, %v2511_v51, 1326507024 }
 0x239   : > { %v2938_v43 = vadd.s32 4294967294, %v1966_v42  ;;  %v2523_v24 = vsel %vm2513_vm2, %v2520_v38, %v2522_v3  ;;  %v2518_v5 = vsel %vm2514_vm5, %v2502_v2, %v2517_v39  ;;  %v2526_v15 = vsel %vm2514_vm5, %v2508_v9, %v2525_v59 }
 0x23a   : > { %v1388_v6 = vxor.u32 2147483648, %v1382_v57  ;;  %v1392_v29 = vsel %vm1390_vm14, %v1391_v28, %v1382_v57  ;;  %v2553_v14 = vand.u32 65535, %v2523_v24  ;;  %v2554_v13 = vshrl.u32 %v2523_v24, 16 }
 0x23b   : > { %vm2939_vm6 = vcmp.lt.s32.totalorder %v2938_v43, 0  ;;  %v2527_v36 = vsel %vm2513_vm2, %v2524_v22, %v2526_v15  ;;  %v775_v47 = vand.u32 2147483647, %v4427_v46  ;;  %v2916_v62 = vadd.s32 4294967169, %v4450_v53 }
 0x23c   : > { %v1389_v60 = vsel %vm1387_vm12, %v1374_v33, %v1388_v6  ;;  %v1969_v55 = vsel %vm2939_vm6, 0, %v2938_v43  ;;  %v2531_v44 = vand.u32 65535, %v2527_v36  ;;  %v2532_v40 = vshrl.u32 %v2527_v36, 16 }
 0x23d   : > { %v1393_v23 = vsel %vm1386_vm13, %v1389_v60, %v1392_v29  ;;  %v1970_v8 = vsub.s32 32, %v1969_v55  ;;  %v1974_v35 = vsub.s32 4294967266, %v1969_v55  ;;  %v1971_v0 = vshll.u32 %v4460_v37, %v1969_v55 }
 0x23e   : > { %v1394_v18 = vsel %vm1383_vm1, nan, %v1393_v23  ;;  %v2556_v45 = vmul.u32 %v2554_v13, %v4445_v4  ;;  %v2557_v2 = vmul.u32 %v2553_v14, %v4448_v61  ;;  %v4513_v37 = vsel %vm2513_vm2, %v2516_v49, %v2518_v5 }
 0x23f   : > { %2796 = vst [vmem:[%s3525_s20 + $0x30] sm:$0xff] %v1394_v18  ;;  %v1972_v41 = vshrl.u32 %v4442_v21, %v1970_v8  ;;  %v1975_v58 = vadd.s32 127, %v1974_v35  ;;  %v4509_v21 = vsel %vm1862_vm3, %v1984_v26, %v4440_v63  ;;  %v2534_v30 = vmul.u32 %v2532_v40, %v4445_v4 }
 0x240   : > { %v2535_v33 = vmul.u32 %v2531_v44, %v4448_v61  ;;  %vm4519_vm7 = vcmp.le.f32.partialorder %v1860_v20, 0.7853982  ;;  %v2555_v31 = vmul.u32 %v2553_v14, %v4445_v4  ;;  %v2558_v63 = vmul.u32 %v2554_v13, %v4448_v61 }
 0x241   : > { %v1973_v11 = vor.u32 %v1972_v41, %v1971_v0  ;;  %v1976_v34 = vshll.u32 %v1975_v58, 23  ;;  %v2559_v9 = vshll.u32 %v2556_v45, 16  ;;  %v2533_v25 = vmul.u32 %v2531_v44, %v4445_v4 }
 0x242   : > { %v2536_v26 = vmul.u32 %v2532_v40, %v4448_v61  ;;  %v2537_v19 = vshll.u32 %v2534_v30, 16  ;;  %v2539_v57 = vshll.u32 %v2535_v33, 16  ;;  %v2561_v28 = vshll.u32 %v2557_v2, 16 }
 0x243   : > { %v1977_v53 = vor.u32 4788187, %v1976_v34  ;;  %v1980_v42 = vcvt.s32.f32 %v1973_v11  ;;  %vm2563_vm9 = vc.u32 %v2555_v31, %v2559_v9  ;;  %v2565_v38 = vadd.s32 %v2559_v9, %v2555_v31 }
 0x244   : > { %vm2541_vm8 = vc.u32 %v2533_v25, %v2537_v19  ;;  %v2543_v20 = vadd.s32 %v2537_v19, %v2533_v25  ;;  %v2564_v43 = vsel %vm2563_vm9, 1, %v3095_v7  ;;  %v785_v12 = vadd.s32 1, %v2916_v62 }
 0x245   : > { %v1978_v51 = vand.u32 2147483647, %v1977_v53  ;;  %v2542_v49 = vsel %vm2541_vm8, 1, %v3095_v7  ;;  %v2566_v39 = vadd.s32 %v2564_v43, %v2558_v63  ;;  %v2560_v4 = vshrl.u32 %v2556_v45, 16 }
 0x246   : > { %v2544_v29 = vadd.s32 %v2542_v49, %v2536_v26  ;;  %vm2545_vm11 = vc.u32 %v2543_v20, %v2539_v57  ;;  %vm2567_vm10 = vc.u32 %v2565_v38, %v2561_v28  ;;  %vm786_vm14 = vcmp.gt.s32.totalorder %v785_v12, 0 }
 0x247   : > { %v1981_v6 = vmul.f32 %v1980_v42, %v1978_v51  ;;  %v2546_v3 = vsel %vm2545_vm11, 1, %v3095_v7  ;;  %v2568_v22 = vsel %vm2567_vm10, 1, %v3095_v7  ;;  %v2538_v60 = vshrl.u32 %v2534_v30, 16 }
 0x248   : > { %v2548_v55 = vadd.s32 %v2546_v3, %v2544_v29  ;;  %v2570_v24 = vadd.s32 %v2568_v22, %v2566_v39  ;;  %v787_v59 = vsel %vm786_vm14, %v785_v12, 0  ;;  %v2540_v8 = vshrl.u32 %v2535_v33, 16 }
 0x249   : > { %v1982_v61 = vxor.u32 2147483648, %v1981_v6  ;;  %v782_v35 = vand.u32 8388607, %v775_v47  ;;  %v789_v5 = vand.u32 31, %v787_v59  ;;  %v2562_v14 = vshrl.u32 %v2557_v2, 16 }
 0x24a   : > { %v2549_v15 = vadd.s32 %v2548_v55, %v2538_v60  ;;  %v2571_v13 = vadd.s32 %v2570_v24, %v2560_v4  ;;  %v1987_v0 = vsel %vm4519_vm7, 0, %v4509_v21  ;;  %v2573_v58 = vmul.u32 %v4435_v27, %v4513_v37 }
 0x24b   : > { %v1983_v23 = vsel %vm1862_vm3, %v1982_v61, %v1981_v6  ;;  %v4543_v36 = vsub.s32 32, %v789_v5  ;;  %v4547_v40 = vadd.s32 %v2565_v38, %v2561_v28  ;;  %v4549_v11 = vshrl.u32 %v787_v59, 5 }
 0x24c   : > { %v1986_v18 = vsel %vm4519_vm7, %v4184_v32, %v1983_v23  ;;  %v4545_v44 = vadd.s32 %v2549_v15, %v2540_v8  ;;  %v2572_v45 = vadd.s32 %v2571_v13, %v2562_v14  ;;  %v792_v62 = vshll.u32 %v3089_v48, %v789_v5 }
 0x24d   : > { %v1988_v41 = vmul.f32 %v1986_v18, %v1986_v18  ;;  %v795_v30 = vshll.u32 %v3090_v50, %v789_v5  ;;  %v796_v27 = vshrl.u32 %v3091_v52, %v4543_v36  ;;  %v801_v37 = vshll.u32 %v3092_v54, %v789_v5 }
 0x24e   : > { %vm2575_vm12 = vc.u32 %v4545_v44, %v4547_v40  ;;  %v2576_v21 = vadd.s32 1, %v2572_v45  ;;  %v798_v53 = vshll.u32 %v3091_v52, %v789_v5  ;;  %v799_v31 = vshrl.u32 %v3092_v54, %v4543_v36 }
 0x24f   : > { %v1989_v34 = vmul.f32 -0.001358992, %v1988_v41  ;;  %v1996_v2 = vmul.f32 -0.00019511016, %v1988_v41  ;;  %v793_v9 = vshrl.u32 %v3090_v50, %v4543_v36  ;;  %v802_v42 = vshrl.u32 %v3093_v56, %v4543_v36 }
 0x250   : > { %v2577_v63 = vsel %vm2575_vm12, %v2576_v21, %v2572_v45  ;;  %v804_v25 = vshll.u32 %v3093_v56, %v789_v5  ;;  %v783_v57 = vor.u32 8388608, %v782_v35  ;;  %v2004_v28 = vadd.s32 3, %v1987_v0 }
 0x251   : > { %v1990_v33 = vadd.f32 0.041655596, %v1989_v34  ;;  %v1997_v16 = vadd.f32 0.008332121, %v1996_v2  ;;  %v2578_v51 = vadd.s32 %v2577_v63, %v2573_v58  ;;  %v4566_v20 = vor.u32 %v796_v27, %v795_v30 }
 0x252   : > { %v803_v43 = vor.u32 %v802_v42, %v801_v37  ;;  %v805_v38 = vshrl.u32 %v3094_v1, %v4543_v36  ;;  %v800_v12 = vor.u32 %v799_v31, %v798_v53  ;;  %v4570_v29 = vor.u32 %v793_v9, %v792_v62  ;;  %v283_v9 = vpop.f32.mrf.mxu1 }
 0x253   : > { %v1991_v26 = vmul.f32 %v1990_v33, %v1988_v41  ;;  %v1998_v19 = vmul.f32 %v1997_v16, %v1988_v41  ;;  %v2579_v39 = vadd.s32 536870912, %v2578_v51  ;;  %vm807_vm13 = vcmp.lt.s32.totalorder %v4549_v11, 1 }
 0x254   : > { %v806_v4 = vor.u32 %v805_v38, %v804_v25  ;;  %vm810_vm15 = vcmp.lt.s32.totalorder %v4549_v11, 4  ;;  %vm809_vm1 = vcmp.lt.s32.totalorder %v4549_v11, 3  ;;  %v2005_v60 = vand.u32 3, %v2004_v28 }
 0x255   : > { %v1992_v6 = vadd.f32 -0.4999988, %v1991_v26  ;;  %v1999_v49 = vadd.f32 -0.16666654, %v1998_v19  ;;  %v4574_v22 = vshrl.u32 %v2579_v39, 30  ;;  %v819_v35 = vsel %vm807_vm13, %v4566_v20, %v800_v12 }
 0x256   : > { %v816_v55 = vsel %vm810_vm15, %v803_v43, 920167782  ;;  %v820_v24 = vsel %vm810_vm15, %v806_v4, 1326507024  ;;  %v815_v5 = vsel %vm807_vm13, %v4570_v29, %v4566_v20  ;;  %v4593_v13 = vshll.u32 %v783_v57, 8 }
 0x257   : > { %v1993_v61 = vmul.f32 %v1992_v6, %v1988_v41  ;;  %v2000_v3 = vmul.f32 %v1999_v49, %v1988_v41  ;;  %v2581_v8 = vshll.u32 %v4574_v22, 30  ;;  %v817_v15 = vsel %vm809_vm1, %v800_v12, %v816_v55  ;;  %v4614_v49 = vld [vmem:[%s5003_s2] ss:$0 sm:$0xff] }
 0x258   : > { %v821_v14 = vsel %vm809_vm1, %v803_v43, %v820_v24  ;;  %vm808_vm0 = vcmp.lt.s32.totalorder %v4549_v11, 2  ;;  %vm2006_vm2 = vcmp.lt.s32.totalorder %v2005_v60, 2  ;;  %vm2007_vm3 = vcmp.eq.s32.totalorder %v2005_v60, 0 }
 0x259   : > { %v1994_v59 = vadd.f32 1.0, %v1993_v61  ;;  %v2001_v23 = vadd.f32 1.0, %v2000_v3  ;;  %v2582_v58 = vsub.s32 %v2578_v51, %v2581_v8  ;;  %v822_v45 = vsel %vm808_vm0, %v819_v35, %v821_v14 }
 0x25a   : > { %v818_v62 = vsel %vm808_vm0, %v815_v5, %v817_v15  ;;  %vm2010_vm4 = vcmp.eq.s32.totalorder %v2005_v60, 2  ;;  %v824_v30 = vand.u32 65535, %v4593_v13  ;;  %v827_v21 = vshrl.u32 %v822_v45, 16 }
 0x25b   : > { %v2002_v0 = vmul.f32 %v2001_v23, %v1986_v18  ;;  %v2011_v41 = vxor.u32 2147483648, %v1994_v59  ;;  %vm2583_vm5 = vcmp.lt.s32.totalorder %v2582_v58, 0  ;;  %v2584_v2 = vsub.s32 0, %v2582_v58 }
 0x25c   : > { %v826_v18 = vand.u32 65535, %v822_v45  ;;  %v825_v16 = vshrl.u32 %v4593_v13, 16  ;;  %vm2003_vm6 = vweird.f32 %v4184_v32  ;;  %v849_v63 = vshrl.u32 %v818_v62, 16 }
 0x25d   : > { %v2008_v34 = vxor.u32 2147483648, %v2002_v0  ;;  %v2012_v37 = vsel %vm2010_vm4, %v2011_v41, %v2002_v0  ;;  %v2585_v33 = vsel %vm2583_vm5, %v2584_v2, %v2582_v58  ;;  %v829_v25 = vmul.u32 %v827_v21, %v824_v30 }
 0x25e   : > { %v2586_v31 = vclz %v2585_v33  ;;  %v830_v26 = vmul.u32 %v826_v18, %v825_v16  ;;  %v848_v19 = vand.u32 65535, %v818_v62  ;;  %v2574_v51 = vadd.s32 %v4547_v40, %v4545_v44 }
 0x25f   : > { %v2009_v27 = vsel %vm2007_vm3, %v1994_v59, %v2008_v34  ;;  %v791_v28 = vshrl.u32 %v3089_v48, %v4543_v36  ;;  %v812_v32 = vsel %vm810_vm15, %v800_v12, 2102212464  ;;  %v828_v43 = vmul.u32 %v826_v18, %v824_v30 }
 0x260   : > { %v2013_v53 = vsel %vm2006_vm2, %v2009_v27, %v2012_v37  ;;  %v2950_v57 = vadd.s32 4294967294, %v2586_v31  ;;  %v831_v38 = vmul.u32 %v827_v21, %v825_v16  ;;  %v832_v6 = vshll.u32 %v829_v25, 16 }
 0x261   : > { %v2014_v42 = vsel %vm2003_vm6, nan, %v2013_v53  ;;  %v4617_v39 = vadd.f32 %v4614_v49, %v283_v9  ;;  %v833_v44 = vshrl.u32 %v829_v25, 16  ;;  %v834_v40 = vshll.u32 %v830_v26, 16 }
 0x262   : > { %2800 = vst [vmem:[%s3525_s20 + $0x50] sm:$0xff] %v2014_v42  ;;  %vm2951_vm7 = vcmp.lt.s32.totalorder %v2950_v57, 0  ;;  %v851_v4 = vmul.u32 %v849_v63, %v824_v30  ;;  %vm2482_vm9 = vcmp.lt.s32.totalorder %v4393_v17, 0  ;;  %vm836_vm8 = vc.u32 %v828_v43, %v832_v6 }
 0x263   : > { %v2589_v36 = vsel %vm2951_vm7, 0, %v2950_v57  ;;  %v838_v12 = vadd.s32 %v832_v6, %v828_v43  ;;  %v852_v61 = vmul.u32 %v848_v19, %v825_v16  ;;  %v837_v55 = vsel %vm836_vm8, 1, %v3095_v7 }
 0x264   : > { %v2590_v3 = vsub.s32 32, %v2589_v36  ;;  %v2594_v60 = vsub.s32 4294967266, %v2589_v36  ;;  %v850_v24 = vmul.u32 %v848_v19, %v824_v30  ;;  %v839_v59 = vadd.s32 %v837_v55, %v831_v38 }
 0x265   : > { %vm840_vm11 = vc.u32 %v838_v12, %v834_v40  ;;  %v853_v23 = vmul.u32 %v849_v63, %v825_v16  ;;  %v854_v8 = vshll.u32 %v851_v4, 16  ;;  %v2591_v35 = vshll.u32 %v2582_v58, %v2589_v36 }
 0x266   : > { %v2592_v5 = vshrl.u32 %v2574_v51, %v2590_v3  ;;  %v2595_v15 = vadd.s32 127, %v2594_v60  ;;  %v841_v14 = vsel %vm840_vm11, 1, %v3095_v7  ;;  %v856_v41 = vshll.u32 %v852_v61, 16 }
 0x267   : > { %v843_v0 = vadd.s32 %v841_v14, %v839_v59  ;;  %vm858_vm10 = vc.u32 %v850_v24, %v854_v8  ;;  %v860_v45 = vadd.s32 %v854_v8, %v850_v24  ;;  %v2604_v62 = vsub.s32 4, %v4574_v22 }
 0x268   : > { %v2593_v34 = vor.u32 %v2592_v5, %v2591_v35  ;;  %v2596_v2 = vshll.u32 %v2595_v15, 23  ;;  %v859_v18 = vsel %vm858_vm10, 1, %v3095_v7  ;;  %v1395_v27 = vand.u32 2147483647, %v4617_v39 }
 0x269   : > { %v844_v30 = vadd.s32 %v843_v0, %v833_v44  ;;  %v861_v21 = vadd.s32 %v859_v18, %v853_v23  ;;  %vm862_vm14 = vc.u32 %v860_v45, %v856_v41  ;;  %v811_v37 = vsel %vm807_vm13, %v791_v28, %v4570_v29 }
 0x26a   : > { %v2597_v58 = vor.u32 4788187, %v2596_v2  ;;  %v835_v33 = vshrl.u32 %v830_v26, 16  ;;  %v863_v16 = vsel %vm862_vm14, 1, %v3095_v7  ;;  %v813_v53 = vsel %vm809_vm1, %v4566_v20, %v812_v32  ;;  %v295_v20 = vpop.f32.mrf.mxu2 }
 0x26b   : > { %v855_v31 = vshrl.u32 %v851_v4, 16  ;;  %v865_v63 = vadd.s32 %v863_v16, %v861_v21  ;;  %v1398_v9 = vand.u32 2139095040, %v4617_v39  ;;  %v2600_v25 = vcvt.s32.f32 %v2593_v34 }
 0x26c   : > { %v2598_v42 = vand.u32 2147483647, %v2597_v58  ;;  %v2605_v19 = vsel %vm2482_vm9, %v2604_v62, %v4574_v22  ;;  %v845_v51 = vadd.s32 %v844_v30, %v835_v33  ;;  %v857_v57 = vshrl.u32 %v852_v61, 16 }
 0x26d   : > { %v866_v29 = vadd.s32 %v865_v63, %v855_v31  ;;  %v1399_v26 = vshrl.u32 %v1398_v9, 23  ;;  %v1402_v28 = vand.u32 8388607, %v1395_v27  ;;  %v864_v38 = vadd.s32 %v860_v45, %v856_v41 }
 0x26e   : > { %v2601_v43 = vmul.f32 %v2600_v25, %v2598_v42  ;;  %vm2481_vm12 = vcmp.le.f32.partialorder %v2480_v10, 0.7853982  ;;  %v814_v32 = vsel %vm808_vm0, %v811_v37, %v813_v53  ;;  %v4643_v61 = vadd.f32 %v4614_v49, %v295_v20 }
 0x26f   : > { %v867_v6 = vadd.s32 %v866_v29, %v857_v57  ;;  %v2928_v44 = vadd.s32 4294967169, %v1399_v26  ;;  %v2607_v22 = vsel %vm2481_vm12, 0, %v2605_v19  ;;  %vm870_vm13 = vc.u32 %v845_v51, %v864_v38 }
 0x270   : > { %v2602_v40 = vxor.u32 2147483648, %v2601_v43  ;;  %v1403_v36 = vor.u32 8388608, %v1402_v28  ;;  %v868_v60 = vmul.u32 %v4593_v13, %v814_v32  ;;  %v2624_v11 = vadd.s32 3, %v2607_v22 }
 0x271   : > { %v871_v4 = vadd.s32 1, %v867_v6  ;;  %v1405_v12 = vadd.s32 1, %v2928_v44  ;;  %v2018_v5 = vand.u32 2139095040, %v4643_v61  ;;  %v4654_v2 = vadd.s32 %v864_v38, %v845_v51 }
 0x272   : > { %v2603_v3 = vsel %vm2482_vm9, %v2602_v40, %v2601_v43  ;;  %v4649_v35 = vshll.u32 %v1403_v36, 8  ;;  %v4652_v41 = vand.u32 3, %v2624_v11  ;;  %v2015_v21 = vand.u32 2147483647, %v4643_v61 }
 0x273   : > { %v2606_v10 = vsel %vm2481_vm12, %v4393_v17, %v2603_v3  ;;  %v872_v55 = vsel %vm870_vm13, %v871_v4, %v867_v6  ;;  %vm1406_vm15 = vcmp.gt.s32.totalorder %v1405_v12, 0  ;;  %v2019_v58 = vshrl.u32 %v2018_v5, 23 }
 0x274   : > { %v2608_v24 = vmul.f32 %v2606_v10, %v2606_v10  ;;  %v873_v59 = vadd.s32 %v872_v55, %v868_v60  ;;  %v1407_v23 = vsel %vm1406_vm15, %v1405_v12, 0  ;;  %v4658_v30 = vand.u32 65535, %v4649_v35 }
 0x275   : > { %v1409_v8 = vand.u32 31, %v1407_v23  ;;  %vm777_vm1 = vcmp.lt.s32.totalorder %v4427_v46, 0  ;;  %vm2630_vm0 = vcmp.eq.s32.totalorder %v4652_v41, 2  ;;  %v4670_v57 = vshrl.u32 %v1407_v23, 5 }
 0x276   : > { %v2609_v15 = vmul.f32 -0.001358992, %v2608_v24  ;;  %v2616_v14 = vmul.f32 -0.00019511016, %v2608_v24  ;;  %v874_v0 = vadd.s32 536870912, %v873_v59  ;;  %vm2627_vm2 = vcmp.eq.s32.totalorder %v4652_v41, 0 }
 0x277   : > { %v1410_v45 = vsub.s32 32, %v1409_v8  ;;  %v1412_v18 = vshll.u32 %v3089_v48, %v1409_v8  ;;  %v1415_v53 = vshll.u32 %v3090_v50, %v1409_v8  ;;  %v1421_v9 = vshll.u32 %v3092_v54, %v1409_v8 }
 0x278   : > { %v2610_v13 = vadd.f32 0.041655596, %v2609_v15  ;;  %v2617_v34 = vadd.f32 0.008332121, %v2616_v14  ;;  %v875_v62 = vshrl.u32 %v874_v0, 30  ;;  %v1418_v29 = vshll.u32 %v3091_v52, %v1409_v8 }
 0x279   : > { %v1413_v31 = vshrl.u32 %v3090_v50, %v1410_v45  ;;  %v1416_v63 = vshrl.u32 %v3091_v52, %v1410_v45  ;;  %v1422_v42 = vshrl.u32 %v3093_v56, %v1410_v45  ;;  %v1419_v26 = vshrl.u32 %v3092_v54, %v1410_v45 }
 0x27a   : > { %v2611_v37 = vmul.f32 %v2610_v13, %v2608_v24  ;;  %v2618_v33 = vmul.f32 %v2617_v34, %v2608_v24  ;;  %v876_v16 = vshll.u32 %v875_v62, 30  ;;  %v1424_v28 = vshll.u32 %v3093_v56, %v1409_v8 }
 0x27b   : > { %v1425_v43 = vshrl.u32 %v3094_v1, %v1410_v45  ;;  %vm2626_vm3 = vcmp.lt.s32.totalorder %v4652_v41, 2  ;;  %vm2623_vm4 = vweird.f32 %v4393_v17  ;;  %v899_v6 = vsub.s32 4, %v875_v62 }
 0x27c   : > { %v2612_v25 = vadd.f32 -0.4999988, %v2611_v37  ;;  %v2619_v19 = vadd.f32 -0.16666654, %v2618_v33  ;;  %v4668_v51 = vsub.s32 %v873_v59, %v876_v16  ;;  %v1414_v44 = vor.u32 %v1413_v31, %v1412_v18 }
 0x27d   : > { %v1417_v40 = vor.u32 %v1416_v63, %v1415_v53  ;;  %v1423_v22 = vor.u32 %v1422_v42, %v1421_v9  ;;  %vm1427_vm6 = vcmp.lt.s32.totalorder %v4670_v57, 1  ;;  %v1420_v60 = vor.u32 %v1419_v26, %v1418_v29 }
 0x27e   : > { %v2613_v38 = vmul.f32 %v2612_v25, %v2608_v24  ;;  %v2620_v20 = vmul.f32 %v2619_v19, %v2608_v24  ;;  %vm878_vm5 = vcmp.lt.s32.totalorder %v4668_v51, 0  ;;  %v879_v32 = vsub.s32 0, %v4668_v51 }
 0x27f   : > { %vm1430_vm7 = vcmp.lt.s32.totalorder %v4670_v57, 4  ;;  %v1445_v11 = vshrl.u32 %v4649_v35, 16  ;;  %vm4687_vm9 = vcmp.le.f32.partialorder %v775_v47, 0.7853982  ;;  %v1426_v23 = vor.u32 %v1425_v43, %v1424_v28 }
 0x280   : > { %v2614_v4 = vadd.f32 1.0, %v2613_v38  ;;  %v2621_v36 = vadd.f32 1.0, %v2620_v20  ;;  %v880_v12 = vsel %vm878_vm5, %v879_v32, %v4668_v51  ;;  %vm1429_vm8 = vcmp.lt.s32.totalorder %v4670_v57, 3 }
 0x281   : > { %v881_v3 = vclz %v880_v12  ;;  %v1411_v5 = vshrl.u32 %v3089_v48, %v1410_v45  ;;  %v1435_v15 = vsel %vm1427_vm6, %v1414_v44, %v1417_v40  ;;  %v2940_v14 = vadd.s32 4294967169, %v2019_v58 }
 0x282   : > { %v2622_v55 = vmul.f32 %v2621_v36, %v2606_v10  ;;  %v2631_v24 = vxor.u32 2147483648, %v2614_v4  ;;  %v4697_v10 = vsel %vm777_vm1, %v899_v6, %v875_v62  ;;  %vm1428_vm11 = vcmp.lt.s32.totalorder %v4670_v57, 2 }
 0x283   : > { %v2917_v8 = vadd.s32 4294967294, %v881_v3  ;;  %v1436_v47 = vsel %vm1430_vm7, %v1423_v22, 920167782  ;;  %v1439_v34 = vsel %vm1427_vm6, %v1417_v40, %v1420_v60  ;;  %v1440_v37 = vsel %vm1430_vm7, %v1426_v23, 1326507024 }
 0x284   : > { %v2628_v0 = vxor.u32 2147483648, %v2622_v55  ;;  %v2632_v13 = vsel %vm2630_vm0, %v2631_v24, %v2622_v55  ;;  %v1437_v45 = vsel %vm1429_vm8, %v1420_v60, %v1436_v47  ;;  %v1432_v31 = vsel %vm1430_vm7, %v1420_v60, 2102212464 }
 0x285   : > { %vm2918_vm10 = vcmp.lt.s32.totalorder %v2917_v8, 0  ;;  %v1438_v58 = vsel %vm1428_vm11, %v1435_v15, %v1437_v45  ;;  %v1441_v9 = vsel %vm1429_vm8, %v1423_v22, %v1440_v37  ;;  %v2025_v17 = vadd.s32 1, %v2940_v14 }
 0x286   : > { %v2629_v62 = vsel %vm2627_vm2, %v2614_v4, %v2628_v0  ;;  %v884_v18 = vsel %vm2918_vm10, 0, %v2917_v8  ;;  %v1468_v42 = vand.u32 65535, %v1438_v58  ;;  %v1469_v25 = vshrl.u32 %v1438_v58, 16 }
 0x287   : > { %v2633_v33 = vsel %vm2626_vm3, %v2629_v62, %v2632_v13  ;;  %v885_v16 = vsub.s32 32, %v884_v18  ;;  %v889_v53 = vsub.s32 4294967266, %v884_v18  ;;  %v886_v19 = vshll.u32 %v4668_v51, %v884_v18 }
 0x288   : > { %v2634_v63 = vsel %vm2623_vm4, nan, %v2633_v33  ;;  %v1442_v26 = vsel %vm1428_vm11, %v1439_v34, %v1441_v9  ;;  %v1471_v38 = vmul.u32 %v1469_v25, %v4658_v30  ;;  %v902_v6 = vsel %vm4687_vm9, 0, %v4697_v10 }
 0x289   : > { %2804 = vst [vmem:[%s3525_s20 + $0x70] sm:$0xff] %v2634_v63  ;;  %v887_v29 = vshrl.u32 %v4654_v2, %v885_v16  ;;  %v890_v41 = vadd.s32 127, %v889_v53  ;;  %v1446_v28 = vand.u32 65535, %v1442_v26  ;;  %v1447_v43 = vshrl.u32 %v1442_v26, 16 }
 0x28a   : > { %v1472_v22 = vmul.u32 %v1468_v42, %v1445_v11  ;;  %v1431_v51 = vsel %vm1427_vm6, %v1411_v5, %v1414_v44  ;;  %v1433_v2 = vsel %vm1429_vm8, %v1417_v40, %v1432_v31  ;;  %v1470_v3 = vmul.u32 %v1468_v42, %v4658_v30 }
 0x28b   : > { %v888_v20 = vor.u32 %v887_v29, %v886_v19  ;;  %v891_v32 = vshll.u32 %v890_v41, 23  ;;  %v1449_v4 = vmul.u32 %v1447_v43, %v4658_v30  ;;  %v1450_v36 = vmul.u32 %v1446_v28, %v1445_v11 }
 0x28c   : > { %v1473_v60 = vmul.u32 %v1469_v25, %v1445_v11  ;;  %v1474_v55 = vshll.u32 %v1471_v38, 16  ;;  %v1448_v23 = vmul.u32 %v1446_v28, %v4658_v30  ;;  %v1451_v8 = vmul.u32 %v1447_v43, %v1445_v11 }
 0x28d   : > { %v892_v12 = vor.u32 4788187, %v891_v32  ;;  %v895_v24 = vcvt.s32.f32 %v888_v20  ;;  %v1452_v15 = vshll.u32 %v1449_v4, 16  ;;  %v1454_v0 = vshll.u32 %v1450_v36, 16 }
 0x28e   : > { %v1476_v10 = vshll.u32 %v1472_v22, 16  ;;  %vm1478_vm14 = vc.u32 %v1470_v3, %v1474_v55  ;;  %v1480_v5 = vadd.s32 %v1474_v55, %v1470_v3  ;;  %vm2026_vm13 = vcmp.gt.s32.totalorder %v2025_v17, 0 }
 0x28f   : > { %v893_v14 = vand.u32 2147483647, %v892_v12  ;;  %vm1456_vm12 = vc.u32 %v1448_v23, %v1452_v15  ;;  %v1458_v44 = vadd.s32 %v1452_v15, %v1448_v23  ;;  %v1479_v40 = vsel %vm1478_vm14, 1, %v3095_v7 }
 0x290   : > { %v1457_v13 = vsel %vm1456_vm12, 1, %v3095_v7  ;;  %v1481_v45 = vadd.s32 %v1479_v40, %v1473_v60  ;;  %v1475_v62 = vshrl.u32 %v1471_v38, 16  ;;  %vm1482_vm0 = vc.u32 %v1480_v5, %v1476_v10 }
 0x291   : > { %v896_v47 = vmul.f32 %v895_v24, %v893_v14  ;;  %v1459_v34 = vadd.s32 %v1457_v13, %v1451_v8  ;;  %vm1460_vm15 = vc.u32 %v1458_v44, %v1454_v0  ;;  %v1483_v18 = vsel %vm1482_vm0, 1, %v3095_v7 }
 0x292   : > { %v1461_v11 = vsel %vm1460_vm15, 1, %v3095_v7  ;;  %v2027_v58 = vsel %vm2026_vm13, %v2025_v17, 0  ;;  %v1453_v37 = vshrl.u32 %v1449_v4, 16  ;;  %v1485_v16 = vadd.s32 %v1483_v18, %v1481_v45 }
 0x293   : > { %v897_v30 = vxor.u32 2147483648, %v896_v47  ;;  %v1463_v33 = vadd.s32 %v1461_v11, %v1459_v34  ;;  %v2029_v53 = vand.u32 31, %v2027_v58  ;;  %v1434_v63 = vsel %vm1428_vm11, %v1431_v51, %v1433_v2 }
 0x294   : > { %v1455_v9 = vshrl.u32 %v1450_v36, 16  ;;  %v1477_v42 = vshrl.u32 %v1472_v22, 16  ;;  %v1486_v29 = vadd.s32 %v1485_v16, %v1475_v62  ;;  %v919_v28 = vadd.s32 3, %v902_v6 }
 0x295   : > { %v898_v31 = vsel %vm777_vm1, %v897_v30, %v896_v47  ;;  %v1464_v19 = vadd.s32 %v1463_v33, %v1453_v37  ;;  %v4749_v41 = vsub.s32 32, %v2029_v53  ;;  %v2022_v43 = vand.u32 8388607, %v2015_v21 }
 0x296   : > { %v901_v25 = vsel %vm4687_vm9, %v4427_v46, %v898_v31  ;;  %v4755_v17 = vadd.s32 %v1480_v5, %v1476_v10  ;;  %v1487_v57 = vadd.s32 %v1486_v29, %v1477_v42  ;;  %v1488_v20 = vmul.u32 %v4649_v35, %v1434_v63 }
 0x297   : > { %v903_v26 = vmul.f32 %v901_v25, %v901_v25  ;;  %v4753_v38 = vadd.s32 %v1464_v19, %v1455_v9  ;;  %v4758_v59 = vshrl.u32 %v2027_v58, 5  ;;  %v2035_v51 = vshll.u32 %v3090_v50, %v2029_v53 }
 0x298   : > { %v1491_v6 = vadd.s32 1, %v1487_v57  ;;  %v2036_v2 = vshrl.u32 %v3091_v52, %v4749_v41  ;;  %v2039_v4 = vshrl.u32 %v3092_v54, %v4749_v41  ;;  %v2033_v35 = vshrl.u32 %v3090_v50, %v4749_v41 }
 0x299   : > { %v904_v32 = vmul.f32 -0.001358992, %v903_v26  ;;  %v911_v22 = vmul.f32 -0.00019511016, %v903_v26  ;;  %vm1490_vm1 = vc.u32 %v4753_v38, %v4755_v17  ;;  %v2038_v3 = vshll.u32 %v3091_v52, %v2029_v53 }
 0x29a   : > { %v1492_v60 = vsel %vm1490_vm1, %v1491_v6, %v1487_v57  ;;  %v2041_v55 = vshll.u32 %v3092_v54, %v2029_v53  ;;  %v2042_v24 = vshrl.u32 %v3093_v56, %v4749_v41  ;;  %v2044_v23 = vshll.u32 %v3093_v56, %v2029_v53 }
 0x29b   : > { %v905_v36 = vadd.f32 0.041655596, %v904_v32  ;;  %v912_v12 = vadd.f32 0.008332121, %v911_v22  ;;  %v1493_v14 = vadd.s32 %v1492_v60, %v1488_v20  ;;  %v2045_v0 = vshrl.u32 %v3094_v1, %v4749_v41 }
 0x29c   : > { %v2032_v10 = vshll.u32 %v3089_v48, %v2029_v53  ;;  %v4777_v44 = vor.u32 %v2036_v2, %v2035_v51  ;;  %v4779_v40 = vor.u32 %v2039_v4, %v2038_v3  ;;  %v2043_v5 = vor.u32 %v2042_v24, %v2041_v55  ;;  %v307_v3 = vpop.f32.mrf.mxu3 }
 0x29d   : > { %v906_v8 = vmul.f32 %v905_v36, %v903_v26  ;;  %v913_v15 = vmul.f32 %v912_v12, %v903_v26  ;;  %v1494_v45 = vadd.s32 536870912, %v1493_v14  ;;  %v2046_v34 = vor.u32 %v2045_v0, %v2044_v23 }
 0x29e   : > { %v920_v62 = vand.u32 3, %v919_v28  ;;  %v2023_v30 = vor.u32 8388608, %v2022_v43  ;;  %v4781_v11 = vor.u32 %v2033_v35, %v2032_v10  ;;  %vm2050_vm2 = vcmp.lt.s32.totalorder %v4758_v59, 4 }
 0x29f   : > { %v907_v47 = vadd.f32 -0.4999988, %v906_v8  ;;  %v914_v13 = vadd.f32 -0.16666654, %v913_v15  ;;  %v4783_v37 = vshrl.u32 %v1494_v45, 30  ;;  %vm2047_vm3 = vcmp.lt.s32.totalorder %v4758_v59, 1 }
 0x2a0   : > { %vm2049_vm5 = vcmp.lt.s32.totalorder %v4758_v59, 3  ;;  %v2056_v33 = vsel %vm2050_vm2, %v2043_v5, 920167782  ;;  %v2060_v16 = vsel %vm2050_vm2, %v2046_v34, 1326507024  ;;  %v2059_v9 = vsel %vm2047_vm3, %v4777_v44, %v4779_v40 }
 0x2a1   : > { %v908_v18 = vmul.f32 %v907_v47, %v903_v26  ;;  %v915_v58 = vmul.f32 %v914_v13, %v903_v26  ;;  %v1496_v63 = vshll.u32 %v4783_v37, 30  ;;  %v2055_v42 = vsel %vm2047_vm3, %v4781_v11, %v4777_v44 }
 0x2a2   : > { %v2057_v19 = vsel %vm2049_vm5, %v4779_v40, %v2056_v33  ;;  %v2061_v29 = vsel %vm2049_vm5, %v2043_v5, %v2060_v16  ;;  %v4806_v26 = vshll.u32 %v2023_v30, 8  ;;  %vm2048_vm4 = vcmp.lt.s32.totalorder %v4758_v59, 2 }
 0x2a3   : > { %v909_v53 = vadd.f32 1.0, %v908_v18  ;;  %v916_v31 = vadd.f32 1.0, %v915_v58  ;;  %v1497_v57 = vsub.s32 %v1493_v14, %v1496_v63  ;;  %vm921_vm6 = vcmp.lt.s32.totalorder %v920_v62, 2 }
 0x2a4   : > { %vm922_vm7 = vcmp.eq.s32.totalorder %v920_v62, 0  ;;  %v2062_v20 = vsel %vm2048_vm4, %v2059_v9, %v2061_v29  ;;  %v2058_v51 = vsel %vm2048_vm4, %v2055_v42, %v2057_v19  ;;  %vm925_vm8 = vcmp.eq.s32.totalorder %v920_v62, 2 }
 0x2a5   : > { %v917_v28 = vmul.f32 %v916_v31, %v901_v25  ;;  %v926_v43 = vxor.u32 2147483648, %v909_v53  ;;  %vm1498_vm9 = vcmp.lt.s32.totalorder %v1497_v57, 0  ;;  %v1499_v22 = vsub.s32 0, %v1497_v57 }
 0x2a6   : > { %v2064_v6 = vand.u32 65535, %v4806_v26  ;;  %v2066_v25 = vand.u32 65535, %v2062_v20  ;;  %v2067_v2 = vshrl.u32 %v2062_v20, 16  ;;  %v2065_v35 = vshrl.u32 %v4806_v26, 16 }
 0x2a7   : > { %v923_v32 = vxor.u32 2147483648, %v917_v28  ;;  %v927_v36 = vsel %vm925_vm8, %v926_v43, %v917_v28  ;;  %v1500_v12 = vsel %vm1498_vm9, %v1499_v22, %v1497_v57  ;;  %vm918_vm11 = vweird.f32 %v4427_v46 }
 0x2a8   : > { %v1501_v55 = vclz %v1500_v12  ;;  %v2089_v24 = vshrl.u32 %v2058_v51, 16  ;;  %v2069_v8 = vmul.u32 %v2067_v2, %v2064_v6  ;;  %v2070_v15 = vmul.u32 %v2066_v25, %v2065_v35 }
 0x2a9   : > { %v924_v4 = vsel %vm922_vm7, %v909_v53, %v923_v32  ;;  %v2088_v14 = vand.u32 65535, %v2058_v51  ;;  %v4819_v10 = vadd.f32 %v4614_v49, %v307_v3  ;;  %v1489_v5 = vadd.s32 %v4755_v17, %v4753_v38 }
 0x2aa   : > { %v928_v60 = vsel %vm921_vm6, %v924_v4, %v927_v36  ;;  %v2929_v0 = vadd.s32 4294967294, %v1501_v55  ;;  %v2068_v47 = vmul.u32 %v2066_v25, %v2064_v6  ;;  %v2071_v13 = vmul.u32 %v2067_v2, %v2065_v35 }
 0x2ab   : > { %v929_v23 = vsel %vm918_vm11, nan, %v928_v60  ;;  %v2072_v45 = vshll.u32 %v2069_v8, 16  ;;  %v2073_v46 = vshrl.u32 %v2069_v8, 16  ;;  %v2074_v34 = vshll.u32 %v2070_v15, 16 }
 0x2ac   : > { %2793 = vst [vmem:[%s3525_s20 + $0x18] sm:$0xff] %v929_v23  ;;  %vm2930_vm10 = vcmp.lt.s32.totalorder %v2929_v0, 0  ;;  %v2091_v62 = vmul.u32 %v2089_v24, %v2064_v6  ;;  %v2092_v58 = vmul.u32 %v2088_v14, %v2065_v35  ;;  %v2090_v49 = vmul.u32 %v2088_v14, %v2064_v6 }
 0x2ad   : > { %v1504_v30 = vsel %vm2930_vm10, 0, %v2929_v0  ;;  %vm2076_vm14 = vc.u32 %v2068_v47, %v2072_v45  ;;  %v2078_v18 = vadd.s32 %v2072_v45, %v2068_v47  ;;  %v2093_v63 = vmul.u32 %v2089_v24, %v2065_v35 }
 0x2ae   : > { %v1505_v33 = vsub.s32 32, %v1504_v30  ;;  %v1509_v16 = vsub.s32 4294967266, %v1504_v30  ;;  %v2077_v53 = vsel %vm2076_vm14, 1, %v3095_v7  ;;  %v2094_v38 = vshll.u32 %v2091_v62, 16 }
 0x2af   : > { %v2079_v31 = vadd.s32 %v2077_v53, %v2071_v13  ;;  %vm2080_vm12 = vc.u32 %v2078_v18, %v2074_v34  ;;  %v1506_v17 = vshll.u32 %v1497_v57, %v1504_v30  ;;  %v2096_v28 = vshll.u32 %v2092_v58, 16 }
 0x2b0   : > { %v1507_v9 = vshrl.u32 %v1489_v5, %v1505_v33  ;;  %v1510_v42 = vadd.s32 127, %v1509_v16  ;;  %v2081_v19 = vsel %vm2080_vm12, 1, %v3095_v7  ;;  %vm2098_vm13 = vc.u32 %v2090_v49, %v2094_v38 }
 0x2b1   : > { %v2083_v29 = vadd.s32 %v2081_v19, %v2079_v31  ;;  %v2100_v43 = vadd.s32 %v2094_v38, %v2090_v49  ;;  %v2031_v22 = vshrl.u32 %v3089_v48, %v4749_v41  ;;  %v2099_v51 = vsel %vm2098_vm13, 1, %v3095_v7 }
 0x2b2   : > { %v1508_v20 = vor.u32 %v1507_v9, %v1506_v17  ;;  %v1511_v32 = vshll.u32 %v1510_v42, 23  ;;  %v2052_v6 = vsel %vm2050_vm2, %v4779_v40, 2102212464  ;;  %v2101_v25 = vadd.s32 %v2099_v51, %v2093_v63 }
 0x2b3   : > { %v2084_v57 = vadd.s32 %v2083_v29, %v2073_v46  ;;  %vm2102_vm15 = vc.u32 %v2100_v43, %v2096_v28  ;;  %v2051_v4 = vsel %vm2047_vm3, %v2031_v22, %v4781_v11  ;;  %v2075_v36 = vshrl.u32 %v2070_v15, 16 }
 0x2b4   : > { %v1512_v2 = vor.u32 4788187, %v1511_v32  ;;  %v2103_v12 = vsel %vm2102_vm15, 1, %v3095_v7  ;;  %v1519_v35 = vsub.s32 4, %v4783_v37  ;;  %v2095_v41 = vshrl.u32 %v2091_v62, 16 }
 0x2b5   : > { %v2105_v3 = vadd.s32 %v2103_v12, %v2101_v25  ;;  %v2638_v60 = vand.u32 2139095040, %v4819_v10  ;;  %v1515_v24 = vcvt.s32.f32 %v1508_v20  ;;  %v2053_v40 = vsel %vm2049_vm5, %v4777_v44, %v2052_v6 }
 0x2b6   : > { %v1513_v55 = vand.u32 2147483647, %v1512_v2  ;;  %v4840_v23 = vadd.s32 %v2084_v57, %v2075_v36  ;;  %v2097_v8 = vshrl.u32 %v2092_v58, 16  ;;  %vm1397_vm0 = vcmp.lt.s32.totalorder %v4617_v39, 0 }
 0x2b7   : > { %v2106_v14 = vadd.s32 %v2105_v3, %v2095_v41  ;;  %v2639_v11 = vshrl.u32 %v2638_v60, 23  ;;  %v4843_v0 = vadd.s32 %v2100_v43, %v2096_v28  ;;  %v2635_v5 = vand.u32 2147483647, %v4819_v10 }
 0x2b8   : > { %v1516_v15 = vmul.f32 %v1515_v24, %v1513_v55  ;;  %v1520_v47 = vsel %vm1397_vm0, %v1519_v35, %v4783_v37  ;;  %v2054_v13 = vsel %vm2048_vm4, %v2051_v4, %v2053_v40  ;;  %vm1396_vm2 = vcmp.le.f32.partialorder %v1395_v27, 0.7853982 }
 0x2b9   : > { %v2107_v45 = vadd.s32 %v2106_v14, %v2097_v8  ;;  %v2952_v46 = vadd.s32 4294967169, %v2639_v11  ;;  %vm2110_vm1 = vc.u32 %v4840_v23, %v4843_v0  ;;  %v1522_v18 = vsel %vm1396_vm2, 0, %v1520_v47 }
 0x2ba   : > { %v1517_v44 = vxor.u32 2147483648, %v1516_v15  ;;  %v2108_v58 = vmul.u32 %v4806_v26, %v2054_v13  ;;  %v2642_v37 = vand.u32 8388607, %v2635_v5  ;;  %v1539_v31 = vadd.s32 3, %v1522_v18 }
 0x2bb   : > { %v2111_v34 = vadd.s32 1, %v2107_v45  ;;  %v2645_v62 = vadd.s32 1, %v2952_v46  ;;  %vm1538_vm7 = vweird.f32 %v4617_v39  ;;  %vm2017_vm13 = vcmp.lt.s32.totalorder %v4643_v61, 0 }
 0x2bc   : > { %v1518_v30 = vsel %vm1397_vm0, %v1517_v44, %v1516_v15  ;;  %v2643_v9 = vor.u32 8388608, %v2642_v37  ;;  %v1540_v28 = vand.u32 3, %v1539_v31  ;;  %vm4926_vm15 = vcmp.le.f32.partialorder %v2015_v21, 0.7853982 }
 0x2bd   : > { %v1521_v59 = vsel %vm1396_vm2, %v4617_v39, %v1518_v30  ;;  %v2112_v33 = vsel %vm2110_vm1, %v2111_v34, %v2107_v45  ;;  %vm2646_vm3 = vcmp.gt.s32.totalorder %v2645_v62, 0 }
 0x2be   : > { %v1523_v16 = vmul.f32 %v1521_v59, %v1521_v59  ;;  %v2113_v53 = vadd.s32 %v2112_v33, %v2108_v58  ;;  %v2647_v49 = vsel %vm2646_vm3, %v2645_v62, 0  ;;  %v4862_v22 = vshll.u32 %v2643_v9, 8 }
 0x2bf   : > { %v2649_v63 = vand.u32 31, %v2647_v49  ;;  %v4864_v51 = vshrl.u32 %v2647_v49, 5  ;;  %vm1542_vm5 = vcmp.eq.s32.totalorder %v1540_v28, 0  ;;  %vm1541_vm4 = vcmp.lt.s32.totalorder %v1540_v28, 2 }
 0x2c0   : > { %v1524_v38 = vmul.f32 -0.001358992, %v1523_v16  ;;  %v1531_v27 = vmul.f32 -0.00019511016, %v1523_v16  ;;  %v2114_v17 = vadd.s32 536870912, %v2113_v53  ;;  %vm1545_vm9 = vcmp.eq.s32.totalorder %v1540_v28, 2 }
 0x2c1   : > { %v4857_v42 = vsub.s32 32, %v2649_v63  ;;  %v2652_v12 = vshll.u32 %v3089_v48, %v2649_v63  ;;  %v2655_v35 = vshll.u32 %v3090_v50, %v2649_v63  ;;  %v2661_v3 = vshll.u32 %v3092_v54, %v2649_v63 }
 0x2c2   : > { %v1525_v19 = vadd.f32 0.041655596, %v1524_v38  ;;  %v1532_v26 = vadd.f32 0.008332121, %v1531_v27  ;;  %v4859_v29 = vshrl.u32 %v2114_v17, 30  ;;  %v2664_v13 = vshll.u32 %v3093_v56, %v2649_v63 }
 0x2c3   : > { %v2653_v6 = vshrl.u32 %v3090_v50, %v4857_v42  ;;  %v2656_v57 = vshrl.u32 %v3091_v52, %v4857_v42  ;;  %v2662_v25 = vshrl.u32 %v3093_v56, %v4857_v42  ;;  %v2659_v41 = vshrl.u32 %v3092_v54, %v4857_v42 }
 0x2c4   : > { %v1526_v43 = vmul.f32 %v1525_v19, %v1523_v16  ;;  %v1533_v20 = vmul.f32 %v1532_v26, %v1523_v16  ;;  %v2116_v32 = vshll.u32 %v4859_v29, 30  ;;  %v2665_v60 = vshrl.u32 %v3094_v1, %v4857_v42 }
 0x2c5   : > { %v4880_v8 = vor.u32 %v2653_v6, %v2652_v12  ;;  %v4882_v14 = vor.u32 %v2656_v57, %v2655_v35  ;;  %v2658_v50 = vshll.u32 %v3091_v52, %v2649_v63  ;;  %v2663_v11 = vor.u32 %v2662_v25, %v2661_v3 }
 0x2c6   : > { %v1527_v2 = vadd.f32 -0.4999988, %v1526_v43  ;;  %v1534_v4 = vadd.f32 -0.16666654, %v1533_v20  ;;  %v2117_v36 = vsub.s32 %v2113_v53, %v2116_v32  ;;  %v2109_v1 = vadd.s32 %v4843_v0, %v4840_v23 }
 0x2c7   : > { %v4888_v46 = vor.u32 %v2659_v41, %v2658_v50  ;;  %v2666_v62 = vor.u32 %v2665_v60, %v2664_v13  ;;  %vm2667_vm8 = vcmp.lt.s32.totalorder %v4864_v51, 1  ;;  %vm2670_vm11 = vcmp.lt.s32.totalorder %v4864_v51, 4 }
 0x2c8   : > { %v1528_v55 = vmul.f32 %v1527_v2, %v1523_v16  ;;  %v1535_v24 = vmul.f32 %v1534_v4, %v1523_v16  ;;  %vm2118_vm6 = vcmp.lt.s32.totalorder %v2117_v36, 0  ;;  %v2119_v40 = vsub.s32 0, %v2117_v36 }
 0x2c9   : > { %v2675_v52 = vsel %vm2667_vm8, %v4880_v8, %v4882_v14  ;;  %v2684_v56 = vand.u32 65535, %v4862_v22  ;;  %vm2668_vm10 = vcmp.lt.s32.totalorder %v4864_v51, 2  ;;  %vm2669_vm14 = vcmp.lt.s32.totalorder %v4864_v51, 3 }
 0x2ca   : > { %v1529_v15 = vadd.f32 1.0, %v1528_v55  ;;  %v1536_v47 = vadd.f32 1.0, %v1535_v24  ;;  %v2120_v54 = vsel %vm2118_vm6, %v2119_v40, %v2117_v36  ;;  %v2676_v23 = vsel %vm2670_vm11, %v2663_v11, 920167782 }
 0x2cb   : > { %v2121_v45 = vclz %v2120_v54  ;;  %v2677_v58 = vsel %vm2669_vm14, %v4888_v46, %v2676_v23  ;;  %v2679_v37 = vsel %vm2667_vm8, %v4882_v14, %v4888_v46  ;;  %v2680_v53 = vsel %vm2670_vm11, %v2666_v62, 1326507024 }
 0x2cc   : > { %v1537_v44 = vmul.f32 %v1536_v47, %v1521_v59  ;;  %v1546_v34 = vxor.u32 2147483648, %v1529_v15  ;;  %v2678_v16 = vsel %vm2668_vm10, %v2675_v52, %v2677_v58  ;;  %v2685_v38 = vshrl.u32 %v4862_v22, 16 }
 0x2cd   : > { %v2941_v30 = vadd.s32 4294967294, %v2121_v45  ;;  %v2681_v17 = vsel %vm2669_vm14, %v2663_v11, %v2680_v53  ;;  %v2708_v9 = vand.u32 65535, %v2678_v16  ;;  %v2709_v19 = vshrl.u32 %v2678_v16, 16 }
 0x2ce   : > { %v1543_v18 = vxor.u32 2147483648, %v1537_v44  ;;  %v1547_v0 = vsel %vm1545_vm9, %v1546_v34, %v1537_v44  ;;  %v2682_v28 = vsel %vm2668_vm10, %v2679_v37, %v2681_v17  ;;  %v2651_v45 = vshrl.u32 %v3089_v48, %v4857_v42 }
 0x2cf   : > { %vm2942_vm12 = vcmp.lt.s32.totalorder %v2941_v30, 0  ;;  %v2686_v32 = vand.u32 65535, %v2682_v28  ;;  %v2687_v6 = vshrl.u32 %v2682_v28, 16  ;;  %v2711_v57 = vmul.u32 %v2709_v19, %v2684_v56 }
 0x2d0   : > { %v1544_v59 = vsel %vm1542_vm5, %v1529_v15, %v1543_v18  ;;  %v2124_v33 = vsel %vm2942_vm12, 0, %v2941_v30  ;;  %v2712_v4 = vmul.u32 %v2708_v9, %v2685_v38  ;;  %v2710_v41 = vmul.u32 %v2708_v9, %v2684_v56 }
 0x2d1   : > { %v1548_v49 = vsel %vm1541_vm4, %v1544_v59, %v1547_v0  ;;  %v2125_v31 = vsub.s32 32, %v2124_v33  ;;  %v2129_v63 = vsub.s32 4294967266, %v2124_v33  ;;  %v2126_v26 = vshll.u32 %v2117_v36, %v2124_v33 }
 0x2d2   : > { %v1549_v27 = vsel %vm1538_vm7, nan, %v1548_v49  ;;  %v2689_v39 = vmul.u32 %v2687_v6, %v2684_v56  ;;  %v2690_v12 = vmul.u32 %v2686_v32, %v2685_v38  ;;  %v2713_v3 = vmul.u32 %v2709_v19, %v2685_v38 }
 0x2d3   : > { %2797 = vst [vmem:[%s3525_s20 + $0x38] sm:$0xff] %v1549_v27  ;;  %v2127_v43 = vshrl.u32 %v2109_v1, %v2125_v31  ;;  %v2130_v20 = vadd.s32 127, %v2129_v63  ;;  %v2714_v60 = vshll.u32 %v2711_v57, 16  ;;  %v2688_v24 = vmul.u32 %v2686_v32, %v2684_v56 }
 0x2d4   : > { %v2691_v40 = vmul.u32 %v2687_v6, %v2685_v38  ;;  %v2692_v50 = vshll.u32 %v2689_v39, 16  ;;  %v2694_v15 = vshll.u32 %v2690_v12, 16  ;;  %v2716_v47 = vshll.u32 %v2712_v4, 16 }
 0x2d5   : > { %v2128_v25 = vor.u32 %v2127_v43, %v2126_v26  ;;  %v2131_v2 = vshll.u32 %v2130_v20, 23  ;;  %vm2718_vm0 = vc.u32 %v2710_v41, %v2714_v60  ;;  %v2720_v21 = vadd.s32 %v2714_v60, %v2710_v41 }
 0x2d6   : > { %vm2696_vm1 = vc.u32 %v2688_v24, %v2692_v50  ;;  %v2698_v54 = vadd.s32 %v2692_v50, %v2688_v24  ;;  %v2719_v13 = vsel %vm2718_vm0, 1, %v3095_v7  ;;  %v2672_v62 = vsel %vm2670_vm11, %v4888_v46, 2102212464 }
 0x2d7   : > { %v2132_v36 = vor.u32 4788187, %v2131_v2  ;;  %v2135_v55 = vcvt.s32.f32 %v2128_v25  ;;  %v2697_v44 = vsel %vm2696_vm1, 1, %v3095_v7  ;;  %v2721_v34 = vadd.s32 %v2719_v13, %v2713_v3 }
 0x2d8   : > { %v2699_v30 = vadd.s32 %v2697_v44, %v2691_v40  ;;  %vm2700_vm2 = vc.u32 %v2698_v54, %v2694_v15  ;;  %vm2722_vm3 = vc.u32 %v2720_v21, %v2716_v47  ;;  %v2139_v56 = vsub.s32 4, %v4859_v29 }
 0x2d9   : > { %v2133_v11 = vand.u32 2147483647, %v2132_v36  ;;  %v2701_v18 = vsel %vm2700_vm2, 1, %v3095_v7  ;;  %v2723_v23 = vsel %vm2722_vm3, 1, %v3095_v7  ;;  %v2693_v0 = vshrl.u32 %v2689_v39, 16 }
 0x2da   : > { %v2703_v58 = vadd.s32 %v2701_v18, %v2699_v30  ;;  %v2715_v48 = vshrl.u32 %v2711_v57, 16  ;;  %v2725_v42 = vadd.s32 %v2723_v23, %v2721_v34  ;;  %v2671_v46 = vsel %vm2667_vm8, %v2651_v45, %v4880_v8 }
 0x2db   : > { %v2136_v1 = vmul.f32 %v2135_v55, %v2133_v11  ;;  %v2673_v59 = vsel %vm2669_vm14, %v4882_v14, %v2672_v62  ;;  %v2695_v33 = vshrl.u32 %v2690_v12, 16  ;;  %v2717_v53 = vshrl.u32 %v2712_v4, 16 }
 0x2dc   : > { %v2704_v16 = vadd.s32 %v2703_v58, %v2693_v0  ;;  %v2726_v49 = vadd.s32 %v2725_v42, %v2715_v48  ;;  %v2674_v63 = vsel %vm2668_vm10, %v2671_v46, %v2673_v59  ;;  %v2724_v27 = vadd.s32 %v2720_v21, %v2716_v47 }
 0x2dd   : > { %v2137_v52 = vxor.u32 2147483648, %v2136_v1  ;;  %v2140_v14 = vsel %vm2017_vm13, %v2139_v56, %v4859_v29  ;;  %v2728_v20 = vmul.u32 %v4862_v22, %v2674_v63  ;;  %vm2158_vm8 = vweird.f32 %v4643_v61 }
 0x2de   : > { %v2705_v38 = vadd.s32 %v2704_v16, %v2695_v33  ;;  %v2727_v17 = vadd.s32 %v2726_v49, %v2717_v53  ;;  %v2142_v51 = vsel %vm4926_vm15, 0, %v2140_v14  ;;  %vm2637_vm10 = vcmp.lt.s32.totalorder %v4819_v10, 0 }
 0x2df   : > { %v2138_v37 = vsel %vm2017_vm13, %v2137_v52, %v2136_v1  ;;  %v2159_v39 = vadd.s32 3, %v2142_v51  ;;  %vm2636_vm14 = vcmp.le.f32.partialorder %v2635_v5, 0.7853982  ;;  %vm2778_vm0 = vweird.f32 %v4819_v10 }
 0x2e0   : > { %v2141_v7 = vsel %vm4926_vm15, %v4643_v61, %v2138_v37  ;;  %vm2730_vm5 = vc.u32 %v2705_v38, %v2724_v27  ;;  %v2731_v19 = vadd.s32 1, %v2727_v17  ;;  %v2729_v44 = vadd.s32 %v2724_v27, %v2705_v38 }
 0x2e1   : > { %v2143_v31 = vmul.f32 %v2141_v7, %v2141_v7  ;;  %v2160_v55 = vand.u32 3, %v2159_v39 }
 0x2e2   : > { %v2732_v28 = vsel %vm2730_vm5, %v2731_v19, %v2727_v17 }
 0x2e3   : > { %v2144_v8 = vmul.f32 -0.001358992, %v2143_v31  ;;  %v2151_v9 = vmul.f32 -0.00019511016, %v2143_v31  ;;  %v2733_v57 = vadd.s32 %v2732_v28, %v2728_v20  ;;  %vm2162_vm6 = vcmp.eq.s32.totalorder %v2160_v55, 0 }
 0x2e4   : > { %vm2165_vm7 = vcmp.eq.s32.totalorder %v2160_v55, 2  ;;  %vm2161_vm9 = vcmp.lt.s32.totalorder %v2160_v55, 2 }
 0x2e5   : > { %v2145_v26 = vadd.f32 0.041655596, %v2144_v8  ;;  %v2152_v43 = vadd.f32 0.008332121, %v2151_v9  ;;  %v2734_v4 = vadd.s32 536870912, %v2733_v57 }
 0x2e7   : > { %v2146_v32 = vmul.f32 %v2145_v26, %v2143_v31  ;;  %v2153_v6 = vmul.f32 %v2152_v43, %v2143_v31  ;;  %v2735_v29 = vshrl.u32 %v2734_v4, 30 }
 0x2e9   : > { %v2147_v25 = vadd.f32 -0.4999988, %v2146_v32  ;;  %v2154_v2 = vadd.f32 -0.16666654, %v2153_v6  ;;  %v2736_v60 = vshll.u32 %v2735_v29, 30  ;;  %v2759_v46 = vsub.s32 4, %v2735_v29 }
 0x2eb   : > { %v2148_v12 = vmul.f32 %v2147_v25, %v2143_v31  ;;  %v2155_v36 = vmul.f32 %v2154_v2, %v2143_v31  ;;  %v2737_v40 = vsub.s32 %v2733_v57, %v2736_v60  ;;  %v2760_v53 = vsel %vm2637_vm10, %v2759_v46, %v2735_v29 }
 0x2ec   : > { %v2762_v63 = vsel %vm2636_vm14, 0, %v2760_v53 }
 0x2ed   : > { %v2149_v41 = vadd.f32 1.0, %v2148_v12  ;;  %v2156_v3 = vadd.f32 1.0, %v2155_v36  ;;  %vm2738_vm4 = vcmp.lt.s32.totalorder %v2737_v40, 0  ;;  %v2739_v50 = vsub.s32 0, %v2737_v40 }
 0x2ee   : > { %v2779_v9 = vadd.s32 3, %v2762_v63 }
 0x2ef   : > { %v2157_v24 = vmul.f32 %v2156_v3, %v2141_v7  ;;  %v2166_v22 = vxor.u32 2147483648, %v2149_v41  ;;  %v2740_v47 = vsel %vm2738_vm4, %v2739_v50, %v2737_v40 }
 0x2f0   : > { %v2741_v13 = vclz %v2740_v47  ;;  %v2780_v43 = vand.u32 3, %v2779_v9 }
 0x2f1   : > { %v2163_v35 = vxor.u32 2147483648, %v2157_v24  ;;  %v2167_v15 = vsel %vm2165_vm7, %v2166_v22, %v2157_v24 }
 0x2f2   : > { %v2953_v1 = vadd.s32 4294967294, %v2741_v13  ;;  %vm2782_vm12 = vcmp.eq.s32.totalorder %v2780_v43, 0  ;;  %vm2785_vm13 = vcmp.eq.s32.totalorder %v2780_v43, 2  ;;  %vm2781_vm15 = vcmp.lt.s32.totalorder %v2780_v43, 2 }
 0x2f3   : > { %v2164_v11 = vsel %vm2162_vm6, %v2149_v41, %v2163_v35 }
 0x2f4   : > { %v2168_v54 = vsel %vm2161_vm9, %v2164_v11, %v2167_v15  ;;  %vm2954_vm11 = vcmp.lt.s32.totalorder %v2953_v1, 0 }
 0x2f5   : > { %v2169_v21 = vsel %vm2158_vm8, nan, %v2168_v54  ;;  %v2744_v45 = vsel %vm2954_vm11, 0, %v2953_v1 }
 0x2f6   : > { %2801 = vst [vmem:[%s3525_s20 + $0x58] sm:$0xff] %v2169_v21  ;;  %v2745_v34 = vsub.s32 32, %v2744_v45  ;;  %v2749_v62 = vsub.s32 4294967266, %v2744_v45  ;;  %v2746_v30 = vshll.u32 %v2737_v40, %v2744_v45 }
 0x2f8   : > { %v2747_v52 = vshrl.u32 %v2729_v44, %v2745_v34  ;;  %v2750_v56 = vadd.s32 127, %v2749_v62 }
 0x2fa   : > { %v2748_v18 = vor.u32 %v2747_v52, %v2746_v30  ;;  %v2751_v23 = vshll.u32 %v2750_v56, 23 }
 0x2fc   : > { %v2752_v0 = vor.u32 4788187, %v2751_v23  ;;  %v2755_v48 = vcvt.s32.f32 %v2748_v18 }
 0x2fe   : > { %v2753_v58 = vand.u32 2147483647, %v2752_v0 }
 0x300   : > { %v2756_v42 = vmul.f32 %v2755_v48, %v2753_v58 }
 0x302   : > { %v2757_v61 = vxor.u32 2147483648, %v2756_v42 }
 0x304   : > { %v2758_v37 = vsel %vm2637_vm10, %v2757_v61, %v2756_v42 }
 0x305   : > { %v2761_v59 = vsel %vm2636_vm14, %v4819_v10, %v2758_v37 }
 0x306   : > { %v2763_v33 = vmul.f32 %v2761_v59, %v2761_v59 }
 0x308   : > { %v2764_v7 = vmul.f32 -0.001358992, %v2763_v33  ;;  %v2771_v16 = vmul.f32 -0.00019511016, %v2763_v33 }
 0x30a   : > { %v2765_v49 = vadd.f32 0.041655596, %v2764_v7  ;;  %v2772_v31 = vadd.f32 0.008332121, %v2771_v16 }
 0x30c   : > { %v2766_v38 = vmul.f32 %v2765_v49, %v2763_v33  ;;  %v2773_v27 = vmul.f32 %v2772_v31, %v2763_v33 }
 0x30e   : > { %v2767_v17 = vadd.f32 -0.4999988, %v2766_v38  ;;  %v2774_v8 = vadd.f32 -0.16666654, %v2773_v27 }
 0x310   : > { %v2768_v5 = vmul.f32 %v2767_v17, %v2763_v33  ;;  %v2775_v14 = vmul.f32 %v2774_v8, %v2763_v33 }
 0x312   : > { %v2769_v19 = vadd.f32 1.0, %v2768_v5  ;;  %v2776_v26 = vadd.f32 1.0, %v2775_v14 }
 0x314   : > { %v2777_v20 = vmul.f32 %v2776_v26, %v2761_v59  ;;  %v2786_v28 = vxor.u32 2147483648, %v2769_v19 }
 0x316   : > { %v2783_v51 = vxor.u32 2147483648, %v2777_v20  ;;  %v2787_v6 = vsel %vm2785_vm13, %v2786_v28, %v2777_v20 }
 0x318   : > { %v2784_v32 = vsel %vm2782_vm12, %v2769_v19, %v2783_v51 }
 0x319   : > { %v2788_v57 = vsel %vm2781_vm15, %v2784_v32, %v2787_v6 }
 0x31a   : > { %v2789_v25 = vsel %vm2778_vm0, nan, %v2788_v57 }
 0x31b   : > { %2805 = vst [vmem:[%s3525_s20 + $0x78] sm:$0xff] %v2789_v25 }
 0x31c   : > { %3052 = shalt.err (!%p3049_p3)
}
 0x31d   : > { %s3096_s17 = smov 128   ;;  %s3097_s20 = smov 8  }
 0x31e   : > { %2973 = dma.vmem_to_hbm [thread:$0]  (%p3156_p5), %s2820_s7, 2048, %s2822_s8, %s2807_s16, %s3096_s17, %s3096_s17, %s3097_s20  }
 0x31f PF: > { %p2979_p4 = scmp.ge.s32.totalorder %s3087_s15, 2  ;;  %s2836_s27 = sand.u32 1, %s3075_s12  }
 0x320   : > { %s2837_s28 = scalar_lea.sflag [#allocation3], %s2836_s27 }
 0x321   : > { %p2976_p7 = pnand %p2979_p4, %p3160_p6 }
 0x323   : > { %p2977_p8 = pneg %p2976_p7 }
 0x325   : > { %3070 = dma.done.wait (%p2977_p8), %s2837_s28, 2048  }
 0x326   : > { %3072 = vsyncadd (%p2977_p8), %s2837_s28, 4294965248  ;;  %p13_p9 = scmp.ge.s32.totalorder %s3143_s18, 4   ;;  %s5029_s12 = smov %s3079_s13 }
 0x327   : > { %s5030_s13 = smov %s3083_s14  ;;  %s5031_s14 = smov %s3154_s21 }
 0x328   : > { %s5032_s15 = smov %s3143_s18  ;;  %15 = sbr.rel (!%p13_p9) target bundleno = 3 (0x3), region = 67 }
 0x32d   :  { %2843 = vsyncpa [#allocation3], 1 }
 0x32e   :  { %2845 = vsyncpa [#allocation3 + $0x1], 1 }

</bundles_post_ra>
